<compile_context>
chip_gen: v7x
topology: tpu7x:2x2x1
jax: 0.10.0
libtpu: 0.0.40
codegen_flags: <defaults>
</compile_context>

<pallas_src>
import functools

import numpy as np

import jax
import jax.numpy as jnp
from jax import lax
from jax.experimental import pallas as pl
from jax.experimental.pallas import tpu as pltpu


def _round_up(x, m):
    return (x + m - 1) // m * m


def _cross_attention_kernel(q_ref, k_ref, v_ref,
                            wq_ref, wk_ref, wv_ref,
                            bq_ref, bk_ref, bv_ref,
                            *rest,
                            skv_valid, skv_pad, cache_kv, return_attn,
                            approx_recip, exp_dtype):
    """Grid = (batch, q_tile).

    q_ref       : (1, TQ,  Ep)   query tile for this (batch, q-tile)
    k_ref/v_ref : (1, Skvp, Ep)  full (padded) key/value sequence for this batch
    w*_ref      : (Ep, Ep)       pre-transposed linear weights (MXU compute dtype)
    b*_ref      : (1, Ep)        linear biases (f32)
    rest        : out_ref (1,TQ,Ep) [, attn_ref (1,TQ,Skvp)], kp_ref, vp_ref
    kp_ref/vp_ref: (Skvp, Ep) VMEM scratch holding the K/V projections.
    """
    if return_attn:
        out_ref, attn_ref, kp_ref, vp_ref = rest
    else:
        out_ref, kp_ref, vp_ref = rest
        attn_ref = None

    def _project_kv():
        k = k_ref[0].astype(wk_ref.dtype)
        v = v_ref[0].astype(wv_ref.dtype)
        kp = jnp.dot(k, wk_ref[...], preferred_element_type=jnp.float32) + bk_ref[0]
        vp = jnp.dot(v, wv_ref[...], preferred_element_type=jnp.float32) + bv_ref[0]
        kp_ref[...] = kp.astype(kp_ref.dtype)
        vp_ref[...] = vp.astype(vp_ref.dtype)

    if cache_kv:
        # K/V projection once per batch element (first Sq tile), reused after.
        @pl.when(pl.program_id(1) == 0)
        def _():
            _project_kv()
    else:
        # Small-B / fully-parallel grid: recompute per tile (cheap vs attention).
        _project_kv()

    # --- Q projection for this tile (f32 accumulate, f32 bias add). ---
    q = q_ref[0].astype(wq_ref.dtype)
    qp = jnp.dot(q, wq_ref[...], preferred_element_type=jnp.float32) + bq_ref[0]
    qp = qp.astype(kp_ref.dtype)                       # MXU operand dtype

    # --- scores = qp @ kp^T : contract LAST dims of both (no kp transpose). ---
    scores = lax.dot_general(
        qp, kp_ref[...],
        dimension_numbers=(((1,), (1,)), ((), ())),
        preferred_element_type=jnp.float32)            # (TQ, Skvp) f32

    # Mask padded key columns (zero-padded keys still pick up the key bias).
    if skv_valid != skv_pad:
        col = lax.broadcasted_iota(jnp.int32, scores.shape, 1)
        scores = jnp.where(col < skv_valid, scores, -jnp.inf)

    # --- numerically-stable softmax (elementwise math in f32). ---
    m = jnp.max(scores, axis=-1, keepdims=True)
    z = scores - m
    if exp_dtype != jnp.dtype(jnp.float32):
        # Opt-in bf16 exp (v6e/v7x: bf16 EUP ~2x transcendental throughput).
        e = jnp.exp(z.astype(exp_dtype)).astype(jnp.float32)
    else:
        e = jnp.exp(z)
    inv = pl.reciprocal(jnp.sum(e, axis=-1, keepdims=True), approx=approx_recip)
    w = e * inv                                        # (TQ, Skvp) f32

    # --- output = attn @ v (probabilities in MXU dtype, f32 accumulate). ---
    out = jnp.dot(w.astype(vp_ref.dtype), vp_ref[...],
                  preferred_element_type=jnp.float32)  # (TQ, Ep) f32

    out_ref[0] = out.astype(out_ref.dtype)
    if return_attn:
        attn_ref[0] = w.astype(attn_ref.dtype)


def cross_attention(query, key, value, wq_t, wk_t, wv_t, bq, bk, bv,
                    *, tq=None, compute_dtype=jnp.bfloat16, attn_dtype=None,
                    return_attn=True, exp_dtype=None, cache_kv=None,
                    single_buffer_resident=True):
    """query: (B,Sq,E); key/value: (B,Skv,E); w*_t: (E,E) pre-transposed; b*: (E,).

    tq           : query-tile target (None -> 512, auto-shrunk to the VMEM budget).
    compute_dtype: MXU operand dtype (bf16 default; jnp.float32 for an exact path).
    attn_dtype   : dtype of returned attention weights (None -> bfloat16; halves
                   the dominant (B,Sq,Skv) HBM write).
    return_attn  : False drops the attention-weights output entirely (biggest
                   single HBM/vst saving when the caller only needs `out`).
    exp_dtype    : None -> f32 exp; set jnp.bfloat16 on v6e/v7x to ease EUP.
    cache_kv     : None -> auto (cache per batch when B>=2 and nq>1, otherwise
                   recompute per tile and mark both grid axes parallel).
    """
    B, Sq, E = query.shape
    Skv = key.shape[1]
    out_dtype = query.dtype
    compute_dtype = jnp.dtype(compute_dtype)
    attn_dtype = jnp.dtype(jnp.bfloat16 if attn_dtype is None else attn_dtype)
    exp_dtype = jnp.dtype(jnp.float32 if exp_dtype is None else exp_dtype)

    # Lane-dense padding: E, Skv -> multiples of 128 (masked / zero-exact),
    # query tiles -> multiples of 8.
    E_pad = _round_up(E, 128)
    Skv_pad = _round_up(Skv, 128)

    # Generation-aware VMEM budget (v7x 64 MiB, v5e/v6e 128 MiB physical).
    try:
        phys_vmem = int(pltpu.get_tpu_info().vmem_capacity_bytes)
    except Exception:
        phys_vmem = 64 * 1024 * 1024          # conservative (v7x-safe) fallback
    vmem_cap = max(int(phys_vmem * 0.8), 32 * 1024 * 1024)

    in_sz = jnp.dtype(query.dtype).itemsize
    c_sz = compute_dtype.itemsize
    a_sz = attn_dtype.itemsize
    o_sz = jnp.dtype(out_dtype).itemsize

    def _est(tq_, bufs):
        return (2 * tq_ * E_pad * in_sz                    # q tile (double-buffered)
                + 2 * bufs * Skv_pad * E_pad * in_sz       # key, value blocks
                + 3 * bufs * E_pad * E_pad * c_sz          # weights
                + 3 * bufs * 8 * E_pad * 4                 # biases (sublane-padded)
                + 2 * tq_ * E_pad * o_sz                   # out tile
                + (2 * tq_ * Skv_pad * a_sz if return_attn else 0)  # attn tile
                + 2 * Skv_pad * E_pad * c_sz               # kp/vp scratch
                + 4 * tq_ * Skv_pad * 4)                   # in-kernel f32 temps

    bufs_used = 1 if single_buffer_resident else 2
    if tq is None:
        tq = 512                       # big tiles amortize ~0.35us/step overhead
    TQ = max(8, min(_round_up(tq, 8), _round_up(Sq, 8)))
    while TQ > 8 and _est(TQ, bufs_used) > vmem_cap:
        TQ = max(8, _round_up(TQ // 2, 8))
    nq = pl.cdiv(Sq, TQ)
    Sq_pad = nq * TQ
    # Limit sized for the worst case (double-buffered fallback), clamped to cap.
    vmem_limit = int(min(max(2 * _est(TQ, 2), 32 * 1024 * 1024), vmem_cap))

    if cache_kv is None:
        cache_kv = (B >= 2) and (nq > 1)
    # The cached-K/V path makes the Sq-tile axis carry state -> "arbitrary";
    # the recompute path keeps both axes "parallel" (v7x megacore at small B).
    dim_sem = ("parallel", "arbitrary") if cache_kv else ("parallel", "parallel")

    def _pad3(x, s_pad):
        s, e = x.shape[1], x.shape[2]
        if s == s_pad and e == E_pad:
            return x
        return jnp.pad(x, ((0, 0), (0, s_pad - s), (0, E_pad - e)))

    q_p = _pad3(query, Sq_pad)
    k_p = _pad3(key, Skv_pad)
    v_p = _pad3(value, Skv_pad)

    def _pad_w(w):
        if E != E_pad:
            w = jnp.pad(w, ((0, E_pad - E), (0, E_pad - E)))
        return w.astype(compute_dtype)

    def _pad_b(b):
        if E != E_pad:
            b = jnp.pad(b, (0, E_pad - E))
        return b.reshape(1, E_pad).astype(jnp.float32)

    wq_c, wk_c, wv_c = _pad_w(wq_t), _pad_w(wk_t), _pad_w(wv_t)
    bq_c, bk_c, bv_c = _pad_b(bq), _pad_b(bk), _pad_b(bv)

    kernel = functools.partial(
        _cross_attention_kernel,
        skv_valid=Skv, skv_pad=Skv_pad, cache_kv=cache_kv,
        return_attn=return_attn,
        approx_recip=bool(compute_dtype != jnp.dtype(jnp.float32)),
        exp_dtype=exp_dtype)

    def _build(single_buffer):
        # Single-buffer the blocks whose index never changes within a batch
        # (K/V) or never at all (weights/biases) -> direct VMEM headroom.
        res_kw = {"pipeline_mode": pl.Buffered(1)} if single_buffer else {}
        kv_spec = pl.BlockSpec((1, Skv_pad, E_pad), lambda b, qi: (b, 0, 0), **res_kw)
        w_spec = pl.BlockSpec((E_pad, E_pad), lambda b, qi: (0, 0), **res_kw)
        b_spec = pl.BlockSpec((1, E_pad), lambda b, qi: (0, 0), **res_kw)
        in_specs = [
            pl.BlockSpec((1, TQ, E_pad), lambda b, qi: (b, qi, 0)),   # query tile
            kv_spec, kv_spec,                                          # key, value
            w_spec, w_spec, w_spec,
            b_spec, b_spec, b_spec,
        ]
        o_spec = pl.BlockSpec((1, TQ, E_pad), lambda b, qi: (b, qi, 0))
        if return_attn:
            out_specs = [o_spec,
                         pl.BlockSpec((1, TQ, Skv_pad), lambda b, qi: (b, qi, 0))]
            out_shape = (jax.ShapeDtypeStruct((B, Sq_pad, E_pad), out_dtype),
                         jax.ShapeDtypeStruct((B, Sq_pad, Skv_pad), attn_dtype))
        else:
            out_specs = o_spec
            out_shape = jax.ShapeDtypeStruct((B, Sq_pad, E_pad), out_dtype)
        return pl.pallas_call(
            kernel,
            out_shape=out_shape,
            grid_spec=pltpu.PrefetchScalarGridSpec(
                num_scalar_prefetch=0,
                grid=(B, nq),
                in_specs=in_specs,
                out_specs=out_specs,
                scratch_shapes=[pltpu.VMEM((Skv_pad, E_pad), compute_dtype),
                                pltpu.VMEM((Skv_pad, E_pad), compute_dtype)]),
            compiler_params=pltpu.CompilerParams(
                dimension_semantics=dim_sem,
                vmem_limit_bytes=vmem_limit))

    args = (q_p, k_p, v_p, wq_c, wk_c, wv_c, bq_c, bk_c, bv_c)
    try:
        res = _build(single_buffer_resident)(*args)
    except Exception:
        if not single_buffer_resident:
            raise
        # pipeline_mode / Buffered(1) unsupported on this jax version -> default
        # double-buffered pipelining (correctness identical, slightly more VMEM).
        res = _build(False)(*args)

    if return_attn:
        out_p, attn_p = res
        return out_p[:, :Sq, :E], attn_p[:, :Sq, :Skv]
    return res[:, :Sq, :E]


def _reference(query, key, value, wq_t, wk_t, wv_t, bq, bk, bv):
    with jax.default_matmul_precision("highest"):
        q = query @ wq_t + bq
        k = key @ wk_t + bk
        v = value @ wv_t + bv
        scores = jnp.einsum('bqe,bke->bqk', q, k)
        w = jax.nn.softmax(scores, axis=-1)
        out = jnp.einsum('bqk,bke->bqe', w, v)
    return out, w


if __name__ == "__main__":
    root = jax.random.PRNGKey(0)
    kq, kk, kv, kwq, kwk, kwv, kbq, kbk, kbv = jax.random.split(root, 9)

    # Small demo shapes (padded internally to lane-dense E=128 / Skv=128).
    B, Sq, Skv, E = 2, 16, 8, 32

    query = jax.random.normal(kq, (B, Sq, E), dtype=jnp.float32)
    key_ = jax.random.normal(kk, (B, Skv, E), dtype=jnp.float32)
    value = jax.random.normal(kv, (B, Skv, E), dtype=jnp.float32)

    # Deterministic "nn.Linear"-style params (uniform in [-1/sqrt(E), 1/sqrt(E)]),
    # stored pre-transposed as (E_in, E_out).
    bound = 1.0 / np.sqrt(E)
    wq_t = jax.random.uniform(kwq, (E, E), jnp.float32, -bound, bound)
    wk_t = jax.random.uniform(kwk, (E, E), jnp.float32, -bound, bound)
    wv_t = jax.random.uniform(kwv, (E, E), jnp.float32, -bound, bound)
    bq = jax.random.uniform(kbq, (E,), jnp.float32, -bound, bound)
    bk = jax.random.uniform(kbk, (E,), jnp.float32, -bound, bound)
    bv = jax.random.uniform(kbv, (E,), jnp.float32, -bound, bound)

    out_want, attn_want = _reference(query, key_, value, wq_t, wk_t, wv_t, bq, bk, bv)

    # 1) exact f32-MXU path, tq=8 -> exercises Sq tiling + cached-K/V (pl.when).
    out32, attn32 = cross_attention(query, key_, value, wq_t, wk_t, wv_t,
                                    bq, bk, bv, tq=8,
                                    compute_dtype=jnp.float32,
                                    attn_dtype=jnp.float32)
    jax.block_until_ready((out32, attn32))
    assert jnp.allclose(out32, out_want, atol=1e-2, rtol=1e-2)
    assert jnp.allclose(attn32, attn_want, atol=1e-2, rtol=1e-2)
    assert jnp.allclose(jnp.sum(attn32, axis=-1), 1.0, atol=1e-3)

    # 2) default perf path: bf16 MXU operands + bf16 attention-weights output.
    out16, attn16 = cross_attention(query, key_, value, wq_t, wk_t, wv_t,
                                    bq, bk, bv)
    jax.block_until_ready((out16, attn16))
    assert jnp.allclose(out16, out_want, atol=5e-2, rtol=5e-2)
    assert jnp.allclose(attn16.astype(jnp.float32), attn_want, atol=5e-2, rtol=5e-2)
    assert jnp.allclose(jnp.sum(attn16.astype(jnp.float32), axis=-1), 1.0, atol=3e-2)

    # 3) attn output dropped + B=1 small-batch path (per-tile K/V recompute,
    #    both grid axes "parallel" for v7x megacore coverage).
    out_only = cross_attention(query[:1], key_[:1], value[:1], wq_t, wk_t, wv_t,
                               bq, bk, bv, tq=8, return_attn=False)
    jax.block_until_ready(out_only)
    assert jnp.allclose(out_only, out_want[:1], atol=5e-2, rtol=5e-2)

    print("KERNEL_OK")
</pallas_src>

<mosaic_0001>
module attributes {stable_mosaic.version = 11 : i64} {
  func.func @_cross_attention_kernel(%arg0: i32, %arg1: i32, %arg2: memref<1x8x128xf32, #tpu.memory_space<vmem>>, %arg3: memref<1x128x128xf32, #tpu.memory_space<vmem>>, %arg4: memref<1x128x128xf32, #tpu.memory_space<vmem>>, %arg5: memref<128x128xf32, #tpu.memory_space<vmem>>, %arg6: memref<128x128xf32, #tpu.memory_space<vmem>>, %arg7: memref<128x128xf32, #tpu.memory_space<vmem>>, %arg8: memref<1x128xf32, #tpu.memory_space<vmem>>, %arg9: memref<1x128xf32, #tpu.memory_space<vmem>>, %arg10: memref<1x128xf32, #tpu.memory_space<vmem>>, %arg11: memref<1x8x128xf32, #tpu.memory_space<vmem>>, %arg12: memref<1x8x128xf32, #tpu.memory_space<vmem>>, %arg13: memref<128x128xf32, #tpu.memory_space<vmem>>, %arg14: memref<128x128xf32, #tpu.memory_space<vmem>>) attributes {dimension_semantics = [#tpu.dimension_semantics<parallel>, #tpu.dimension_semantics<arbitrary>], iteration_bounds = array<i64: 2, 2>, scalar_prefetch = 0 : i64, scratch_operands = 2 : i64, tpu.core_type = #tpu.core_type<tc>, window_params = [{transform_indices = @transform_0, window_bounds = array<i64: 1, 8, 128>}, {pipeline_mode = #tpu.pipeline_mode<synchronous>, transform_indices = @transform_1, window_bounds = array<i64: 1, 128, 128>}, {pipeline_mode = #tpu.pipeline_mode<synchronous>, transform_indices = @transform_2, window_bounds = array<i64: 1, 128, 128>}, {pipeline_mode = #tpu.pipeline_mode<synchronous>, transform_indices = @transform_3, window_bounds = array<i64: 128, 128>}, {pipeline_mode = #tpu.pipeline_mode<synchronous>, transform_indices = @transform_4, window_bounds = array<i64: 128, 128>}, {pipeline_mode = #tpu.pipeline_mode<synchronous>, transform_indices = @transform_5, window_bounds = array<i64: 128, 128>}, {pipeline_mode = #tpu.pipeline_mode<synchronous>, transform_indices = @transform_6, window_bounds = array<i64: 1, 128>}, {pipeline_mode = #tpu.pipeline_mode<synchronous>, transform_indices = @transform_7, window_bounds = array<i64: 1, 128>}, {pipeline_mode = #tpu.pipeline_mode<synchronous>, transform_indices = @transform_8, window_bounds = array<i64: 1, 128>}, {transform_indices = @transform_9, window_bounds = array<i64: 1, 8, 128>}, {transform_indices = @transform_10, window_bounds = array<i64: 1, 8, 128>}]} {
    %c0_i32 = arith.constant 0 : i32
    %0 = arith.cmpi eq, %arg1, %c0_i32 : i32
    %1 = arith.extui %0 : i1 to i32
    %c0_i32_0 = arith.constant 0 : i32
    %2 = arith.cmpi ne, %1, %c0_i32_0 : i32
    scf.if %2 {
      %c0_22 = arith.constant 0 : index
      %c0_23 = arith.constant 0 : index
      %c0_24 = arith.constant 0 : index
      %37 = vector.load %arg3[%c0_22, %c0_23, %c0_24] : memref<1x128x128xf32, #tpu.memory_space<vmem>>, vector<1x128x128xf32>
      %38 = vector.shape_cast %37 : vector<1x128x128xf32> to vector<128x128xf32>
      %c0_25 = arith.constant 0 : index
      %c0_26 = arith.constant 0 : index
      %c0_27 = arith.constant 0 : index
      %39 = vector.load %arg4[%c0_25, %c0_26, %c0_27] : memref<1x128x128xf32, #tpu.memory_space<vmem>>, vector<1x128x128xf32>
      %40 = vector.shape_cast %39 : vector<1x128x128xf32> to vector<128x128xf32>
      %c0_28 = arith.constant 0 : index
      %c0_29 = arith.constant 0 : index
      %41 = vector.load %arg6[%c0_28, %c0_29] : memref<128x128xf32, #tpu.memory_space<vmem>>, vector<128x128xf32>
      %cst_30 = arith.constant dense<0.000000e+00> : vector<128x128xf32>
      %42 = tpu.matmul %38, %41, %cst_30 {dimension_numbers = #tpu.dot_dimension_numbers<[1], [0], [0], [1], [0, 0, 1, 1], [], []>} : vector<128x128xf32>, vector<128x128xf32>, vector<128x128xf32> -> vector<128x128xf32>
      %c0_31 = arith.constant 0 : index
      %c0_32 = arith.constant 0 : index
      %43 = vector.load %arg9[%c0_31, %c0_32] : memref<1x128xf32, #tpu.memory_space<vmem>>, vector<1x128xf32>
      %44 = vector.shape_cast %43 : vector<1x128xf32> to vector<128xf32>
      %45 = vector.shape_cast %44 : vector<128xf32> to vector<1x128xf32>
      %46 = vector.broadcast %45 : vector<1x128xf32> to vector<128x128xf32>
      %47 = arith.addf %42, %46 : vector<128x128xf32>
      %c0_33 = arith.constant 0 : index
      %c0_34 = arith.constant 0 : index
      %48 = vector.load %arg7[%c0_33, %c0_34] : memref<128x128xf32, #tpu.memory_space<vmem>>, vector<128x128xf32>
      %cst_35 = arith.constant dense<0.000000e+00> : vector<128x128xf32>
      %49 = tpu.matmul %40, %48, %cst_35 {dimension_numbers = #tpu.dot_dimension_numbers<[1], [0], [0], [1], [0, 0, 1, 1], [], []>} : vector<128x128xf32>, vector<128x128xf32>, vector<128x128xf32> -> vector<128x128xf32>
      %c0_36 = arith.constant 0 : index
      %c0_37 = arith.constant 0 : index
      %50 = vector.load %arg10[%c0_36, %c0_37] : memref<1x128xf32, #tpu.memory_space<vmem>>, vector<1x128xf32>
      %51 = vector.shape_cast %50 : vector<1x128xf32> to vector<128xf32>
      %52 = vector.shape_cast %51 : vector<128xf32> to vector<1x128xf32>
      %53 = vector.broadcast %52 : vector<1x128xf32> to vector<128x128xf32>
      %54 = arith.addf %49, %53 : vector<128x128xf32>
      %c0_38 = arith.constant 0 : index
      %c0_39 = arith.constant 0 : index
      %55 = vector.load %arg13[%c0_38, %c0_39] : memref<128x128xf32, #tpu.memory_space<vmem>>, vector<128x128xf32>
      tpu.vector_store %arg13[%c0_38, %c0_39], %47 {strides = array<i32>} : memref<128x128xf32, #tpu.memory_space<vmem>>, vector<128x128xf32>,
      %c0_40 = arith.constant 0 : index
      %c0_41 = arith.constant 0 : index
      %56 = vector.load %arg14[%c0_40, %c0_41] : memref<128x128xf32, #tpu.memory_space<vmem>>, vector<128x128xf32>
      tpu.vector_store %arg14[%c0_40, %c0_41], %54 {strides = array<i32>} : memref<128x128xf32, #tpu.memory_space<vmem>>, vector<128x128xf32>,
    } else {
    }
    %c0 = arith.constant 0 : index
    %c0_1 = arith.constant 0 : index
    %c0_2 = arith.constant 0 : index
    %3 = vector.load %arg2[%c0, %c0_1, %c0_2] : memref<1x8x128xf32, #tpu.memory_space<vmem>>, vector<1x8x128xf32>
    %4 = vector.shape_cast %3 : vector<1x8x128xf32> to vector<8x128xf32>
    %c0_3 = arith.constant 0 : index
    %c0_4 = arith.constant 0 : index
    %5 = vector.load %arg5[%c0_3, %c0_4] : memref<128x128xf32, #tpu.memory_space<vmem>>, vector<128x128xf32>
    %cst = arith.constant dense<0.000000e+00> : vector<8x128xf32>
    %6 = tpu.matmul %4, %5, %cst {dimension_numbers = #tpu.dot_dimension_numbers<[1], [0], [0], [1], [0, 0, 1, 1], [], []>} : vector<8x128xf32>, vector<128x128xf32>, vector<8x128xf32> -> vector<8x128xf32>
    %c0_5 = arith.constant 0 : index
    %c0_6 = arith.constant 0 : index
    %7 = vector.load %arg8[%c0_5, %c0_6] : memref<1x128xf32, #tpu.memory_space<vmem>>, vector<1x128xf32>
    %8 = vector.shape_cast %7 : vector<1x128xf32> to vector<128xf32>
    %9 = vector.shape_cast %8 : vector<128xf32> to vector<1x128xf32>
    %10 = vector.broadcast %9 : vector<1x128xf32> to vector<8x128xf32>
    %11 = arith.addf %6, %10 : vector<8x128xf32>
    %c0_7 = arith.constant 0 : index
    %c0_8 = arith.constant 0 : index
    %12 = vector.load %arg13[%c0_7, %c0_8] : memref<128x128xf32, #tpu.memory_space<vmem>>, vector<128x128xf32>
    %cst_9 = arith.constant dense<0.000000e+00> : vector<8x128xf32>
    %13 = tpu.matmul %11, %12, %cst_9 {dimension_numbers = #tpu.dot_dimension_numbers<[1], [1], [0], [0], [0, 0, 1, 0], [], []>} : vector<8x128xf32>, vector<128x128xf32>, vector<8x128xf32> -> vector<8x128xf32>
    %14 = tpu.iota {dimensions = array<i32: 1>} : vector<8x128xi32>
    %c8_i32 = arith.constant 8 : i32
    %15 = vector.broadcast %c8_i32 : i32 to vector<8x128xi32>
    %16 = arith.cmpi slt, %14, %15 : vector<8x128xi32>
    %cst_10 = arith.constant 0xFF800000 : f32
    %17 = vector.broadcast %cst_10 : f32 to vector<8x128xf32>
    %18 = arith.select %16, %13, %17 : vector<8x128xi1>, vector<8x128xf32>
    %cst_11 = arith.constant dense<0xFF800000> : vector<8xf32>
    %19 = vector.multi_reduction <maximumf>, %18, %cst_11 [1] : vector<8x128xf32> to vector<8xf32>
    %20 = vector.shape_cast %19 : vector<8xf32> to vector<8x1xf32>
    %21 = vector.broadcast %20 : vector<8x1xf32> to vector<8x128xf32>
    %22 = arith.subf %18, %21 : vector<8x128xf32>
    %23 = math.exp %22 : vector<8x128xf32>
    %cst_12 = arith.constant dense<0.000000e+00> : vector<8xf32>
    %24 = vector.multi_reduction <add>, %23, %cst_12 [1] : vector<8x128xf32> to vector<8xf32>
    %25 = vector.shape_cast %24 : vector<8xf32> to vector<8x1xf32>
    %26 = tpu.reciprocal %25 : vector<8x1xf32> -> vector<8x1xf32>
    %27 = vector.broadcast %26 : vector<8x1xf32> to vector<8x128xf32>
    %28 = arith.mulf %23, %27 : vector<8x128xf32>
    %c0_13 = arith.constant 0 : index
    %c0_14 = arith.constant 0 : index
    %29 = vector.load %arg14[%c0_13, %c0_14] : memref<128x128xf32, #tpu.memory_space<vmem>>, vector<128x128xf32>
    %cst_15 = arith.constant dense<0.000000e+00> : vector<8x128xf32>
    %30 = tpu.matmul %28, %29, %cst_15 {dimension_numbers = #tpu.dot_dimension_numbers<[1], [0], [0], [1], [0, 0, 1, 1], [], []>} : vector<8x128xf32>, vector<128x128xf32>, vector<8x128xf32> -> vector<8x128xf32>
    %c0_16 = arith.constant 0 : index
    %c0_17 = arith.constant 0 : index
    %c0_18 = arith.constant 0 : index
    %31 = vector.load %arg11[%c0_16, %c0_17, %c0_18] : memref<1x8x128xf32, #tpu.memory_space<vmem>>, vector<1x8x128xf32>
    %32 = vector.shape_cast %31 : vector<1x8x128xf32> to vector<8x128xf32>
    %33 = vector.shape_cast %30 : vector<8x128xf32> to vector<1x8x128xf32>
    tpu.vector_store %arg11[%c0_16, %c0_17, %c0_18], %33 {strides = array<i32>} : memref<1x8x128xf32, #tpu.memory_space<vmem>>, vector<1x8x128xf32>,
    %c0_19 = arith.constant 0 : index
    %c0_20 = arith.constant 0 : index
    %c0_21 = arith.constant 0 : index
    %34 = vector.load %arg12[%c0_19, %c0_20, %c0_21] : memref<1x8x128xf32, #tpu.memory_space<vmem>>, vector<1x8x128xf32>
    %35 = vector.shape_cast %34 : vector<1x8x128xf32> to vector<8x128xf32>
    %36 = vector.shape_cast %28 : vector<8x128xf32> to vector<1x8x128xf32>
    tpu.vector_store %arg12[%c0_19, %c0_20, %c0_21], %36 {strides = array<i32>} : memref<1x8x128xf32, #tpu.memory_space<vmem>>, vector<1x8x128xf32>,
    return
  }
  func.func @transform_0(%arg0: i32, %arg1: i32) -> (i32, i32, i32) {
    %c0_i32 = arith.constant 0 : i32
    %c0_i32_0 = arith.constant 0 : i32
    return %arg0, %arg1, %c0_i32 : i32, i32, i32
  }
  func.func @transform_1(%arg0: i32, %arg1: i32) -> (i32, i32, i32) {
    %c0_i32 = arith.constant 0 : i32
    %c0_i32_0 = arith.constant 0 : i32
    %c0_i32_1 = arith.constant 0 : i32
    return %arg0, %c0_i32, %c0_i32_0 : i32, i32, i32
  }
  func.func @transform_2(%arg0: i32, %arg1: i32) -> (i32, i32, i32) {
    %c0_i32 = arith.constant 0 : i32
    %c0_i32_0 = arith.constant 0 : i32
    %c0_i32_1 = arith.constant 0 : i32
    return %arg0, %c0_i32, %c0_i32_0 : i32, i32, i32
  }
  func.func @transform_3(%arg0: i32, %arg1: i32) -> (i32, i32) {
    %c0_i32 = arith.constant 0 : i32
    %c0_i32_0 = arith.constant 0 : i32
    %c0_i32_1 = arith.constant 0 : i32
    return %c0_i32, %c0_i32_0 : i32, i32
  }
  func.func @transform_4(%arg0: i32, %arg1: i32) -> (i32, i32) {
    %c0_i32 = arith.constant 0 : i32
    %c0_i32_0 = arith.constant 0 : i32
    %c0_i32_1 = arith.constant 0 : i32
    return %c0_i32, %c0_i32_0 : i32, i32
  }
  func.func @transform_5(%arg0: i32, %arg1: i32) -> (i32, i32) {
    %c0_i32 = arith.constant 0 : i32
    %c0_i32_0 = arith.constant 0 : i32
    %c0_i32_1 = arith.constant 0 : i32
    return %c0_i32, %c0_i32_0 : i32, i32
  }
  func.func @transform_6(%arg0: i32, %arg1: i32) -> (i32, i32) {
    %c0_i32 = arith.constant 0 : i32
    %c0_i32_0 = arith.constant 0 : i32
    %c0_i32_1 = arith.constant 0 : i32
    return %c0_i32, %c0_i32_0 : i32, i32
  }
  func.func @transform_7(%arg0: i32, %arg1: i32) -> (i32, i32) {
    %c0_i32 = arith.constant 0 : i32
    %c0_i32_0 = arith.constant 0 : i32
    %c0_i32_1 = arith.constant 0 : i32
    return %c0_i32, %c0_i32_0 : i32, i32
  }
  func.func @transform_8(%arg0: i32, %arg1: i32) -> (i32, i32) {
    %c0_i32 = arith.constant 0 : i32
    %c0_i32_0 = arith.constant 0 : i32
    %c0_i32_1 = arith.constant 0 : i32
    return %c0_i32, %c0_i32_0 : i32, i32
  }
  func.func @transform_9(%arg0: i32, %arg1: i32) -> (i32, i32, i32) {
    %c0_i32 = arith.constant 0 : i32
    %c0_i32_0 = arith.constant 0 : i32
    return %arg0, %arg1, %c0_i32 : i32, i32, i32
  }
  func.func @transform_10(%arg0: i32, %arg1: i32) -> (i32, i32, i32) {
    %c0_i32 = arith.constant 0 : i32
    %c0_i32_0 = arith.constant 0 : i32
    return %arg0, %arg1, %c0_i32 : i32, i32, i32
  }
}

module attributes {stable_mosaic.version = 11 : i64} {
  func.func @_cross_attention_kernel(%arg0: i32, %arg1: i32, %arg2: memref<1x8x128xf32, #tpu.memory_space<vmem>>, %arg3: memref<1x128x128xf32, #tpu.memory_space<vmem>>, %arg4: memref<1x128x128xf32, #tpu.memory_space<vmem>>, %arg5: memref<128x128xf32, #tpu.memory_space<vmem>>, %arg6: memref<128x128xf32, #tpu.memory_space<vmem>>, %arg7: memref<128x128xf32, #tpu.memory_space<vmem>>, %arg8: memref<1x128xf32, #tpu.memory_space<vmem>>, %arg9: memref<1x128xf32, #tpu.memory_space<vmem>>, %arg10: memref<1x128xf32, #tpu.memory_space<vmem>>, %arg11: memref<1x8x128xf32, #tpu.memory_space<vmem>>, %arg12: memref<1x8x128xf32, #tpu.memory_space<vmem>>, %arg13: memref<128x128xf32, #tpu.memory_space<vmem>>, %arg14: memref<128x128xf32, #tpu.memory_space<vmem>>) attributes {dimension_semantics = [#tpu.dimension_semantics<parallel>, #tpu.dimension_semantics<arbitrary>], iteration_bounds = array<i64: 2, 2>, scalar_prefetch = 0 : i64, scratch_operands = 2 : i64, tpu.core_type = #tpu.core_type<tc>, window_params = [{transform_indices = @transform_0, window_bounds = array<i64: 1, 8, 128>}, {transform_indices = @transform_1, window_bounds = array<i64: 1, 128, 128>}, {transform_indices = @transform_2, window_bounds = array<i64: 1, 128, 128>}, {pipeline_mode = #tpu.pipeline_mode<synchronous>, transform_indices = @transform_3, window_bounds = array<i64: 128, 128>}, {pipeline_mode = #tpu.pipeline_mode<synchronous>, transform_indices = @transform_4, window_bounds = array<i64: 128, 128>}, {pipeline_mode = #tpu.pipeline_mode<synchronous>, transform_indices = @transform_5, window_bounds = array<i64: 128, 128>}, {pipeline_mode = #tpu.pipeline_mode<synchronous>, transform_indices = @transform_6, window_bounds = array<i64: 1, 128>}, {pipeline_mode = #tpu.pipeline_mode<synchronous>, transform_indices = @transform_7, window_bounds = array<i64: 1, 128>}, {pipeline_mode = #tpu.pipeline_mode<synchronous>, transform_indices = @transform_8, window_bounds = array<i64: 1, 128>}, {transform_indices = @transform_9, window_bounds = array<i64: 1, 8, 128>}, {transform_indices = @transform_10, window_bounds = array<i64: 1, 8, 128>}]} {
    %c0_i32 = arith.constant 0 : i32
    %0 = arith.cmpi eq, %arg1, %c0_i32 : i32
    %1 = arith.extui %0 : i1 to i32
    %c0_i32_0 = arith.constant 0 : i32
    %2 = arith.cmpi ne, %1, %c0_i32_0 : i32
    scf.if %2 {
      %c0_22 = arith.constant 0 : index
      %c0_23 = arith.constant 0 : index
      %c0_24 = arith.constant 0 : index
      %37 = vector.load %arg3[%c0_22, %c0_23, %c0_24] : memref<1x128x128xf32, #tpu.memory_space<vmem>>, vector<1x128x128xf32>
      %38 = vector.shape_cast %37 : vector<1x128x128xf32> to vector<128x128xf32>
      %c0_25 = arith.constant 0 : index
      %c0_26 = arith.constant 0 : index
      %c0_27 = arith.constant 0 : index
      %39 = vector.load %arg4[%c0_25, %c0_26, %c0_27] : memref<1x128x128xf32, #tpu.memory_space<vmem>>, vector<1x128x128xf32>
      %40 = vector.shape_cast %39 : vector<1x128x128xf32> to vector<128x128xf32>
      %c0_28 = arith.constant 0 : index
      %c0_29 = arith.constant 0 : index
      %41 = vector.load %arg6[%c0_28, %c0_29] : memref<128x128xf32, #tpu.memory_space<vmem>>, vector<128x128xf32>
      %cst_30 = arith.constant dense<0.000000e+00> : vector<128x128xf32>
      %42 = tpu.matmul %38, %41, %cst_30 {dimension_numbers = #tpu.dot_dimension_numbers<[1], [0], [0], [1], [0, 0, 1, 1], [], []>} : vector<128x128xf32>, vector<128x128xf32>, vector<128x128xf32> -> vector<128x128xf32>
      %c0_31 = arith.constant 0 : index
      %c0_32 = arith.constant 0 : index
      %43 = vector.load %arg9[%c0_31, %c0_32] : memref<1x128xf32, #tpu.memory_space<vmem>>, vector<1x128xf32>
      %44 = vector.shape_cast %43 : vector<1x128xf32> to vector<128xf32>
      %45 = vector.shape_cast %44 : vector<128xf32> to vector<1x128xf32>
      %46 = vector.broadcast %45 : vector<1x128xf32> to vector<128x128xf32>
      %47 = arith.addf %42, %46 : vector<128x128xf32>
      %c0_33 = arith.constant 0 : index
      %c0_34 = arith.constant 0 : index
      %48 = vector.load %arg7[%c0_33, %c0_34] : memref<128x128xf32, #tpu.memory_space<vmem>>, vector<128x128xf32>
      %cst_35 = arith.constant dense<0.000000e+00> : vector<128x128xf32>
      %49 = tpu.matmul %40, %48, %cst_35 {dimension_numbers = #tpu.dot_dimension_numbers<[1], [0], [0], [1], [0, 0, 1, 1], [], []>} : vector<128x128xf32>, vector<128x128xf32>, vector<128x128xf32> -> vector<128x128xf32>
      %c0_36 = arith.constant 0 : index
      %c0_37 = arith.constant 0 : index
      %50 = vector.load %arg10[%c0_36, %c0_37] : memref<1x128xf32, #tpu.memory_space<vmem>>, vector<1x128xf32>
      %51 = vector.shape_cast %50 : vector<1x128xf32> to vector<128xf32>
      %52 = vector.shape_cast %51 : vector<128xf32> to vector<1x128xf32>
      %53 = vector.broadcast %52 : vector<1x128xf32> to vector<128x128xf32>
      %54 = arith.addf %49, %53 : vector<128x128xf32>
      %c0_38 = arith.constant 0 : index
      %c0_39 = arith.constant 0 : index
      %55 = vector.load %arg13[%c0_38, %c0_39] : memref<128x128xf32, #tpu.memory_space<vmem>>, vector<128x128xf32>
      tpu.vector_store %arg13[%c0_38, %c0_39], %47 {strides = array<i32>} : memref<128x128xf32, #tpu.memory_space<vmem>>, vector<128x128xf32>,
      %c0_40 = arith.constant 0 : index
      %c0_41 = arith.constant 0 : index
      %56 = vector.load %arg14[%c0_40, %c0_41] : memref<128x128xf32, #tpu.memory_space<vmem>>, vector<128x128xf32>
      tpu.vector_store %arg14[%c0_40, %c0_41], %54 {strides = array<i32>} : memref<128x128xf32, #tpu.memory_space<vmem>>, vector<128x128xf32>,
    } else {
    }
    %c0 = arith.constant 0 : index
    %c0_1 = arith.constant 0 : index
    %c0_2 = arith.constant 0 : index
    %3 = vector.load %arg2[%c0, %c0_1, %c0_2] : memref<1x8x128xf32, #tpu.memory_space<vmem>>, vector<1x8x128xf32>
    %4 = vector.shape_cast %3 : vector<1x8x128xf32> to vector<8x128xf32>
    %c0_3 = arith.constant 0 : index
    %c0_4 = arith.constant 0 : index
    %5 = vector.load %arg5[%c0_3, %c0_4] : memref<128x128xf32, #tpu.memory_space<vmem>>, vector<128x128xf32>
    %cst = arith.constant dense<0.000000e+00> : vector<8x128xf32>
    %6 = tpu.matmul %4, %5, %cst {dimension_numbers = #tpu.dot_dimension_numbers<[1], [0], [0], [1], [0, 0, 1, 1], [], []>} : vector<8x128xf32>, vector<128x128xf32>, vector<8x128xf32> -> vector<8x128xf32>
    %c0_5 = arith.constant 0 : index
    %c0_6 = arith.constant 0 : index
    %7 = vector.load %arg8[%c0_5, %c0_6] : memref<1x128xf32, #tpu.memory_space<vmem>>, vector<1x128xf32>
    %8 = vector.shape_cast %7 : vector<1x128xf32> to vector<128xf32>
    %9 = vector.shape_cast %8 : vector<128xf32> to vector<1x128xf32>
    %10 = vector.broadcast %9 : vector<1x128xf32> to vector<8x128xf32>
    %11 = arith.addf %6, %10 : vector<8x128xf32>
    %c0_7 = arith.constant 0 : index
    %c0_8 = arith.constant 0 : index
    %12 = vector.load %arg13[%c0_7, %c0_8] : memref<128x128xf32, #tpu.memory_space<vmem>>, vector<128x128xf32>
    %cst_9 = arith.constant dense<0.000000e+00> : vector<8x128xf32>
    %13 = tpu.matmul %11, %12, %cst_9 {dimension_numbers = #tpu.dot_dimension_numbers<[1], [1], [0], [0], [0, 0, 1, 0], [], []>} : vector<8x128xf32>, vector<128x128xf32>, vector<8x128xf32> -> vector<8x128xf32>
    %14 = tpu.iota {dimensions = array<i32: 1>} : vector<8x128xi32>
    %c8_i32 = arith.constant 8 : i32
    %15 = vector.broadcast %c8_i32 : i32 to vector<8x128xi32>
    %16 = arith.cmpi slt, %14, %15 : vector<8x128xi32>
    %cst_10 = arith.constant 0xFF800000 : f32
    %17 = vector.broadcast %cst_10 : f32 to vector<8x128xf32>
    %18 = arith.select %16, %13, %17 : vector<8x128xi1>, vector<8x128xf32>
    %cst_11 = arith.constant dense<0xFF800000> : vector<8xf32>
    %19 = vector.multi_reduction <maximumf>, %18, %cst_11 [1] : vector<8x128xf32> to vector<8xf32>
    %20 = vector.shape_cast %19 : vector<8xf32> to vector<8x1xf32>
    %21 = vector.broadcast %20 : vector<8x1xf32> to vector<8x128xf32>
    %22 = arith.subf %18, %21 : vector<8x128xf32>
    %23 = math.exp %22 : vector<8x128xf32>
    %cst_12 = arith.constant dense<0.000000e+00> : vector<8xf32>
    %24 = vector.multi_reduction <add>, %23, %cst_12 [1] : vector<8x128xf32> to vector<8xf32>
    %25 = vector.shape_cast %24 : vector<8xf32> to vector<8x1xf32>
    %26 = tpu.reciprocal %25 : vector<8x1xf32> -> vector<8x1xf32>
    %27 = vector.broadcast %26 : vector<8x1xf32> to vector<8x128xf32>
    %28 = arith.mulf %23, %27 : vector<8x128xf32>
    %c0_13 = arith.constant 0 : index
    %c0_14 = arith.constant 0 : index
    %29 = vector.load %arg14[%c0_13, %c0_14] : memref<128x128xf32, #tpu.memory_space<vmem>>, vector<128x128xf32>
    %cst_15 = arith.constant dense<0.000000e+00> : vector<8x128xf32>
    %30 = tpu.matmul %28, %29, %cst_15 {dimension_numbers = #tpu.dot_dimension_numbers<[1], [0], [0], [1], [0, 0, 1, 1], [], []>} : vector<8x128xf32>, vector<128x128xf32>, vector<8x128xf32> -> vector<8x128xf32>
    %c0_16 = arith.constant 0 : index
    %c0_17 = arith.constant 0 : index
    %c0_18 = arith.constant 0 : index
    %31 = vector.load %arg11[%c0_16, %c0_17, %c0_18] : memref<1x8x128xf32, #tpu.memory_space<vmem>>, vector<1x8x128xf32>
    %32 = vector.shape_cast %31 : vector<1x8x128xf32> to vector<8x128xf32>
    %33 = vector.shape_cast %30 : vector<8x128xf32> to vector<1x8x128xf32>
    tpu.vector_store %arg11[%c0_16, %c0_17, %c0_18], %33 {strides = array<i32>} : memref<1x8x128xf32, #tpu.memory_space<vmem>>, vector<1x8x128xf32>,
    %c0_19 = arith.constant 0 : index
    %c0_20 = arith.constant 0 : index
    %c0_21 = arith.constant 0 : index
    %34 = vector.load %arg12[%c0_19, %c0_20, %c0_21] : memref<1x8x128xf32, #tpu.memory_space<vmem>>, vector<1x8x128xf32>
    %35 = vector.shape_cast %34 : vector<1x8x128xf32> to vector<8x128xf32>
    %36 = vector.shape_cast %28 : vector<8x128xf32> to vector<1x8x128xf32>
    tpu.vector_store %arg12[%c0_19, %c0_20, %c0_21], %36 {strides = array<i32>} : memref<1x8x128xf32, #tpu.memory_space<vmem>>, vector<1x8x128xf32>,
    return
  }
  func.func @transform_0(%arg0: i32, %arg1: i32) -> (i32, i32, i32) {
    %c0_i32 = arith.constant 0 : i32
    %c0_i32_0 = arith.constant 0 : i32
    return %arg0, %arg1, %c0_i32 : i32, i32, i32
  }
  func.func @transform_1(%arg0: i32, %arg1: i32) -> (i32, i32, i32) {
    %c0_i32 = arith.constant 0 : i32
    %c0_i32_0 = arith.constant 0 : i32
    %c0_i32_1 = arith.constant 0 : i32
    return %arg0, %c0_i32, %c0_i32_0 : i32, i32, i32
  }
  func.func @transform_2(%arg0: i32, %arg1: i32) -> (i32, i32, i32) {
    %c0_i32 = arith.constant 0 : i32
    %c0_i32_0 = arith.constant 0 : i32
    %c0_i32_1 = arith.constant 0 : i32
    return %arg0, %c0_i32, %c0_i32_0 : i32, i32, i32
  }
  func.func @transform_3(%arg0: i32, %arg1: i32) -> (i32, i32) {
    %c0_i32 = arith.constant 0 : i32
    %c0_i32_0 = arith.constant 0 : i32
    %c0_i32_1 = arith.constant 0 : i32
    return %c0_i32, %c0_i32_0 : i32, i32
  }
  func.func @transform_4(%arg0: i32, %arg1: i32) -> (i32, i32) {
    %c0_i32 = arith.constant 0 : i32
    %c0_i32_0 = arith.constant 0 : i32
    %c0_i32_1 = arith.constant 0 : i32
    return %c0_i32, %c0_i32_0 : i32, i32
  }
  func.func @transform_5(%arg0: i32, %arg1: i32) -> (i32, i32) {
    %c0_i32 = arith.constant 0 : i32
    %c0_i32_0 = arith.constant 0 : i32
    %c0_i32_1 = arith.constant 0 : i32
    return %c0_i32, %c0_i32_0 : i32, i32
  }
  func.func @transform_6(%arg0: i32, %arg1: i32) -> (i32, i32) {
    %c0_i32 = arith.constant 0 : i32
    %c0_i32_0 = arith.constant 0 : i32
    %c0_i32_1 = arith.constant 0 : i32
    return %c0_i32, %c0_i32_0 : i32, i32
  }
  func.func @transform_7(%arg0: i32, %arg1: i32) -> (i32, i32) {
    %c0_i32 = arith.constant 0 : i32
    %c0_i32_0 = arith.constant 0 : i32
    %c0_i32_1 = arith.constant 0 : i32
    return %c0_i32, %c0_i32_0 : i32, i32
  }
  func.func @transform_8(%arg0: i32, %arg1: i32) -> (i32, i32) {
    %c0_i32 = arith.constant 0 : i32
    %c0_i32_0 = arith.constant 0 : i32
    %c0_i32_1 = arith.constant 0 : i32
    return %c0_i32, %c0_i32_0 : i32, i32
  }
  func.func @transform_9(%arg0: i32, %arg1: i32) -> (i32, i32, i32) {
    %c0_i32 = arith.constant 0 : i32
    %c0_i32_0 = arith.constant 0 : i32
    return %arg0, %arg1, %c0_i32 : i32, i32, i32
  }
  func.func @transform_10(%arg0: i32, %arg1: i32) -> (i32, i32, i32) {
    %c0_i32 = arith.constant 0 : i32
    %c0_i32_0 = arith.constant 0 : i32
    return %arg0, %arg1, %c0_i32 : i32, i32, i32
  }
}

</mosaic_0001>

<bundles_post_ra>
// kernel: tpu_custom_call.1
= control target key start
LH: loop header
LB: loop body
LE: loop exit
PB: predicated region body
PF: predicated region fallthrough
CT: control target
= control target key end

     0   :  { %s2995_s0 = inlined_call_operand.hbm [shape: f32[2,16,128], index: 0, kind: input, shape index: {}]   ;;  %s2996_s1 = inlined_call_operand.hbm [shape: f32[2,128,128], index: 1, kind: input, shape index: {}]   ;;  %s2997_s2 = inlined_call_operand.hbm [shape: f32[2,128,128], index: 2, kind: input, shape index: {}]   ;;  %s2998_s3 = inlined_call_operand.hbm [shape: f32[128,128], index: 3, kind: input, shape index: {}]   ;;  %s2999_s4 = inlined_call_operand.hbm [shape: f32[128,128], index: 4, kind: input, shape index: {}]   ;;  %s3000_s5 = inlined_call_operand.hbm [shape: f32[128,128], index: 5, kind: input, shape index: {}]   ;;  %s3001_s6 = inlined_call_operand.vmem [shape: f32[1,128], index: 6, kind: input, shape index: {}]   ;;  %s3002_s7 = inlined_call_operand.vmem [shape: f32[1,128], index: 7, kind: input, shape index: {}]   ;;  %s3003_s8 = inlined_call_operand.vmem [shape: f32[1,128], index: 8, kind: input, shape index: {}]   ;;  %s3004_s9 = inlined_call_operand.hbm [shape: f32[2,16,128], index: 9, kind: output, shape index: {0}]   ;;  %s3005_s10 = inlined_call_operand.hbm [shape: f32[2,16,128], index: 10, kind: output, shape index: {1}]  }
   0x1   :  { %3031 = sst [smem:[#allocation27_spill]] %s2995_s0 }
   0x2   :  { %3032 = sst [smem:[#allocation28_spill]] %s2996_s1 }
   0x3   :  { %3033 = sst [smem:[#allocation29_spill]] %s2997_s2 }
   0x4   :  { %3034 = sst [smem:[#allocation30_spill]] %s2998_s3 }
   0x5   :  { %3035 = sst [smem:[#allocation31_spill]] %s3001_s6 }
   0x6   :  { %3036 = sst [smem:[#allocation32_spill]] %s3002_s7 }
   0x7   :  { %3037 = sst [smem:[#allocation33_spill]] %s3003_s8 }
   0x8   :  { %3038 = sst [smem:[#allocation34_spill]] %s3004_s9 }
   0x9   :  { %3039 = sst [smem:[#allocation35_spill]] %s3005_s10 }
   0xa   :  { %16 = vsyncpa [#allocation5], 0 }
   0xb   :  { %18 = vsyncpa [#allocation5 + $0x1], 0 }
   0xc   :  { %19 = vsyncpa [#allocation8], 0 }
   0xd   :  { %20 = vsyncpa [#allocation11], 0 }
   0xe   :  { %21 = vsyncpa [#allocation14], 0 }
   0xf   :  { %22 = vsyncpa [#allocation6], 0 }
  0x10   :  { %24 = vsyncpa [#allocation6 + $0x1], 0 }
  0x11   :  { %25 = vsyncpa [#allocation17], 0 }
  0x12   :  { %27 = vsyncpa [#allocation17 + $0x1], 0  ;;  %s2459_s13 = smov 0   ;;  %s2461_s14 = smov 0  }
  0x13   :  { %s2463_s15 = smov 0   ;;  %s2465_s16 = smov 0  }
  0x14   :  { %s2467_s17 = smov 0   ;;  %s2469_s18 = smov 0  }
  0x15   :  { %s2471_s19 = smov 0   ;;  %s2473_s20 = smov 0  }
  0x16   :  { %s2475_s21 = smov 0   ;;  %s2477_s22 = smov 0  }
  0x17   :  { %s2479_s23 = smov 0  }
  0x18 LB: > { %3040 = sst [smem:[#allocation24_spill]] %s2353_s14  ;;  %s3006_s24 = sadd.s32 4294967295, %s2389_s23   ;;  %s2389_s23 = sphi %s2479_s23, %s33_s23   ;;  %s2385_s22 = sphi %s2477_s22, %s3095_s22   ;;  %s2381_s21 = sphi %s2475_s21, %s3094_s21   ;;  %s2377_s20 = sphi %s2473_s20, %s3093_s20   ;;  %s2373_s19 = sphi %s2471_s19, %s3092_s19   ;;  %s2369_s18 = sphi %s2469_s18, %s3091_s18   ;;  %s2365_s17 = sphi %s2467_s17, %s3090_s17   ;;  %s2361_s16 = sphi %s2465_s16, %s3089_s16   ;;  %s2357_s15 = sphi %s2463_s15, %s3088_s15   ;;  %s2353_s14 = sphi %s2461_s14, %s3087_s14   ;;  %s2349_s13 = sphi %s2459_s13, %s3084_s13  }
  0x19   : > { %3041 = sst [smem:[#allocation25_spill]] %s2373_s19  ;;  %p93_p0 = scmp.ne.s32.totalorder %s2353_s14, %s2349_s13 }
  0x1a   : > { %3042 = sst [smem:[#allocation26_spill]] %s2377_s20  ;;  %p2516_p1 = scmp.eq.s32.totalorder %s3006_s24, 0 }
  0x1b   : > { %p1389_p2 = scmp.ge.s32.totalorder %s2389_s23, 1  ;;  %p312_p3 = scmp.lt.s32.totalorder %s2389_s23, 5 }
  0x1c   : > { %s3043_s25 = scalar_select %p2516_p1, 1, 0 }
  0x1d   : > { %s1420_s26 = sshll.u32 %s2377_s20, 11  ;;  %p2525_p4 = por %p93_p0, %p2516_p1 }
  0x1e   : > { %s3045_s1 = sld [smem:[#allocation28_spill]]  ;;  %p2534_p5 = pnand %p1389_p2, %p312_p3 }
  0x1f   : > { %s3044_s27 = scalar_select %p2525_p4, 1, 0 }
  0x20   : > { %s3046_s11 = scalar_select %p2534_p5, 1, 0 }
  0x21   : > { %s2391_s12 = smov [#allocation7]   ;;  %p3011_p6 = pneg %p2534_p5 }
  0x22   : > { %s327_s13 = sshll.u32 %s2391_s12, 4  ;;  %s3047_s2 = sld [smem:[#allocation29_spill]]  ;;  %s2540_s13 = int_to_ptr.vmem [resolvable:$true] %s327_s13 }
  0x23   : > { %p2552_p7 = pnand %p3011_p6, %p2525_p4  ;;  %s2392_s12 = smov [#allocation10]  }
  0x24   : > { %s2532_s30 = scalar_lea.hbm %s3045_s1, %s1420_s26  ;;  %s2556_s9 = sshll.u32 %s2392_s12, 4  ;;  %s357_s9 = int_to_ptr.vmem [resolvable:$true] %s2556_s9 }
  0x25   : > { %s3048_s14 = scalar_select %p2552_p7, 1, 0 }
  0x26   : > { %s2049_s10 = scalar_lea.hbm %s2532_s30, 2048  ;;  %p3021_p9 = pneg %p2552_p7 }
  0x27   : > { %p2050_p8 = scmp.ne.s32.totalorder %s2532_s30, %s2049_s10  ;;  %s2054_s29 = scalar_lea.hbm %s3045_s1, 4096 }
  0x28   : > { %s2545_s24 = scalar_lea.hbm %s3047_s2, %s1420_s26  ;;  %p2055_p12 = scmp.lt.u32.totalorder %s2532_s30, %s3045_s1 }
  0x29   : > { %p2052_p10 = pnand %p3021_p9, %p2050_p8  ;;  %p2056_p13 = scmp.lt.u32.totalorder %s2054_s29, %s2049_s10 }
  0x2a   : > { %p2058_p2 = scmp.lt.u32.totalorder %s2049_s10, %s2532_s30 }
  0x2b   : > { %p2053_p11 = pneg %p2052_p10  ;;  %p2057_p0 = por %p2056_p13, %p2055_p12 }
  0x2d   : > { %p2059_p3 = por %p2058_p2, %p2057_p0 }
  0x2f   : > { %p2060_p6 = pnand %p2059_p3, %p2053_p11 }
  0x31   : > { %2063 = shalt.err (!%p2060_p6)
}
  0x32   : > { %s2064_s12 = scalar_lea.vmem %s2540_s13, 2048  ;;  %p2072_p5 = scmp.lt.s32.totalorder %s2540_s13, %s2540_s13 }
  0x33   : > { %p2065_p8 = scmp.ne.s32.totalorder %s2540_s13, %s2064_s12  ;;  %p2073_p1 = scmp.lt.s32.totalorder %s2064_s12, %s2064_s12 }
  0x35   : > { %p2067_p10 = pnand %p2065_p8, %p3021_p9  ;;  %p2074_p12 = por %p2073_p1, %p2072_p5 }
  0x37   : > { %p2068_p4 = pneg %p2067_p10 }
  0x39   : > { %p2075_p13 = pnand %p2074_p12, %p2068_p4 }
  0x3b   : > { %2078 = shalt.err (!%p2075_p13)
}
  0x3c   : > { %s3019_s6 = smov 128   ;;  %s2394_s10 = smov 8  }
  0x3d   : > { %1915 = dma.hbm_to_vmem [thread:$0]  (!%p2552_p7), %s2532_s30, 2048, %s2540_s13, [#allocation8], %s3019_s6, %s3019_s6, %s2394_s10  }
  0x3e   : > { %p3049_p6 = scmp.ne.s32.totalorder %s3043_s25, 0  ;;  %p3050_p11 = scmp.ne.s32.totalorder %s3046_s11, 0 }
  0x3f   : > { %s2395_s26 = smov [#allocation9]   ;;  %s3053_s3 = sld [smem:[#allocation30_spill]] }
  0x40   : > { %p3051_p0 = pneg %p3050_p11  ;;  %s343_s28 = sshll.u32 %s2395_s26, 4  ;;  %s344_s28 = int_to_ptr.vmem [resolvable:$true] %s343_s28 }
  0x42   : > { %p2593_p1 = pnand %p3051_p0, %p3049_p6 }
  0x44   : > { %s3052_s20 = scalar_select %p2593_p1, 1, 0 }
  0x45   : > { %s2079_s1 = scalar_lea.hbm %s3053_s3, 2048  ;;  %p2605_p5 = pneg %p2593_p1 }
  0x46   : > { %p2080_p4 = scmp.ne.s32.totalorder %s3053_s3, %s2079_s1  ;;  %p2086_p8 = scmp.lt.u32.totalorder %s2079_s1, %s3053_s3 }
  0x47   : > { %s3054_s30 = scalar_select %p2605_p5, 1, 0 }
  0x48   : > { %p2082_p2 = pnand %p2605_p5, %p2080_p4 }
  0x4a   : > { %p2083_p3 = pneg %p2082_p2 }
  0x4c   : > { %p2088_p10 = pnand %p2086_p8, %p2083_p3 }
  0x4e   : > { %2091 = shalt.err (!%p2088_p10)
}
  0x4f   : > { %s2092_s26 = scalar_lea.vmem %s357_s9, 2048  ;;  %p2100_p9 = scmp.lt.s32.totalorder %s357_s9, %s357_s9 }
  0x50   : > { %p2093_p12 = scmp.ne.s32.totalorder %s357_s9, %s2092_s26  ;;  %p2101_p11 = scmp.lt.s32.totalorder %s2092_s26, %s2092_s26 }
  0x52   : > { %p2095_p13 = pnand %p2093_p12, %p2605_p5  ;;  %p2102_p6 = por %p2101_p11, %p2100_p9 }
  0x54   : > { %p2096_p0 = pneg %p2095_p13 }
  0x56   : > { %p2103_p7 = pnand %p2102_p6, %p2096_p0 }
  0x58   : > { %2106 = shalt.err (!%p2103_p7)
}
  0x59   : > { %s3055_s7 = smov 128   ;;  %s2396_s6 = smov [#allocation12]  }
  0x5a   : > { %1921 = dma.hbm_to_vmem [thread:$0]  (!%p2593_p1), %s3053_s3, 2048, %s357_s9, [#allocation11], %s3055_s7, %s3055_s7, %s2394_s10  }
  0x5b   : > { %s369_s29 = sshll.u32 %s2396_s6, 4  ;;  %s2107_s12 = scalar_lea.hbm %s2545_s24, 2048  ;;  %s370_s29 = int_to_ptr.vmem [resolvable:$true] %s369_s29 }
  0x5c   : > { %p2108_p9 = scmp.ne.s32.totalorder %s2545_s24, %s2107_s12  ;;  %p3056_p7 = scmp.ne.s32.totalorder %s3048_s14, 0 }
  0x5d   : > { %s2112_s19 = scalar_lea.hbm %s3047_s2, 4096  ;;  %p2113_p2 = scmp.lt.u32.totalorder %s2545_s24, %s3047_s2 }
  0x5e   : > { %p3057_p6 = pneg %p3056_p7  ;;  %p2114_p3 = scmp.lt.u32.totalorder %s2112_s19, %s2107_s12 }
  0x5f   : > { %p2116_p10 = scmp.lt.u32.totalorder %s2107_s12, %s2545_s24 }
  0x60   : > { %p2110_p11 = pnand %p2108_p9, %p3057_p6  ;;  %p2115_p8 = por %p2114_p3, %p2113_p2 }
  0x62   : > { %p2111_p4 = pneg %p2110_p11  ;;  %p2117_p12 = por %p2116_p10, %p2115_p8 }
  0x64   : > { %p2118_p13 = pnand %p2117_p12, %p2111_p4 }
  0x66   : > { %2121 = shalt.err (!%p2118_p13)
}
  0x67   : > { %s2122_s9 = scalar_lea.vmem %s344_s28, 2048  ;;  %p3058_p9 = pmov %p3057_p6 }
  0x68   : > { %p2123_p0 = scmp.ne.s32.totalorder %s344_s28, %s2122_s9  ;;  %p2130_p1 = scmp.lt.s32.totalorder %s344_s28, %s344_s28 }
  0x69   : > { %p2131_p5 = scmp.lt.s32.totalorder %s2122_s9, %s2122_s9 }
  0x6a   : > { %p2125_p6 = pnand %p2123_p0, %p3058_p9 }
  0x6b   : > { %p2132_p2 = por %p2131_p5, %p2130_p1 }
  0x6c   : > { %p2126_p11 = pneg %p2125_p6 }
  0x6e   : > { %p2133_p3 = pnand %p2132_p2, %p2126_p11 }
  0x70   : > { %2136 = shalt.err (!%p2133_p3)
}
  0x71   : > { %1918 = dma.hbm_to_vmem [thread:$0]  (!%p3056_p7), %s2545_s24, 2048, %s344_s28, [#allocation8], %s3055_s7, %s3055_s7, %s2394_s10  }
  0x72   : > { %s2137_s12 = scalar_lea.hbm %s2999_s4, 2048  ;;  %p3059_p1 = scmp.ne.s32.totalorder %s3054_s30, 0 }
  0x73   : > { %p2138_p4 = scmp.ne.s32.totalorder %s2999_s4, %s2137_s12  ;;  %p2144_p10 = scmp.lt.u32.totalorder %s2137_s12, %s2999_s4 }
  0x75   : > { %p2140_p5 = pnand %p2138_p4, %p3059_p1 }
  0x77   : > { %p2141_p8 = pneg %p2140_p5 }
  0x79   : > { %p2146_p12 = pnand %p2144_p10, %p2141_p8 }
  0x7b   : > { %2149 = shalt.err (!%p2146_p12)
}
  0x7c   : > { %s2150_s1 = scalar_lea.vmem %s370_s29, 2048  ;;  %p2158_p9 = scmp.lt.s32.totalorder %s370_s29, %s370_s29 }
  0x7d   : > { %p2151_p7 = scmp.ne.s32.totalorder %s370_s29, %s2150_s1  ;;  %p2159_p6 = scmp.lt.s32.totalorder %s2150_s1, %s2150_s1 }
  0x7f   : > { %p2153_p13 = pnand %p2151_p7, %p3059_p1  ;;  %p2160_p11 = por %p2159_p6, %p2158_p9 }
  0x81   : > { %p2154_p0 = pneg %p2153_p13 }
  0x83   : > { %p2161_p2 = pnand %p2160_p11, %p2154_p0 }
  0x85   : > { %2164 = shalt.err (!%p2161_p2)
}
  0x86   : > { %p3060_p3 = scmp.ne.s32.totalorder %s3052_s20, 0  ;;  %s2397_s9 = smov [#allocation13]  }
  0x87   : > { %s382_s19 = sshll.u32 %s2397_s9, 4  ;;  %s2165_s13 = scalar_lea.hbm %s3000_s5, 2048  ;;  %s383_s19 = int_to_ptr.vmem [resolvable:$true] %s382_s19 }
  0x88   : > { %1924 = dma.hbm_to_vmem [thread:$0]  (!%p3060_p3), %s2999_s4, 2048, %s370_s29, [#allocation11], %s3055_s7, %s3055_s7, %s2394_s10  }
  0x89   : > { %p2166_p4 = scmp.ne.s32.totalorder %s3000_s5, %s2165_s13  ;;  %p2172_p10 = scmp.lt.u32.totalorder %s2165_s13, %s3000_s5 }
  0x8b   : > { %p2168_p5 = pnand %p2166_p4, %p3059_p1 }
  0x8d   : > { %p2169_p8 = pneg %p2168_p5 }
  0x8f   : > { %p2174_p12 = pnand %p2172_p10, %p2169_p8 }
  0x91   : > { %2177 = shalt.err (!%p2174_p12)
}
  0x92   : > { %s2178_s29 = scalar_lea.vmem %s383_s19, 2048  ;;  %p2186_p9 = scmp.lt.s32.totalorder %s383_s19, %s383_s19 }
  0x93   : > { %p2179_p7 = scmp.ne.s32.totalorder %s383_s19, %s2178_s29  ;;  %p2187_p6 = scmp.lt.s32.totalorder %s2178_s29, %s2178_s29 }
  0x95   : > { %p2181_p13 = pnand %p2179_p7, %p3059_p1  ;;  %p2188_p11 = por %p2187_p6, %p2186_p9 }
  0x97   : > { %p2182_p0 = pneg %p2181_p13 }
  0x99   : > { %p2189_p2 = pnand %p2188_p11, %p2182_p0 }
  0x9b   : > { %2192 = shalt.err (!%p2189_p2)
}
  0x9c   : > { %1927 = dma.hbm_to_vmem [thread:$0]  (!%p3060_p3), %s3000_s5, 2048, %s383_s19, [#allocation14], %s3055_s7, %s3055_s7, %s2394_s10  }
  0x9d   : > { %s42_s20 = sadd.s32 1, %s2381_s21  ;;  %s45_s30 = sadd.s32 1, %s2385_s22 }
  0x9e   : > { %p43_p1 = scmp.ge.s32.totalorder %s42_s20, 2  ;;  %s1388_s9 = sadd.s32 4294967294, %s2389_s23  }
  0x9f   : > { %s54_s6 = sadd.s32 1, %s2369_s18  ;;  %p61_p4 = scmp.ne.s32.totalorder %s2369_s18, %s2365_s17 }
  0xa0   : > { %s3097_s20 = smov (%p43_p1, %s42_s20), 0  ;;  %s3099_s30 = smov (!%p43_p1, %s45_s30), %s2385_s22 }
  0xa1   : > { %s50_s12 = ssub.s32 %s2381_s21, %s3097_s20  ;;  %p47_p3 = scmp.ge.s32.totalorder %s3099_s30, 2 }
  0xa2   : > { %p67_p5 = scmp.ne.s32.totalorder %s2365_s17, %s2361_s16  ;;  %p62_p8 = scmp.eq.s32.totalorder %s2389_s23, 0 }
  0xa3   : > { %s80_s10 = sadd.s32 1, %s2357_s15  ;;  %s3101_s30 = smov (%p47_p3, %s3099_s30), 0 }
  0xa4   : > { %p3061_p10 = scmp.ne.s32.totalorder %s3043_s25, 0  ;;  %s3063_s19 = sadd.s32 4294967295, %s2389_s23  }
  0xa5   : > { %p271_p7 = scmp.eq.s32.totalorder %s3063_s19, 3  ;;  %s49_s13 = ssub.s32 %s2385_s22, %s3101_s30 }
  0xa6   : > { %p2710_p12 = por %p3061_p10, %p67_p5  ;;  %p277_p13 = scmp.eq.s32.totalorder %s1388_s9, 3 }
  0xa7   : > { %s51_s26 = sor.u32 %s50_s12, %s49_s13  ;;  %p78_p0 = scmp.eq.s32.totalorder %s49_s13, 0 }
  0xa8   : > { %p52_p9 = scmp.eq.s32.totalorder %s51_s26, 0  ;;  %p2721_p6 = por %p271_p7, %p61_p4 }
  0xa9   : > { %s2726_s14 = scalar_select %p78_p0, %s2357_s15, %s80_s10  }
  0xaa   : > { %s3064_s8 = scalar_select %p2721_p6, 1, 0 }
  0xab   : > { %s2729_s1 = scalar_select %p52_p9, %s2369_s18, %s54_s6  }
  0xac   : > { %p63_p11 = por %p62_p8, %p61_p4  ;;  %p2739_p2 = por %p277_p13, %p67_p5 }
  0xad   : > { %s405_s24 = sand.u32 1, %s2369_s18   ;;  %s1399_s28 = sshll.u32 %s2385_s22, 1 }
  0xae   : > { %s3065_s29 = scalar_select %p2739_p2, 1, 0 }
  0xaf   : > { %p1942_p1 = scmp.lt.s32.totalorder %s2389_s23, 4  ;;  %s1398_s9 = sshll.u32 %s405_s24, 3 }
  0xb0   : > { %s414_s12 = sadd.s32 %s2381_s21, %s1399_s28  ;;  %s409_s13 = scalar_lea.vmem [#allocation4], %s1398_s9 }
  0xb1   : > { %s1400_s19 = sshll.u32 %s414_s12, 7  ;;  %s418_s26 = sshll.u32 %s409_s13, 4  ;;  %s2752_s26 = int_to_ptr.vmem [resolvable:$true] %s418_s26 }
  0xb2   : > { %s3066_s0 = sld [smem:[#allocation27_spill]]  ;;  %p2754_p4 = pnand %p1942_p1, %p63_p11 }
  0xb3   : > { %s406_s28 = scalar_lea.sflag [#allocation5], %s405_s24 }
  0xb4   : > { %p2195_p5 = pneg %p2754_p4 }
  0xb8   : > { %s2750_s6 = scalar_lea.hbm %s3066_s0, %s1400_s19  ;;  %s2198_s19 = scalar_lea.hbm %s3066_s0, 512 }
  0xb9   : > { %s2193_s9 = scalar_lea.hbm %s2750_s6, 128  ;;  %p2199_p7 = scmp.lt.u32.totalorder %s2750_s6, %s3066_s0 }
  0xba   : > { %p2194_p3 = scmp.ne.s32.totalorder %s2750_s6, %s2193_s9  ;;  %p2200_p13 = scmp.lt.u32.totalorder %s2198_s19, %s2193_s9 }
  0xbb   : > { %p2202_p9 = scmp.lt.u32.totalorder %s2193_s9, %s2750_s6 }
  0xbc   : > { %p2196_p8 = pnand %p2195_p5, %p2194_p3  ;;  %p2201_p0 = por %p2200_p13, %p2199_p7 }
  0xbe   : > { %p2197_p10 = pneg %p2196_p8  ;;  %p2203_p11 = por %p2202_p9, %p2201_p0 }
  0xc0   : > { %p2204_p1 = pnand %p2203_p11, %p2197_p10 }
  0xc2   : > { %2207 = shalt.err (!%p2204_p1)
}
  0xc3   : > { %s2208_s24 = scalar_lea.vmem %s2752_s26, 128  ;;  %s2398_s2 = smov [#allocation4]  }
  0xc4   : > { %p2209_p3 = scmp.ne.s32.totalorder %s2752_s26, %s2208_s24  ;;  %s2213_s12 = sshll.u32 %s2398_s2, 4  ;;  %s2214_s12 = int_to_ptr.vmem [resolvable:$false] %s2213_s12 }
  0xc5   : > { %s2215_s13 = scalar_lea.vmem %s2214_s12, 256  ;;  %p2216_p6 = scmp.lt.s32.totalorder %s2752_s26, %s2214_s12 }
  0xc6   : > { %p2211_p8 = pnand %p2209_p3, %p2195_p5  ;;  %p2217_p7 = scmp.lt.s32.totalorder %s2215_s13, %s2208_s24 }
  0xc8   : > { %p2212_p2 = pneg %p2211_p8  ;;  %p2218_p13 = por %p2217_p7, %p2216_p6 }
  0xca   : > { %p2219_p0 = pnand %p2218_p13, %p2212_p2 }
  0xcc   : > { %2222 = shalt.err (!%p2219_p0)
}
  0xcd   : > { %1931 = dma.hbm_to_vmem [thread:$0]  (!%p2754_p4), %s2750_s6, 128, %s2752_s26, %s406_s28  }
  0xce   : > { %p3068_p10 = scmp.ne.s32.totalorder %s3046_s11, 0 }
  0xcf   : > { %s2786_s9 = sand.u32 (!%p3068_p10), 1, %s2365_s17  }
  0xd0   : > { %427 = sbr.rel (%p3068_p10) target bundleno = 1510 (0x5e6), region = 56  ;;  %s2789_s19 = sshll.u32 (!%p3068_p10), %s2786_s9, 3 }
  0xd1   : > { %s430_s10 = scalar_lea.sflag (!%p3068_p10), [#allocation5], %s2786_s9  ;;  %s433_s24 = scalar_lea.vmem (!%p3068_p10), [#allocation4], %s2789_s19 }
  0xd7   : > { %2324 = dma.done.wait (%p2710_p12), %s430_s10, 128  }
  0xd8   : > { %2326 = vsyncadd (%p2710_p12), %s430_s10, 4294967168  ;;  %p3069_p6 = scmp.ne.s32.totalorder %s3044_s27, 0 }
  0xda   : > { %2328 = dma.done.wait (%p3069_p6), [#allocation8], 4096  }
  0xdb   : > { %2330 = vsyncadd (%p3069_p6), [#allocation8], 4294963200  ;;  %p3070_p2 = scmp.ne.s32.totalorder %s3043_s25, 0 }
  0xdd   : > { %2332 = dma.done.wait (%p3070_p2), [#allocation11], 4096  }
  0xde   : > { %2334 = vsyncadd (%p3070_p2), [#allocation11], 4294963200 }
  0xdf   : > { %2336 = dma.done.wait (%p3070_p2), [#allocation14], 2048  }
  0xe0   : > { %2338 = vsyncadd (%p3070_p2), [#allocation14], 4294965248  ;;  %s494_s11 = scalar_lea.vmem [#allocation16], %s2789_s19  ;;  %s3071_s7 = sld [smem:[#allocation25_spill]] }
  0xe6   : > { %p1408_p12 = scmp.ne.s32.totalorder %s3071_s7, 0 }
  0xe7   : > { %v531_v0 = vld [vmem:[#allocation12] sm:$0xff] (!%p1408_p12)  ;;  %v532_v1 = vld [vmem:[#allocation12 + $0x8] sm:$0xff] (!%p1408_p12)  ;;  %v533_v5 = vld [vmem:[#allocation12 + $0x10] sm:$0xff] (!%p1408_p12)  ;;  %s3072_s26 = sld [smem:[#allocation32_spill]] (!%p1408_p12)  ;;  %s3073_s2 = sld [smem:[#allocation33_spill]] (!%p1408_p12) }
  0xe8   : > { %498 = sbr.rel (%p1408_p12) target bundleno = 511 (0x1ff), region = 84  ;;  %v699_v2 = vld [vmem:[#allocation13] sm:$0xff] (!%p1408_p12)  ;;  %v1754_v3 = vpack.c.bf16 (!%p1408_p12), %v532_v1, %v531_v0  ;;  %v700_v4 = vld [vmem:[#allocation13 + $0x8] sm:$0xff] (!%p1408_p12)  ;;  %v534_v6 = vld [vmem:[#allocation12 + $0x18] sm:$0xff] (!%p1408_p12) }
  0xe9   : > { %v1786_v7 = vpack.c.bf16 (!%p1408_p12), %v700_v4, %v699_v2  ;;  %v1758_v8 = vpack.c.bf16 (!%p1408_p12), %v534_v6, %v533_v5  ;;  %v701_v9 = vld [vmem:[#allocation13 + $0x10] sm:$0xff] (!%p1408_p12)  ;;  %v702_v10 = vld [vmem:[#allocation13 + $0x18] sm:$0xff] (!%p1408_p12)  ;;  %v535_v11 = vld [vmem:[#allocation12 + $0x20] sm:$0xff] (!%p1408_p12) }
  0xea   : > { %1755 = vmatprep.subr.bf16.mxu0 (!%p1408_p12), %v1754_v3  ;;  %v1790_v12 = vpack.c.bf16 (!%p1408_p12), %v702_v10, %v701_v9  ;;  %v536_v13 = vld [vmem:[#allocation12 + $0x28] sm:$0xff] (!%p1408_p12)  ;;  %v703_v14 = vld [vmem:[#allocation13 + $0x20] sm:$0xff] (!%p1408_p12)  ;;  %v537_v18 = vld [vmem:[#allocation12 + $0x30] sm:$0xff] (!%p1408_p12) }
  0xeb   : > { %v704_v15 = vld [vmem:[#allocation13 + $0x28] sm:$0xff] (!%p1408_p12)  ;;  %1787 = vmatprep.subr.bf16.mxu1 (!%p1408_p12), %v1786_v7  ;;  %1757 = vmatpush3.bf16.msra.mxu0 (!%p1408_p12), %v1754_v3  ;;  %v1762_v16 = vpack.c.bf16 (!%p1408_p12), %v536_v13, %v535_v11  ;;  %v538_v19 = vld [vmem:[#allocation12 + $0x38] sm:$0xff] (!%p1408_p12)  ;;  %v705_v20 = vld [vmem:[#allocation13 + $0x30] sm:$0xff] (!%p1408_p12) }
  0xec   : > { %1789 = vmatpush3.bf16.msra.mxu1 (!%p1408_p12), %v1786_v7  ;;  %1759 = vmatprep.subr.bf16.mxu0 (!%p1408_p12), %v1758_v8  ;;  %v1794_v17 = vpack.c.bf16 (!%p1408_p12), %v704_v15, %v703_v14  ;;  %v706_v21 = vld [vmem:[#allocation13 + $0x38] sm:$0xff] (!%p1408_p12)  ;;  %v1766_v22 = vpack.c.bf16 (!%p1408_p12), %v538_v19, %v537_v18  ;;  %v539_v24 = vld [vmem:[#allocation12 + $0x40] sm:$0xff] (!%p1408_p12)  ;;  %v540_v25 = vld [vmem:[#allocation12 + $0x48] sm:$0xff] (!%p1408_p12) }
  0xed   : > { %1791 = vmatprep.subr.bf16.mxu1 (!%p1408_p12), %v1790_v12  ;;  %v1798_v23 = vpack.c.bf16 (!%p1408_p12), %v706_v21, %v705_v20  ;;  %v499_v26 = vld [vmem:[#allocation7] sm:$0xff] (!%p1408_p12)  ;;  %v708_v28 = vld [vmem:[#allocation13 + $0x48] sm:$0xff] (!%p1408_p12)  ;;  %v1770_v30 = vpack.c.bf16 (!%p1408_p12), %v540_v25, %v539_v24  ;;  %v541_v32 = vld [vmem:[#allocation12 + $0x50] sm:$0xff] (!%p1408_p12) }
  0xee   : > { %v707_v27 = vld [vmem:[#allocation13 + $0x40] sm:$0xff] (!%p1408_p12)  ;;  %1569 = vmatprep.mubr.f32.mxu0 (!%p1408_p12), %v499_v26  ;;  %v542_v33 = vld [vmem:[#allocation12 + $0x58] sm:$0xff] (!%p1408_p12)  ;;  %v709_v34 = vld [vmem:[#allocation13 + $0x50] sm:$0xff] (!%p1408_p12) }
  0xef   : > { %1761 = vmatpush3.bf16.msra.mxu0 %v1758_v8  ;;  %v515_v29 = vld [vmem:[#allocation9] sm:$0xff]  ;;  %v1802_v31 = vpack.c.bf16 %v708_v28, %v707_v27  ;;  %v710_v35 = vld [vmem:[#allocation13 + $0x58] sm:$0xff]  ;;  %v1774_v36 = vpack.c.bf16 %v542_v33, %v541_v32  ;;  %v544_v39 = vld [vmem:[#allocation12 + $0x68] sm:$0xff] }
  0xf0   : > { %1793 = vmatpush3.bf16.msra.mxu1 %v1790_v12  ;;  %1763 = vmatprep.subr.bf16.mxu0 %v1762_v16  ;;  %v1806_v37 = vpack.c.bf16 %v710_v35, %v709_v34  ;;  %v543_v38 = vld [vmem:[#allocation12 + $0x60] sm:$0xff]  ;;  %v712_v41 = vld [vmem:[#allocation13 + $0x68] sm:$0xff]  ;;  %v545_v44 = vld [vmem:[#allocation12 + $0x70] sm:$0xff] }
  0xf1   : > { %1795 = vmatprep.subr.bf16.mxu1 %v1794_v17  ;;  %1625 = vmatprep.mubr.f32.mxu1 %v515_v29  ;;  %v711_v40 = vld [vmem:[#allocation13 + $0x60] sm:$0xff]  ;;  %v1778_v42 = vpack.c.bf16 %v544_v39, %v543_v38  ;;  %v546_v45 = vld [vmem:[#allocation12 + $0x78] sm:$0xff]  ;;  %v713_v46 = vld [vmem:[#allocation13 + $0x70] sm:$0xff] }
  0xf2   : > { %v1810_v43 = vpack.c.bf16 %v712_v41, %v711_v40  ;;  %v714_v47 = vld [vmem:[#allocation13 + $0x78] sm:$0xff]  ;;  %v1782_v48 = vpack.c.bf16 %v546_v45, %v545_v44  ;;  %v500_v50 = vld [vmem:[#allocation7 + $0x8] sm:$0xff]  ;;  %v501_v52 = vld [vmem:[#allocation7 + $0x10] sm:$0xff] }
  0xf3   : > { %1765 = vmatpush3.bf16.msra.mxu0 %v1762_v16  ;;  %v1814_v49 = vpack.c.bf16 %v714_v47, %v713_v46  ;;  %v516_v51 = vld [vmem:[#allocation9 + $0x8] sm:$0xff]  ;;  %v517_v53 = vld [vmem:[#allocation9 + $0x10] sm:$0xff]  ;;  %v502_v54 = vld [vmem:[#allocation7 + $0x18] sm:$0xff] }
  0xf4   : > { %1797 = vmatpush3.bf16.msra.mxu1 %v1794_v17  ;;  %1767 = vmatprep.subr.bf16.mxu0 %v1766_v22  ;;  %v518_v55 = vld [vmem:[#allocation9 + $0x18] sm:$0xff]  ;;  %v503_v56 = vld [vmem:[#allocation7 + $0x20] sm:$0xff]  ;;  %v504_v58 = vld [vmem:[#allocation7 + $0x28] sm:$0xff] }
  0xf5   : > { %1799 = vmatprep.subr.bf16.mxu1 %v1798_v23  ;;  %v519_v57 = vld [vmem:[#allocation9 + $0x20] sm:$0xff]  ;;  %v520_v59 = vld [vmem:[#allocation9 + $0x28] sm:$0xff]  ;;  %v505_v60 = vld [vmem:[#allocation7 + $0x30] sm:$0xff] }
  0xf6   : > { %v521_v61 = vld [vmem:[#allocation9 + $0x30] sm:$0xff]  ;;  %v506_v62 = vld [vmem:[#allocation7 + $0x38] sm:$0xff]  ;;  %v507_v0 = vld [vmem:[#allocation7 + $0x40] sm:$0xff] }
  0xf7   : > { %1769 = vmatpush3.bf16.msra.mxu0 %v1766_v22  ;;  %v522_v63 = vld [vmem:[#allocation9 + $0x38] sm:$0xff]  ;;  %v523_v1 = vld [vmem:[#allocation9 + $0x40] sm:$0xff]  ;;  %v508_v2 = vld [vmem:[#allocation7 + $0x48] sm:$0xff] }
  0xf8   : > { %1801 = vmatpush3.bf16.msra.mxu1 %v1798_v23  ;;  %1771 = vmatprep.subr.bf16.mxu0 %v1770_v30  ;;  %v524_v3 = vld [vmem:[#allocation9 + $0x48] sm:$0xff]  ;;  %v509_v4 = vld [vmem:[#allocation7 + $0x50] sm:$0xff]  ;;  %v510_v6 = vld [vmem:[#allocation7 + $0x58] sm:$0xff] }
  0xf9   : > { %1803 = vmatprep.subr.bf16.mxu1 %v1802_v31  ;;  %v525_v5 = vld [vmem:[#allocation9 + $0x50] sm:$0xff]  ;;  %v526_v7 = vld [vmem:[#allocation9 + $0x58] sm:$0xff]  ;;  %v511_v8 = vld [vmem:[#allocation7 + $0x60] sm:$0xff] }
  0xfa   : > { %v527_v9 = vld [vmem:[#allocation9 + $0x60] sm:$0xff]  ;;  %v512_v10 = vld [vmem:[#allocation7 + $0x68] sm:$0xff]  ;;  %v513_v12 = vld [vmem:[#allocation7 + $0x70] sm:$0xff] }
  0xfb   : > { %1773 = vmatpush3.bf16.msra.mxu0 %v1770_v30  ;;  %v528_v11 = vld [vmem:[#allocation9 + $0x68] sm:$0xff]  ;;  %v529_v13 = vld [vmem:[#allocation9 + $0x70] sm:$0xff]  ;;  %v514_v14 = vld [vmem:[#allocation7 + $0x78] sm:$0xff] }
  0xfc   : > { %1805 = vmatpush3.bf16.msra.mxu1 %v1802_v31  ;;  %1775 = vmatprep.subr.bf16.mxu0 %v1774_v36  ;;  %v530_v15 = vld [vmem:[#allocation9 + $0x78] sm:$0xff]  ;;  %v2815_v16 = vld [vmem:[%s3072_s26] ss:$0 sm:$0xff] }
  0xfd   : > { %1807 = vmatprep.subr.bf16.mxu1 %v1806_v37  ;;  %v2820_v17 = vld [vmem:[%s3073_s2] ss:$0 sm:$0xff] }
  0xff   : > { %1777 = vmatpush3.bf16.msra.mxu0 %v1774_v36 }
 0x100   : > { %1809 = vmatpush3.bf16.msra.mxu1 %v1806_v37  ;;  %1779 = vmatprep.subr.bf16.mxu0 %v1778_v42 }
 0x101   : > { %1811 = vmatprep.subr.bf16.mxu1 %v1810_v43 }
 0x103   : > { %1781 = vmatpush3.bf16.msra.mxu0 %v1778_v42 }
 0x104   : > { %1813 = vmatpush3.bf16.msra.mxu1 %v1810_v43  ;;  %1783 = vmatprep.subr.bf16.mxu0 %v1782_v48 }
 0x105   : > { %1815 = vmatprep.subr.bf16.mxu1 %v1814_v49 }
 0x107   : > { %1785 = vmatpush3.bf16.msra.mxu0 %v1782_v48 }
 0x108   : > { %1817 = vmatpush3.bf16.msra.mxu1 %v1814_v49 }
 0x10a   : > { %1570 = vmatmul.mubr.f32.vlgmr.msra.gmra.mrb[0].mxu0 %v500_v50 }
 0x10b   : > { %1626 = vmatmul.mubr.f32.vlgmr.msra.gmra.mrb[0].mxu1 %v516_v51  ;;  %1572 = vmatprep.mubr.f32.mxu0 %v501_v52 }
 0x10c   : > { %1628 = vmatprep.mubr.f32.mxu1 %v517_v53 }
 0x10e   : > { %1573 = vmatmul.mubr.f32.gmra.mrb[2].mxu0 %v502_v54 }
 0x10f   : > { %1629 = vmatmul.mubr.f32.gmra.mrb[2].mxu1 %v518_v55  ;;  %1575 = vmatprep.mubr.f32.mxu0 %v503_v56 }
 0x110   : > { %1631 = vmatprep.mubr.f32.mxu1 %v519_v57 }
 0x112   : > { %1576 = vmatmul.mubr.f32.gmra.mrb[4].mxu0 %v504_v58 }
 0x113   : > { %1632 = vmatmul.mubr.f32.gmra.mrb[4].mxu1 %v520_v59  ;;  %1578 = vmatprep.mubr.f32.mxu0 %v505_v60 }
 0x114   : > { %1634 = vmatprep.mubr.f32.mxu1 %v521_v61 }
 0x116   : > { %1579 = vmatmul.mubr.f32.gmra.mrb[6].mxu0 %v506_v62 }
 0x117   : > { %1635 = vmatmul.mubr.f32.gmra.mrb[6].mxu1 %v522_v63  ;;  %1581 = vmatprep.mubr.f32.mxu0 %v507_v0 }
 0x118   : > { %1637 = vmatprep.mubr.f32.mxu1 %v523_v1 }
 0x11a   : > { %1582 = vmatmul.mubr.f32.gmra.mrb[8].mxu0 %v508_v2 }
 0x11b   : > { %1638 = vmatmul.mubr.f32.gmra.mrb[8].mxu1 %v524_v3  ;;  %1584 = vmatprep.mubr.f32.mxu0 %v509_v4 }
 0x11c   : > { %1640 = vmatprep.mubr.f32.mxu1 %v525_v5 }
 0x11e   : > { %1585 = vmatmul.mubr.f32.gmra.mrb[10].mxu0 %v510_v6 }
 0x11f   : > { %1641 = vmatmul.mubr.f32.gmra.mrb[10].mxu1 %v526_v7  ;;  %1587 = vmatprep.mubr.f32.mxu0 %v511_v8 }
 0x120   : > { %1643 = vmatprep.mubr.f32.mxu1 %v527_v9 }
 0x122   : > { %1588 = vmatmul.mubr.f32.gmra.mrb[12].mxu0 %v512_v10 }
 0x123   : > { %1644 = vmatmul.mubr.f32.gmra.mrb[12].mxu1 %v528_v11  ;;  %1590 = vmatprep.mubr.f32.mxu0 %v513_v12 }
 0x124   : > { %1646 = vmatprep.mubr.f32.mxu1 %v529_v13 }
 0x126   : > { %1591 = vmatmul.mubr.f32.gmra.mrb[14].mxu0 %v514_v14 }
 0x127   : > { %1647 = vmatmul.mubr.f32.gmra.mrb[14].mxu1 %v530_v15 }
 0x1dd   : > { %v1571_v18 = vpop.f32.mrb[0].mxu0 }
 0x1de   : > { %v626_v19 = vadd.f32 %v1571_v18, %v2815_v16  ;;  %v1627_v20 = vpop.f32.mrb[0].mxu1  ;;  %v620_v21 = vpop.f32.mrb[1].mxu0 }
 0x1df   : > { %v794_v22 = vadd.f32 %v1627_v20, %v2820_v17  ;;  %v621_v23 = vadd.f32 %v2815_v16, %v620_v21  ;;  %v788_v24 = vpop.f32.mrb[1].mxu1 }
 0x1e0   : > { %868 = vst [vmem:[#allocation2 + $0x8] sm:$0xff] %v626_v19  ;;  %v789_v25 = vadd.f32 %v2820_v17, %v788_v24 }
 0x1e1   : > { %884 = vst [vmem:[#allocation3 + $0x8] sm:$0xff] %v794_v22  ;;  %867 = vst [vmem:[#allocation2] sm:$0xff] %v621_v23  ;;  %v1574_v26 = vpop.f32.mrb[2].mxu0 }
 0x1e2   : > { %883 = vst [vmem:[#allocation3] sm:$0xff] %v789_v25  ;;  %v636_v27 = vadd.f32 %v1574_v26, %v2815_v16  ;;  %v1630_v28 = vpop.f32.mrb[2].mxu1  ;;  %v630_v29 = vpop.f32.mrb[3].mxu0 }
 0x1e3   : > { %v804_v30 = vadd.f32 %v1630_v28, %v2820_v17  ;;  %v631_v31 = vadd.f32 %v2815_v16, %v630_v29  ;;  %v798_v32 = vpop.f32.mrb[3].mxu1 }
 0x1e4   : > { %870 = vst [vmem:[#allocation2 + $0x18] sm:$0xff] %v636_v27  ;;  %v799_v33 = vadd.f32 %v2820_v17, %v798_v32 }
 0x1e5   : > { %886 = vst [vmem:[#allocation3 + $0x18] sm:$0xff] %v804_v30  ;;  %869 = vst [vmem:[#allocation2 + $0x10] sm:$0xff] %v631_v31  ;;  %v1577_v34 = vpop.f32.mrb[4].mxu0 }
 0x1e6   : > { %885 = vst [vmem:[#allocation3 + $0x10] sm:$0xff] %v799_v33  ;;  %v646_v35 = vadd.f32 %v1577_v34, %v2815_v16  ;;  %v1633_v36 = vpop.f32.mrb[4].mxu1  ;;  %v640_v37 = vpop.f32.mrb[5].mxu0 }
 0x1e7   : > { %v814_v38 = vadd.f32 %v1633_v36, %v2820_v17  ;;  %v641_v39 = vadd.f32 %v2815_v16, %v640_v37  ;;  %v808_v40 = vpop.f32.mrb[5].mxu1 }
 0x1e8   : > { %872 = vst [vmem:[#allocation2 + $0x28] sm:$0xff] %v646_v35  ;;  %v809_v41 = vadd.f32 %v2820_v17, %v808_v40 }
 0x1e9   : > { %888 = vst [vmem:[#allocation3 + $0x28] sm:$0xff] %v814_v38  ;;  %871 = vst [vmem:[#allocation2 + $0x20] sm:$0xff] %v641_v39  ;;  %v1580_v42 = vpop.f32.mrb[6].mxu0 }
 0x1ea   : > { %887 = vst [vmem:[#allocation3 + $0x20] sm:$0xff] %v809_v41  ;;  %v656_v43 = vadd.f32 %v1580_v42, %v2815_v16  ;;  %v1636_v44 = vpop.f32.mrb[6].mxu1  ;;  %v650_v45 = vpop.f32.mrb[7].mxu0 }
 0x1eb   : > { %v824_v46 = vadd.f32 %v1636_v44, %v2820_v17  ;;  %v651_v47 = vadd.f32 %v2815_v16, %v650_v45  ;;  %v818_v48 = vpop.f32.mrb[7].mxu1 }
 0x1ec   : > { %874 = vst [vmem:[#allocation2 + $0x38] sm:$0xff] %v656_v43  ;;  %v819_v49 = vadd.f32 %v2820_v17, %v818_v48 }
 0x1ed   : > { %890 = vst [vmem:[#allocation3 + $0x38] sm:$0xff] %v824_v46  ;;  %873 = vst [vmem:[#allocation2 + $0x30] sm:$0xff] %v651_v47  ;;  %v1583_v50 = vpop.f32.mrb[8].mxu0 }
 0x1ee   : > { %889 = vst [vmem:[#allocation3 + $0x30] sm:$0xff] %v819_v49  ;;  %v666_v51 = vadd.f32 %v1583_v50, %v2815_v16  ;;  %v1639_v52 = vpop.f32.mrb[8].mxu1  ;;  %v660_v53 = vpop.f32.mrb[9].mxu0 }
 0x1ef   : > { %v834_v54 = vadd.f32 %v1639_v52, %v2820_v17  ;;  %v661_v55 = vadd.f32 %v2815_v16, %v660_v53  ;;  %v828_v56 = vpop.f32.mrb[9].mxu1 }
 0x1f0   : > { %876 = vst [vmem:[#allocation2 + $0x48] sm:$0xff] %v666_v51  ;;  %v829_v57 = vadd.f32 %v2820_v17, %v828_v56 }
 0x1f1   : > { %892 = vst [vmem:[#allocation3 + $0x48] sm:$0xff] %v834_v54  ;;  %875 = vst [vmem:[#allocation2 + $0x40] sm:$0xff] %v661_v55  ;;  %v1586_v58 = vpop.f32.mrb[10].mxu0 }
 0x1f2   : > { %891 = vst [vmem:[#allocation3 + $0x40] sm:$0xff] %v829_v57  ;;  %v676_v59 = vadd.f32 %v1586_v58, %v2815_v16  ;;  %v1642_v60 = vpop.f32.mrb[10].mxu1  ;;  %v670_v61 = vpop.f32.mrb[11].mxu0 }
 0x1f3   : > { %v844_v62 = vadd.f32 %v1642_v60, %v2820_v17  ;;  %v671_v63 = vadd.f32 %v2815_v16, %v670_v61  ;;  %v838_v0 = vpop.f32.mrb[11].mxu1 }
 0x1f4   : > { %878 = vst [vmem:[#allocation2 + $0x58] sm:$0xff] %v676_v59  ;;  %v839_v1 = vadd.f32 %v2820_v17, %v838_v0 }
 0x1f5   : > { %894 = vst [vmem:[#allocation3 + $0x58] sm:$0xff] %v844_v62  ;;  %877 = vst [vmem:[#allocation2 + $0x50] sm:$0xff] %v671_v63  ;;  %v1589_v2 = vpop.f32.mrb[12].mxu0 }
 0x1f6   : > { %893 = vst [vmem:[#allocation3 + $0x50] sm:$0xff] %v839_v1  ;;  %v686_v3 = vadd.f32 %v1589_v2, %v2815_v16  ;;  %v1645_v4 = vpop.f32.mrb[12].mxu1  ;;  %v680_v5 = vpop.f32.mrb[13].mxu0 }
 0x1f7   : > { %v854_v6 = vadd.f32 %v1645_v4, %v2820_v17  ;;  %v681_v7 = vadd.f32 %v2815_v16, %v680_v5  ;;  %v848_v8 = vpop.f32.mrb[13].mxu1 }
 0x1f8   : > { %880 = vst [vmem:[#allocation2 + $0x68] sm:$0xff] %v686_v3  ;;  %v849_v9 = vadd.f32 %v2820_v17, %v848_v8 }
 0x1f9   : > { %896 = vst [vmem:[#allocation3 + $0x68] sm:$0xff] %v854_v6  ;;  %879 = vst [vmem:[#allocation2 + $0x60] sm:$0xff] %v681_v7  ;;  %v1592_v10 = vpop.f32.mrb[14].mxu0 }
 0x1fa   : > { %895 = vst [vmem:[#allocation3 + $0x60] sm:$0xff] %v849_v9  ;;  %v696_v11 = vadd.f32 %v1592_v10, %v2815_v16  ;;  %v1648_v12 = vpop.f32.mrb[14].mxu1  ;;  %v690_v13 = vpop.f32.mrb[15].mxu0 }
 0x1fb   : > { %v864_v14 = vadd.f32 %v1648_v12, %v2820_v17  ;;  %v691_v15 = vadd.f32 %v2815_v16, %v690_v13  ;;  %v858_v18 = vpop.f32.mrb[15].mxu1 }
 0x1fc   : > { %882 = vst [vmem:[#allocation2 + $0x78] sm:$0xff] %v696_v11  ;;  %v859_v19 = vadd.f32 %v2820_v17, %v858_v18 }
 0x1fd   : > { %898 = vst [vmem:[#allocation3 + $0x78] sm:$0xff] %v864_v14  ;;  %881 = vst [vmem:[#allocation2 + $0x70] sm:$0xff] %v691_v15 }
 0x1fe   : > { %897 = vst [vmem:[#allocation3 + $0x70] sm:$0xff] %v859_v19 }
 0x1ff PF: > { %v900_v20 = vld [vmem:[#allocation10] sm:$0xff]  ;;  %v901_v21 = vld [vmem:[#allocation10 + $0x8] sm:$0xff]  ;;  %v902_v22 = vld [vmem:[#allocation10 + $0x10] sm:$0xff]  ;;  %v2399_v23 = vmov 0.0|0.0   ;;  %vm2400_vm0 = vmmov 0   ;;  %v2401_v26 = vmov 0.0   ;;  %v1079_v9 = vlaneseq }
 0x200   : > { %1818 = vmatprep.subr.bf16.mxu0 %v2399_v23  ;;  %v1819_v24 = vpack.c.bf16 %v901_v21, %v900_v20  ;;  %v903_v25 = vld [vmem:[#allocation10 + $0x18] sm:$0xff]  ;;  %1681 = vmatprep.mubr.msk.f32.mxu0 %vm2400_vm0, %v2401_v26  ;;  %v904_v17 = vld [vmem:[#allocation10 + $0x20] sm:$0xff]  ;;  %v905_v27 = vld [vmem:[#allocation10 + $0x28] sm:$0xff]  ;;  %s3074_s10 = sld [smem:[#allocation31_spill]]  ;;  %s3076_s7 = sld [smem:[#allocation25_spill]] }
 0x201   : > { %1842 = vmatprep.subr.bf16.mxu1 %v2399_v23  ;;  %1716 = vmatprep.mubr.msk.f32.mxu1 %vm2400_vm0, %v2401_v26  ;;  %v1822_v16 = vpack.c.bf16 %v903_v25, %v902_v22  ;;  %v993_v28 = vld [vmem:[#allocation2] sm:$0xff]  ;;  %v994_v29 = vld [vmem:[#allocation2 + $0x8] sm:$0xff]  ;;  %v1825_v30 = vpack.c.bf16 %v905_v27, %v904_v17  ;;  %v995_v34 = vld [vmem:[#allocation2 + $0x10] sm:$0xff]  ;;  %v1080_v10 = vand.u32 127, %v1079_v9  ;;  %s3077_s2 = sld [smem:[#allocation35_spill]]  ;;  %s1216_s13 = sshll.u32 %s494_s11, 4  ;;  %s1217_s13 = int_to_ptr.vmem [resolvable:$true] %s1216_s13 }
 0x202   : > { %1820 = vmatpush3.bf16.msra.mxu0 %v1819_v24  ;;  %v1843_v31 = vpack.c.bf16 %v994_v29, %v993_v28  ;;  %v906_v32 = vld [vmem:[#allocation10 + $0x30] sm:$0xff]  ;;  %v907_v33 = vld [vmem:[#allocation10 + $0x38] sm:$0xff]  ;;  %v996_v35 = vld [vmem:[#allocation2 + $0x18] sm:$0xff]  ;;  %s2223_s3 = scalar_lea.vmem %s1217_s13, 128  ;;  %p3078_p5 = scmp.ne.s32.totalorder %s3064_s8, 0 }
 0x203   : > { %1821 = vmatprep.subr.bf16.mxu0 %v2399_v23  ;;  %v1828_v36 = vpack.c.bf16 %v907_v33, %v906_v32  ;;  %v908_v37 = vld [vmem:[#allocation10 + $0x40] sm:$0xff]  ;;  %v909_v38 = vld [vmem:[#allocation10 + $0x48] sm:$0xff]  ;;  %v1846_v39 = vpack.c.bf16 %v996_v35, %v995_v34  ;;  %v910_v41 = vld [vmem:[#allocation10 + $0x50] sm:$0xff]  ;;  %vm1081_vm1 = vcmp.lt.s32.totalorder %v1080_v10, 8  ;;  %p2224_p4 = scmp.ne.s32.totalorder %s1217_s13, %s2223_s3 }
 0x204   : > { %1844 = vmatpush3.bf16.xpose.msra.mxu1 %v1843_v31  ;;  %v1831_v40 = vpack.c.bf16 %v909_v38, %v908_v37  ;;  %v911_v42 = vld [vmem:[#allocation10 + $0x58] sm:$0xff]  ;;  %v997_v43 = vld [vmem:[#allocation2 + $0x20] sm:$0xff]  ;;  %v912_v46 = vld [vmem:[#allocation10 + $0x60] sm:$0xff] }
 0x205   : > { %1845 = vmatprep.subr.bf16.mxu1 %v2399_v23  ;;  %v998_v44 = vld [vmem:[#allocation2 + $0x28] sm:$0xff]  ;;  %v1834_v45 = vpack.c.bf16 %v911_v42, %v910_v41  ;;  %v913_v47 = vld [vmem:[#allocation10 + $0x68] sm:$0xff]  ;;  %v914_v50 = vld [vmem:[#allocation10 + $0x70] sm:$0xff]  ;;  %p2225_p9 = pnand %p2224_p4, %p3078_p5 }
 0x206   : > { %1823 = vmatpush3.bf16.msra.mxu0 %v1822_v16  ;;  %v1849_v48 = vpack.c.bf16 %v998_v44, %v997_v43  ;;  %v1837_v49 = vpack.c.bf16 %v913_v47, %v912_v46  ;;  %v915_v51 = vld [vmem:[#allocation10 + $0x78] sm:$0xff]  ;;  %v999_v52 = vld [vmem:[#allocation2 + $0x30] sm:$0xff]  ;;  %v1000_v53 = vld [vmem:[#allocation2 + $0x38] sm:$0xff] }
 0x207   : > { %1824 = vmatprep.subr.bf16.mxu0 %v2399_v23  ;;  %v1840_v54 = vpack.c.bf16 %v915_v51, %v914_v50  ;;  %v1852_v55 = vpack.c.bf16 %v1000_v53, %v999_v52  ;;  %v899_v56 = vld [vmem:[%s433_s24] sm:$0xff]  ;;  %v1003_v60 = vld [vmem:[#allocation2 + $0x50] sm:$0xff]  ;;  %v1004_v61 = vld [vmem:[#allocation2 + $0x58] sm:$0xff]  ;;  %s3075_s24 = sld [smem:[#allocation26_spill]]  ;;  %p2226_p11 = pneg %p2225_p9 }
 0x208   : > { %v1001_v57 = vld [vmem:[#allocation2 + $0x40] sm:$0xff]  ;;  %v1002_v58 = vld [vmem:[#allocation2 + $0x48] sm:$0xff]  ;;  %v1858_v62 = vpack.c.bf16 %v1004_v61, %v1003_v60  ;;  %v1007_v2 = vld [vmem:[#allocation2 + $0x70] sm:$0xff] }
 0x209   : > { %v1855_v59 = vpack.c.bf16 %v1002_v58, %v1001_v57  ;;  %v1005_v63 = vld [vmem:[#allocation2 + $0x60] sm:$0xff]  ;;  %v1006_v0 = vld [vmem:[#allocation2 + $0x68] sm:$0xff]  ;;  %v1008_v3 = vld [vmem:[#allocation2 + $0x78] sm:$0xff] }
 0x20a   : > { %1826 = vmatpush3.bf16.msra.mxu0 %v1825_v30  ;;  %v1861_v1 = vpack.c.bf16 %v1006_v0, %v1005_v63  ;;  %v1864_v4 = vpack.c.bf16 %v1008_v3, %v1007_v2  ;;  %v1411_v5 = vld [vmem:[%s3074_s10] ss:$0 sm:$0xff]  ;;  %v1093_v15 = vld [vmem:[#allocation3 + $0x8] sm:$0xff]  ;;  %v1094_v18 = vld [vmem:[#allocation3 + $0x10] sm:$0xff]  ;;  %s1186_s10 = scalar_lea.sflag [#allocation17], %s2786_s9 }
 0x20b   : > { %1827 = vmatprep.subr.bf16.mxu0 %v2399_v23  ;;  %v1092_v14 = vld [vmem:[#allocation3] sm:$0xff]  ;;  %v1095_v20 = vld [vmem:[#allocation3 + $0x18] sm:$0xff]  ;;  %v1097_v24 = vld [vmem:[#allocation3 + $0x28] sm:$0xff] }
 0x20c   : > { %1847 = vmatpush3.bf16.xpose.msra.mxu1 %v1846_v39  ;;  %v1867_v19 = vpack.c.bf16 %v1093_v15, %v1092_v14  ;;  %v1870_v21 = vpack.c.bf16 %v1095_v20, %v1094_v18  ;;  %v1096_v22 = vld [vmem:[#allocation3 + $0x20] sm:$0xff]  ;;  %v1099_v16 = vld [vmem:[#allocation3 + $0x38] sm:$0xff]  ;;  %v1101_v28 = vld [vmem:[#allocation3 + $0x48] sm:$0xff] }
 0x20d   : > { %1848 = vmatprep.subr.bf16.mxu1 %v2399_v23  ;;  %v1873_v25 = vpack.c.bf16 %v1097_v24, %v1096_v22  ;;  %v1100_v27 = vld [vmem:[#allocation3 + $0x40] sm:$0xff]  ;;  %v1102_v34 = vld [vmem:[#allocation3 + $0x50] sm:$0xff]  ;;  %v1103_v35 = vld [vmem:[#allocation3 + $0x58] sm:$0xff]  ;;  %s1414_s25 = sshll.u32 %s3075_s24, 1  ;;  %s2402_s24 = smov [#allocation16]  }
 0x20e   : > { %1829 = vmatpush3.bf16.msra.mxu0 %v1828_v36  ;;  %v1879_v29 = vpack.c.bf16 %v1101_v28, %v1100_v27  ;;  %v1882_v36 = vpack.c.bf16 %v1103_v35, %v1102_v34  ;;  %v1104_v37 = vld [vmem:[#allocation3 + $0x60] sm:$0xff]  ;;  %v1105_v38 = vld [vmem:[#allocation3 + $0x68] sm:$0xff]  ;;  %v1107_v41 = vld [vmem:[#allocation3 + $0x78] sm:$0xff]  ;;  %s2893_s27 = sadd.s32 %s3076_s7, %s1414_s25  ;;  %s2227_s7 = sshll.u32 %s2402_s24, 4  ;;  %s2228_s7 = int_to_ptr.vmem [resolvable:$false] %s2227_s7 }
 0x20f   : > { %1830 = vmatprep.subr.bf16.mxu0 %v2399_v23  ;;  %v1885_v39 = vpack.c.bf16 %v1105_v38, %v1104_v37  ;;  %s3029_s26 = sshll.u32 %s2893_s27, 7  ;;  %s2229_s25 = scalar_lea.vmem %s2228_s7, 256 }
 0x210   : > { %s2901_s12 = scalar_lea.hbm %s3077_s2, %s3029_s26  ;;  %p2230_p1 = scmp.lt.s32.totalorder %s1217_s13, %s2228_s7 }
 0x211   : > { %p2231_p3 = scmp.lt.s32.totalorder %s2229_s25, %s2223_s3 }
 0x212   : > { %1832 = vmatpush3.bf16.msra.mxu0 %v1831_v40  ;;  %v1106_v40 = vld [vmem:[#allocation3 + $0x70] sm:$0xff] }
 0x213   : > { %1833 = vmatprep.subr.bf16.mxu0 %v2399_v23  ;;  %v1888_v42 = vpack.c.bf16 %v1107_v41, %v1106_v40  ;;  %p2232_p8 = por %p2231_p3, %p2230_p1 }
 0x214   : > { %1850 = vmatpush3.bf16.xpose.msra.mxu1 %v1849_v48 }
 0x215   : > { %1851 = vmatprep.subr.bf16.mxu1 %v2399_v23  ;;  %p2233_p7 = pnand %p2232_p8, %p2226_p11 }
 0x216   : > { %1835 = vmatpush3.bf16.msra.mxu0 %v1834_v45 }
 0x217   : > { %1836 = vmatprep.subr.bf16.mxu0 %v2399_v23 }
 0x21a   : > { %1838 = vmatpush3.bf16.msra.mxu0 %v1837_v49 }
 0x21b   : > { %1839 = vmatprep.subr.bf16.mxu0 %v2399_v23 }
 0x21c   : > { %1853 = vmatpush3.bf16.xpose.msra.mxu1 %v1852_v55 }
 0x21d   : > { %1854 = vmatprep.subr.bf16.mxu1 %v2399_v23 }
 0x21e   : > { %1841 = vmatpush3.bf16.msra.mxu0 %v1840_v54 }
 0x21f   : > { %1866 = vmatprep.subr.bf16.mxu0 %v2399_v23 }
 0x221   : > { %1682 = vmatmul.mubr.f32.vlgmr.msra.gmra.mrb[0].mxu0 %v899_v56 }
 0x222   : > { %1751 = vmatprep.mubr.msk.f32.mxu0 %vm2400_vm0, %v2401_v26  ;;  %1868 = vmatpush3.bf16.msra.mxu0 %v1867_v19  ;;  %v1098_v26 = vld [vmem:[#allocation3 + $0x30] sm:$0xff] }
 0x223   : > { %1869 = vmatprep.subr.bf16.mxu0 %v2399_v23  ;;  %v1876_v17 = vpack.c.bf16 %v1099_v16, %v1098_v26 }
 0x224   : > { %1856 = vmatpush3.bf16.xpose.msra.mxu1 %v1855_v59 }
 0x225   : > { %1857 = vmatprep.subr.bf16.mxu1 %v2399_v23 }
 0x226   : > { %1871 = vmatpush3.bf16.msra.mxu0 %v1870_v21 }
 0x227   : > { %1872 = vmatprep.subr.bf16.mxu0 %v2399_v23 }
 0x22a   : > { %1874 = vmatpush3.bf16.msra.mxu0 %v1873_v25 }
 0x22b   : > { %1875 = vmatprep.subr.bf16.mxu0 %v2399_v23 }
 0x22c   : > { %1859 = vmatpush3.bf16.xpose.msra.mxu1 %v1858_v62 }
 0x22d   : > { %1860 = vmatprep.subr.bf16.mxu1 %v2399_v23 }
 0x22e   : > { %1877 = vmatpush3.bf16.msra.mxu0 %v1876_v17 }
 0x22f   : > { %1878 = vmatprep.subr.bf16.mxu0 %v2399_v23 }
 0x232   : > { %1880 = vmatpush3.bf16.msra.mxu0 %v1879_v29 }
 0x233   : > { %1881 = vmatprep.subr.bf16.mxu0 %v2399_v23 }
 0x234   : > { %1862 = vmatpush3.bf16.xpose.msra.mxu1 %v1861_v1 }
 0x235   : > { %1863 = vmatprep.subr.bf16.mxu1 %v2399_v23 }
 0x236   : > { %1883 = vmatpush3.bf16.msra.mxu0 %v1882_v36 }
 0x237   : > { %1884 = vmatprep.subr.bf16.mxu0 %v2399_v23 }
 0x23a   : > { %1886 = vmatpush3.bf16.msra.mxu0 %v1885_v39 }
 0x23b   : > { %1887 = vmatprep.subr.bf16.mxu0 %v2399_v23 }
 0x23c   : > { %1865 = vmatpush3.bf16.xpose.msra.mxu1 %v1864_v4 }
 0x23e   : > { %1889 = vmatpush3.bf16.msra.mxu0 %v1888_v42 }
 0x2f4   : > { %v989_v6 = vpop.f32.mrb[0].mxu0 }
 0x2f5   : > { %v990_v7 = vadd.f32 %v1411_v5, %v989_v6  ;;  %v1683_v8 = vpop.f32.mrb[1].mxu0 }
 0x2f7   : > { %1717 = vmatmul.mubr.f32.vlgmr.msra.gmra.mrb[0].mxu1 %v990_v7 }
 0x3ca   : > { %v1075_v11 = vpop.f32.mrb[0].mxu1 }
 0x3cb   : > { %v1718_v12 = vpop.f32.mrb[1].mxu1  ;;  %v1082_v13 = vsel %vm1081_vm1, %v1075_v11, -inf }
 0x3cc   : > { %1083 = vmax.xlane.f32.xlu0 %v1082_v13 }
 0x459   : > { %v1084_v30 = vpop.xlane.xlu0 %1083 }
 0x45a   : > { %v1085_v31 = vsub.f32 %v1082_v13, %v1084_v30 }
 0x45c   : > { %v1086_v32 = vmul.f32 1.442695, %v1085_v31 }
 0x45e   : > { %2045 = vpow2.f32 %v1086_v32 }
 0x468   : > { %v2046_v33 = vpop.eup %2045 }
 0x469   : > { %1088 = vadd.xlane.f32.xlu0 %v2046_v33 }
 0x4f6   : > { %v1089_v43 = vpop.xlane.xlu0 %1088 }
 0x4f7   : > { %2047 = vrcp.f32 %v1089_v43 }
 0x501   : > { %v2048_v44 = vpop.eup %2047 }
 0x502   : > { %v1091_v45 = vmul.f32 %v2048_v44, %v2046_v33 }
 0x504   : > { %1752 = vmatmul.mubr.f32.vlgmr.msra.gmra.mrb[2].mxu0 %v1091_v45  ;;  %1179 = vst [vmem:[%s494_s11] sm:$0xff] %v1091_v45 }
 0x505   : > { %2236 = shalt.err (!%p2233_p7)
}
 0x506   : > { %s2237_s11 = scalar_lea.hbm %s2901_s12, 128  ;;  %s2241_s24 = scalar_lea.hbm %s3077_s2, 512 }
 0x507   : > { %p2238_p13 = scmp.ne.s32.totalorder %s2901_s12, %s2237_s11  ;;  %p2242_p6 = scmp.lt.u32.totalorder %s2901_s12, %s3077_s2 }
 0x508   : > { %p2243_p2 = scmp.lt.u32.totalorder %s2241_s24, %s2237_s11  ;;  %p2245_p4 = scmp.lt.u32.totalorder %s2237_s11, %s2901_s12 }
 0x509   : > { %p2239_p0 = pnand %p2238_p13, %p3078_p5 }
 0x50a   : > { %p2244_p12 = por %p2243_p2, %p2242_p6 }
 0x50b   : > { %p2240_p10 = pneg %p2239_p0 }
 0x50c   : > { %p2246_p9 = por %p2245_p4, %p2244_p12 }
 0x50e   : > { %p2247_p11 = pnand %p2246_p9, %p2240_p10 }
 0x510   : > { %2250 = shalt.err (!%p2247_p11)
}
 0x511   : > { %1909 = dma.vmem_to_hbm [thread:$0]  (%p3078_p5), %s1217_s13, 128, %s2901_s12, %s1186_s10  }
 0x512   : > { %s3079_s3 = scalar_lea.vmem [#allocation15], %s2789_s19  ;;  %s3080_s6 = sshll.u32 %s2893_s27, 7 }
 0x513   : > { %s1201_s25 = sshll.u32 %s3079_s3, 4  ;;  %s3081_s24 = sld [smem:[#allocation34_spill]]  ;;  %s2932_s25 = int_to_ptr.vmem [resolvable:$true] %s1201_s25 }
 0x514   : > { %s3082_s11 = smov %s3079_s3  ;;  %s1181_s0 = scalar_lea.sflag [#allocation6], %s2786_s9 }
 0x515   : > { %s2251_s2 = scalar_lea.vmem %s2932_s25, 128  ;;  %s2403_s27 = smov [#allocation15]  }
 0x516   : > { %p2252_p1 = scmp.ne.s32.totalorder %s2932_s25, %s2251_s2  ;;  %s2255_s12 = sshll.u32 %s2403_s27, 4  ;;  %s2256_s12 = int_to_ptr.vmem [resolvable:$false] %s2255_s12 }
 0x517   : > { %s2257_s13 = scalar_lea.vmem %s2256_s12, 256  ;;  %p2258_p7 = scmp.lt.s32.totalorder %s2932_s25, %s2256_s12 }
 0x518   : > { %p2253_p3 = pnand %p2252_p1, %p3078_p5  ;;  %p2259_p13 = scmp.lt.s32.totalorder %s2257_s13, %s2251_s2 }
 0x519   : > { %s2930_s7 = scalar_lea.hbm %s3081_s24, %s3080_s6 }
 0x51a   : > { %p2254_p8 = pneg %p2253_p3  ;;  %p2260_p0 = por %p2259_p13, %p2258_p7 }
 0x51c   : > { %p2261_p10 = pnand %p2260_p0, %p2254_p8 }
 0x5d7   : > { %v1174_v23 = vpop.f32.mrb[2].mxu0 }
 0x5d8   : > { %1178 = vst [vmem:[%s3082_s11] sm:$0xff] %v1174_v23  ;;  %v1753_v46 = vpop.f32.mrb[3].mxu0 }
 0x5d9   : > { %2264 = shalt.err (!%p2261_p10)
}
 0x5da   : > { %s2265_s9 = scalar_lea.hbm %s2930_s7, 128  ;;  %s2269_s3 = scalar_lea.hbm %s3081_s24, 512 }
 0x5db   : > { %p2266_p6 = scmp.ne.s32.totalorder %s2930_s7, %s2265_s9  ;;  %p2270_p4 = scmp.lt.u32.totalorder %s2930_s7, %s3081_s24 }
 0x5dc   : > { %p2271_p9 = scmp.lt.u32.totalorder %s2269_s3, %s2265_s9  ;;  %p2273_p1 = scmp.lt.u32.totalorder %s2265_s9, %s2930_s7 }
 0x5dd   : > { %p2267_p2 = pnand %p2266_p6, %p3078_p5 }
 0x5de   : > { %p2272_p11 = por %p2271_p9, %p2270_p4 }
 0x5df   : > { %p2268_p12 = pneg %p2267_p2 }
 0x5e0   : > { %p2274_p3 = por %p2273_p1, %p2272_p11 }
 0x5e2   : > { %p2275_p8 = pnand %p2274_p3, %p2268_p12 }
 0x5e4   : > { %2278 = shalt.err (!%p2275_p8)
}
 0x5e5   : > { %1908 = dma.vmem_to_hbm [thread:$0]  (%p3078_p5), %s2932_s25, 128, %s2930_s7, %s1181_s0  }
 0x5e6 PF: > { %p1946_p7 = scmp.ge.s32.totalorder %s2389_s23, 2  ;;  %s1228_s2 = sand.u32 1, %s2361_s16  }
 0x5e7   : > { %p3083_p13 = scmp.ne.s32.totalorder %s3065_s29, 0  ;;  %s1229_s28 = scalar_lea.sflag [#allocation6], %s1228_s2 }
 0x5e9   : > { %p1933_p0 = pnand %p1946_p7, %p3083_p13 }
 0x5eb   : > { %2340 = dma.done.wait (!%p1933_p0), %s1229_s28, 128  }
 0x5ec   : > { %2342 = vsyncadd (!%p1933_p0), %s1229_s28, 4294967168  ;;  %s1238_s11 = scalar_lea.sflag [#allocation17], %s1228_s2 }
 0x5ed   : > { %2344 = dma.done.wait (!%p1933_p0), %s1238_s11, 128  }
 0x5ee   : > { %2346 = vsyncadd (!%p1933_p0), %s1238_s11, 4294967168  ;;  %s33_s23 = sadd.s32 1, %s2389_s23   ;;  %s3084_s13 = sld [smem:[#allocation24_spill]] }
 0x5ef   : > { %p30_p10 = scmp.ge.s32.totalorder %s33_s23, 6   ;;  %s3085_s0 = smov %s2726_s14 }
 0x5f0   : > { %s3086_s8 = smov %s3097_s20  ;;  %s3087_s14 = smov %s2357_s15 }
 0x5f1   : > { %s3088_s15 = smov %s3085_s0  ;;  %s3089_s16 = smov %s2365_s17 }
 0x5f2   : > { %s3090_s17 = smov %s2369_s18  ;;  %s3091_s18 = smov %s2729_s1 }
 0x5f3   : > { %s3092_s19 = smov %s2381_s21  ;;  %s3093_s20 = smov %s2385_s22 }
 0x5f4   : > { %s3094_s21 = smov %s3086_s8  ;;  %s3095_s22 = smov %s3101_s30 }
 0x5f5   :  { %32 = sbr.rel (!%p30_p10) target bundleno = 24 (0x18), region = 144 }
 0x5fc   :  { %1243 = vsyncpa [#allocation5], 1 }
 0x5fd   :  { %1245 = vsyncpa [#allocation5 + $0x1], 1 }
 0x5fe   :  { %1246 = vsyncpa [#allocation8], 1 }
 0x5ff   :  { %1247 = vsyncpa [#allocation11], 1 }
 0x600   :  { %1248 = vsyncpa [#allocation14], 1 }
 0x601   :  { %1249 = vsyncpa [#allocation6], 1 }
 0x602   :  { %1251 = vsyncpa [#allocation6 + $0x1], 1 }
 0x603   :  { %1252 = vsyncpa [#allocation17], 1 }
 0x604   :  { %1254 = vsyncpa [#allocation17 + $0x1], 1 }

// kernel: tpu_custom_call.1
= control target key start
LH: loop header
LB: loop body
LE: loop exit
PB: predicated region body
PF: predicated region fallthrough
CT: control target
= control target key end

     0   :  { %s3100_s0 = inlined_call_operand.hbm [shape: f32[2,16,128], index: 0, kind: input, shape index: {}]   ;;  %s3101_s1 = inlined_call_operand.hbm [shape: f32[2,128,128], index: 1, kind: input, shape index: {}]   ;;  %s3102_s2 = inlined_call_operand.hbm [shape: f32[2,128,128], index: 2, kind: input, shape index: {}]   ;;  %s3103_s3 = inlined_call_operand.hbm [shape: f32[128,128], index: 3, kind: input, shape index: {}]   ;;  %s3104_s4 = inlined_call_operand.hbm [shape: f32[128,128], index: 4, kind: input, shape index: {}]   ;;  %s3105_s5 = inlined_call_operand.hbm [shape: f32[128,128], index: 5, kind: input, shape index: {}]   ;;  %s3106_s6 = inlined_call_operand.vmem [shape: f32[1,128], index: 6, kind: input, shape index: {}]   ;;  %s3107_s7 = inlined_call_operand.vmem [shape: f32[1,128], index: 7, kind: input, shape index: {}]   ;;  %s3108_s8 = inlined_call_operand.vmem [shape: f32[1,128], index: 8, kind: input, shape index: {}]   ;;  %s3109_s9 = inlined_call_operand.hbm [shape: f32[2,16,128], index: 9, kind: output, shape index: {0}]   ;;  %s3110_s10 = inlined_call_operand.hbm [shape: f32[2,16,128], index: 10, kind: output, shape index: {1}]  }
   0x1   :  { %3142 = sst [smem:[#allocation34_spill]] %s3100_s0 }
   0x2   :  { %3143 = sst [smem:[#allocation35_spill]] %s3101_s1 }
   0x3   :  { %3144 = sst [smem:[#allocation36_spill]] %s3103_s3 }
   0x4   :  { %3145 = sst [smem:[#allocation37_spill]] %s3104_s4 }
   0x5   :  { %3146 = sst [smem:[#allocation38_spill]] %s3105_s5 }
   0x6   :  { %3147 = sst [smem:[#allocation39_spill]] %s3106_s6 }
   0x7   :  { %3148 = sst [smem:[#allocation40_spill]] %s3107_s7 }
   0x8   :  { %3149 = sst [smem:[#allocation41_spill]] %s3108_s8 }
   0x9   :  { %3150 = sst [smem:[#allocation42_spill]] %s3109_s9 }
   0xa   :  { %3151 = sst [smem:[#allocation43_spill]] %s3110_s10 }
   0xb   :  { %16 = vsyncpa [#allocation5], 0 }
   0xc   :  { %18 = vsyncpa [#allocation5 + $0x1], 0 }
   0xd   :  { %19 = vsyncpa [#allocation8], 0 }
   0xe   :  { %21 = vsyncpa [#allocation8 + $0x1], 0 }
   0xf   :  { %22 = vsyncpa [#allocation11], 0 }
  0x10   :  { %23 = vsyncpa [#allocation14], 0 }
  0x11   :  { %24 = vsyncpa [#allocation6], 0 }
  0x12   :  { %26 = vsyncpa [#allocation6 + $0x1], 0 }
  0x13   :  { %27 = vsyncpa [#allocation17], 0 }
  0x14   :  { %29 = vsyncpa [#allocation17 + $0x1], 0  ;;  %s2513_s13 = smov 0   ;;  %s2515_s14 = smov 0  }
  0x15   :  { %s2517_s15 = smov 0   ;;  %s2519_s16 = smov 0  }
  0x16   :  { %s2521_s17 = smov 0   ;;  %s2523_s18 = smov 0  }
  0x17   :  { %s2525_s19 = smov 0   ;;  %s2527_s20 = smov 0  }
  0x18   :  { %s2529_s21 = smov 0   ;;  %s2531_s22 = smov 0  }
  0x19   :  { %s2533_s23 = smov 0  }
  0x1a LB: > { %3152 = sst [smem:[#allocation24_spill]] %s2407_s14  ;;  %s2567_s24 = sadd.s32 4294967295, %s2443_s23   ;;  %s2443_s23 = sphi %s2533_s23, %s35_s23   ;;  %s2439_s22 = sphi %s2531_s22, %s3213_s22   ;;  %s2435_s21 = sphi %s2529_s21, %s3220_s21   ;;  %s2431_s20 = sphi %s2527_s20, %s3211_s20   ;;  %s2427_s19 = sphi %s2525_s19, %s3219_s19   ;;  %s2423_s18 = sphi %s2523_s18, %s3218_s18   ;;  %s2419_s17 = sphi %s2521_s17, %s3217_s17   ;;  %s2415_s16 = sphi %s2519_s16, %s3216_s16   ;;  %s2411_s15 = sphi %s2517_s15, %s3215_s15   ;;  %s2407_s14 = sphi %s2515_s14, %s3214_s14   ;;  %s2403_s13 = sphi %s2513_s13, %s3210_s13  }
  0x1b   : > { %3153 = sst [smem:[#allocation25_spill]] %s2427_s19  ;;  %p95_p0 = scmp.ne.s32.totalorder %s2407_s14, %s2403_s13 }
  0x1c   : > { %3154 = sst [smem:[#allocation26_spill]] %s2431_s20  ;;  %p3113_p1 = scmp.eq.s32.totalorder %s2567_s24, 0 }
  0x1d   : > { %3155 = sst [smem:[#allocation27_spill]] %s2439_s22  ;;  %p1441_p2 = scmp.ge.s32.totalorder %s2443_s23, 1 }
  0x1e   : > { %3156 = sst [smem:[#allocation28_spill]] %s2567_s24  ;;  %p314_p3 = scmp.lt.s32.totalorder %s2443_s23, 5 }
  0x1f   : > { %p2575_p4 = por %p95_p0, %p3113_p1  ;;  %s2445_s27 = smov [#allocation10]  }
  0x20   : > { %p2579_p5 = pnand %p1441_p2, %p314_p3  ;;  %s326_s28 = sshll.u32 %s2445_s27, 4  ;;  %s327_s28 = int_to_ptr.vmem [resolvable:$true] %s326_s28 }
  0x21   : > { %s3157_s25 = scalar_select %p2575_p4, 1, 0 }
  0x22   : > { %s3159_s26 = scalar_select %p2579_p5, 1, 0 }
  0x23   : > { %3158 = sst [smem:[#allocation29_spill]] %s3157_s25  ;;  %p1968_p6 = pneg %p2579_p5 }
  0x24   : > { %3160 = sst [smem:[#allocation30_spill]] %s3159_s26 }
  0x25   : > { %p2587_p7 = pnand %p1968_p6, %p3113_p1  ;;  %s3162_s3 = sld [smem:[#allocation36_spill]] }
  0x27   : > { %s3161_s29 = scalar_select %p2587_p7, 1, 0 }
  0x28   : > { %p2600_p10 = pneg %p2587_p7 }
  0x2b   : > { %s2103_s12 = scalar_lea.hbm %s3162_s3, 2048 }
  0x2c   : > { %p2104_p9 = scmp.ne.s32.totalorder %s3162_s3, %s2103_s12  ;;  %p2110_p13 = scmp.lt.u32.totalorder %s2103_s12, %s3162_s3 }
  0x2e   : > { %p2106_p11 = pnand %p2600_p10, %p2104_p9 }
  0x30   : > { %p2107_p12 = pneg %p2106_p11 }
  0x32   : > { %p2112_p0 = pnand %p2110_p13, %p2107_p12 }
  0x34   : > { %2115 = shalt.err (!%p2112_p0)
}
  0x35   : > { %s2116_s30 = scalar_lea.vmem %s327_s28, 2048  ;;  %p2124_p1 = scmp.lt.s32.totalorder %s327_s28, %s327_s28 }
  0x36   : > { %p2117_p2 = scmp.ne.s32.totalorder %s327_s28, %s2116_s30  ;;  %p2125_p8 = scmp.lt.s32.totalorder %s2116_s30, %s2116_s30 }
  0x38   : > { %p2119_p3 = pnand %p2117_p2, %p2600_p10  ;;  %p2126_p4 = por %p2125_p8, %p2124_p1 }
  0x3a   : > { %p2120_p6 = pneg %p2119_p3 }
  0x3c   : > { %p2127_p5 = pnand %p2126_p4, %p2120_p6 }
  0x3e   : > { %2130 = shalt.err (!%p2127_p5)
}
  0x3f   : > { %s3117_s9 = smov 128   ;;  %s3119_s10 = smov 8  }
  0x40   : > { %1971 = dma.hbm_to_vmem [thread:$0]  (!%p2587_p7), %s3162_s3, 2048, %s327_s28, [#allocation11], %s3117_s9, %s3117_s9, %s3119_s10  }
  0x41   : > { %p89_p1 = scmp.ne.s32.totalorder %s2411_s15, %s2407_s14  ;;  %p3121_p4 = scmp.lt.s32.totalorder %s2443_s23, 4 }
  0x42   : > { %s395_s12 = sand.u32 1, %s2443_s23   ;;  %s397_s13 = sand.u32 1, %s2411_s15  }
  0x43   : > { %p3164_p5 = scmp.eq.s32.totalorder %s2443_s23, 0  ;;  %s2626_s30 = sshll.u32 %s397_s13, 7 }
  0x44   : > { %s3116_s6 = sshll.u32 %s2439_s22, 11  ;;  %s3165_s1 = sld [smem:[#allocation35_spill]] }
  0x45   : > { %p91_p8 = por %p89_p1, %p3164_p5  ;;  %s399_s28 = scalar_lea.vmem [#allocation7], %s2626_s30 }
  0x46   : > { %s406_s20 = sshll.u32 %s399_s28, 4  ;;  %s2645_s13 = scalar_lea.sflag [#allocation8], %s395_s12  ;;  %s2643_s20 = int_to_ptr.vmem [resolvable:$true] %s406_s20 }
  0x47   : > { %p2639_p9 = pnand %p3121_p4, %p91_p8 }
  0x49   : > { %s3166_s11 = scalar_select %p2639_p9, 1, 0 }
  0x4a   : > { %s2634_s19 = scalar_lea.hbm %s3165_s1, %s3116_s6  ;;  %p3134_p12 = pneg %p2639_p9 }
  0x4b   : > { %3167 = sst [smem:[#allocation31_spill]] %s3166_s11  ;;  %s2131_s7 = scalar_lea.hbm %s2634_s19, 2048 }
  0x4c   : > { %p2132_p11 = scmp.ne.s32.totalorder %s2634_s19, %s2131_s7  ;;  %s2136_s6 = scalar_lea.hbm %s3165_s1, 4096 }
  0x4d   : > { %p2137_p2 = scmp.lt.u32.totalorder %s2634_s19, %s3165_s1  ;;  %p2138_p3 = scmp.lt.u32.totalorder %s2136_s6, %s2131_s7 }
  0x4e   : > { %p2134_p13 = pnand %p3134_p12, %p2132_p11  ;;  %p2140_p1 = scmp.lt.u32.totalorder %s2131_s7, %s2634_s19 }
  0x4f   : > { %p2139_p6 = por %p2138_p3, %p2137_p2 }
  0x50   : > { %p2135_p0 = pneg %p2134_p13 }
  0x51   : > { %p2141_p5 = por %p2140_p1, %p2139_p6 }
  0x53   : > { %p2142_p8 = pnand %p2141_p5, %p2135_p0 }
  0x55   : > { %2145 = shalt.err (!%p2142_p8)
}
  0x56   : > { %s2146_s12 = scalar_lea.vmem %s2643_s20, 2048  ;;  %s2448_s8 = smov [#allocation7]  }
  0x57   : > { %p2147_p11 = scmp.ne.s32.totalorder %s2643_s20, %s2146_s12  ;;  %s2151_s28 = sshll.u32 %s2448_s8, 4  ;;  %s2152_s28 = int_to_ptr.vmem [resolvable:$false] %s2151_s28 }
  0x58   : > { %s2153_s9 = scalar_lea.vmem %s2152_s28, 4096  ;;  %p2154_p7 = scmp.lt.s32.totalorder %s2643_s20, %s2152_s28 }
  0x59   : > { %p2149_p13 = pnand %p2147_p11, %p3134_p12  ;;  %p2155_p2 = scmp.lt.s32.totalorder %s2153_s9, %s2146_s12 }
  0x5b   : > { %p2150_p4 = pneg %p2149_p13  ;;  %p2156_p3 = por %p2155_p2, %p2154_p7 }
  0x5d   : > { %p2157_p6 = pnand %p2156_p3, %p2150_p4 }
  0x5f   : > { %2160 = shalt.err (!%p2157_p6)
}
  0x60   : > { %s3168_s6 = smov 8   ;;  %s3169_s10 = smov 128  }
  0x61   : > { %1984 = dma.hbm_to_vmem [thread:$0]  (!%p2639_p9), %s2634_s19, 2048, %s2643_s20, %s2645_s13, %s3169_s10, %s3169_s10, %s3168_s6  }
  0x62   : > { %s3170_s7 = sshll.u32 %s2439_s22, 11  ;;  %s420_s28 = scalar_lea.vmem [#allocation9], %s2626_s30 }
  0x63   : > { %s2681_s12 = scalar_lea.hbm %s3102_s2, %s3170_s7  ;;  %s2684_s9 = sshll.u32 %s420_s28, 4  ;;  %s2729_s9 = int_to_ptr.vmem [resolvable:$true] %s2684_s9 }
  0x64   : > { %s2449_s3 = smov [#allocation12]   ;;  %s3171_s4 = sld [smem:[#allocation37_spill]] }
  0x65   : > { %s339_s25 = sshll.u32 %s2449_s3, 4  ;;  %s340_s25 = int_to_ptr.vmem [resolvable:$true] %s339_s25 }
  0x6a   : > { %s2161_s0 = scalar_lea.hbm %s3171_s4, 2048 }
  0x6b   : > { %p2162_p7 = scmp.ne.s32.totalorder %s3171_s4, %s2161_s0  ;;  %p2168_p1 = scmp.lt.u32.totalorder %s2161_s0, %s3171_s4 }
  0x6d   : > { %p2164_p4 = pnand %p2162_p7, %p2600_p10 }
  0x6f   : > { %p2165_p0 = pneg %p2164_p4 }
  0x71   : > { %p2170_p5 = pnand %p2168_p1, %p2165_p0 }
  0x73   : > { %2173 = shalt.err (!%p2170_p5)
}
  0x74   : > { %s2174_s30 = scalar_lea.vmem %s340_s25, 2048  ;;  %p2182_p2 = scmp.lt.s32.totalorder %s340_s25, %s340_s25 }
  0x75   : > { %p2175_p8 = scmp.ne.s32.totalorder %s340_s25, %s2174_s30  ;;  %p2183_p3 = scmp.lt.s32.totalorder %s2174_s30, %s2174_s30 }
  0x77   : > { %p2177_p11 = pnand %p2175_p8, %p2600_p10  ;;  %p2184_p6 = por %p2183_p3, %p2182_p2 }
  0x79   : > { %p2178_p13 = pneg %p2177_p11 }
  0x7b   : > { %p2185_p12 = pnand %p2184_p6, %p2178_p13 }
  0x7d   : > { %2188 = shalt.err (!%p2185_p12)
}
  0x7e   : > { %p3172_p7 = scmp.ne.s32.totalorder %s3161_s29, 0  ;;  %s2450_s14 = smov [#allocation13]  }
  0x7f   : > { %s352_s24 = sshll.u32 %s2450_s14, 4  ;;  %s3173_s5 = sld [smem:[#allocation38_spill]]  ;;  %s353_s24 = int_to_ptr.vmem [resolvable:$true] %s352_s24 }
  0x80   : > { %1974 = dma.hbm_to_vmem [thread:$0]  (!%p3172_p7), %s3171_s4, 2048, %s340_s25, [#allocation11], %s3169_s10, %s3169_s10, %s3168_s6  }
  0x85   : > { %s2189_s11 = scalar_lea.hbm %s3173_s5, 2048 }
  0x86   : > { %p2190_p12 = scmp.ne.s32.totalorder %s3173_s5, %s2189_s11  ;;  %p2196_p1 = scmp.lt.u32.totalorder %s2189_s11, %s3173_s5 }
  0x88   : > { %p2192_p4 = pnand %p2190_p12, %p2600_p10 }
  0x8a   : > { %p2193_p0 = pneg %p2192_p4 }
  0x8c   : > { %p2198_p5 = pnand %p2196_p1, %p2193_p0 }
  0x8e   : > { %2201 = shalt.err (!%p2198_p5)
}
  0x8f   : > { %s2202_s25 = scalar_lea.vmem %s353_s24, 2048  ;;  %p2210_p2 = scmp.lt.s32.totalorder %s353_s24, %s353_s24 }
  0x90   : > { %p2203_p8 = scmp.ne.s32.totalorder %s353_s24, %s2202_s25  ;;  %p2211_p3 = scmp.lt.s32.totalorder %s2202_s25, %s2202_s25 }
  0x92   : > { %p2205_p11 = pnand %p2203_p8, %p2600_p10  ;;  %p2212_p6 = por %p2211_p3, %p2210_p2 }
  0x94   : > { %p2206_p13 = pneg %p2205_p11 }
  0x96   : > { %p2213_p9 = pnand %p2212_p6, %p2206_p13 }
  0x98   : > { %2216 = shalt.err (!%p2213_p9)
}
  0x99   : > { %s3174_s27 = sld [smem:[#allocation28_spill]]  ;;  %s44_s29 = sadd.s32 1, %s2435_s21 }
  0x9a   : > { %1977 = dma.hbm_to_vmem [thread:$0]  (!%p3172_p7), %s3173_s5, 2048, %s353_s24, [#allocation14], %s3169_s10, %s3169_s10, %s3168_s6  }
  0x9b   : > { %p45_p10 = scmp.ge.s32.totalorder %s44_s29, 2  ;;  %s47_s3 = sadd.s32 1, %s2439_s22 }
  0x9c   : > { %s1440_s0 = sadd.s32 4294967294, %s2443_s23   ;;  %s56_s14 = sadd.s32 1, %s2423_s18 }
  0x9d   : > { %s3222_s29 = smov (%p45_p10, %s44_s29), 0  ;;  %s3224_s3 = smov (!%p45_p10, %s47_s3), %s2439_s22 }
  0x9e   : > { %3175 = sst [smem:[#allocation32_spill]] %s3222_s29  ;;  %s52_s26 = ssub.s32 %s2435_s21, %s3222_s29 }
  0x9f   : > { %p63_p9 = scmp.ne.s32.totalorder %s2423_s18, %s2419_s17  ;;  %p49_p7 = scmp.ge.s32.totalorder %s3224_s3, 2 }
  0xa0   : > { %p69_p12 = scmp.ne.s32.totalorder %s2419_s17, %s2415_s16  ;;  %s82_s24 = sadd.s32 1, %s2411_s15 }
  0xa1   : > { %p273_p4 = scmp.eq.s32.totalorder %s3174_s27, 3  ;;  %s3226_s3 = smov (%p49_p7, %s3224_s3), 0 }
  0xa2   : > { %3176 = sst [smem:[#allocation33_spill]] %s3226_s3  ;;  %p3177_p0 = scmp.eq.s32.totalorder %s3174_s27, 0 }
  0xa3   : > { %p2757_p5 = por %p273_p4, %p63_p9  ;;  %s51_s7 = ssub.s32 %s2439_s22, %s3226_s3 }
  0xa4   : > { %p2750_p1 = por %p3177_p0, %p69_p12  ;;  %p279_p8 = scmp.eq.s32.totalorder %s1440_s0, 3 }
  0xa5   : > { %s3179_s11 = scalar_select %p2757_p5, 1, 0 }
  0xa6   : > { %s3178_s20 = scalar_select %p2750_p1, 1, 0 }
  0xa7   : > { %s53_s8 = sor.u32 %s52_s26, %s51_s7  ;;  %p80_p11 = scmp.eq.s32.totalorder %s51_s7, 0 }
  0xa8   : > { %p54_p13 = scmp.eq.s32.totalorder %s53_s8, 0  ;;  %p2763_p2 = por %p279_p8, %p69_p12 }
  0xa9   : > { %s3181_s1 = sld [smem:[#allocation31_spill]]  ;;  %s375_s30 = sand.u32 1, %s2423_s18  }
  0xaa   : > { %s3180_s28 = scalar_select %p2763_p2, 1, 0 }
  0xab   : > { %s2768_s25 = scalar_select %p80_p11, %s2411_s15, %s82_s24  }
  0xac   : > { %s2771_s19 = scalar_select %p54_p13, %s2423_s18, %s56_s14  }
  0xad   : > { %s1447_s27 = sshll.u32 %s2439_s22, 1  ;;  %p3182_p3 = scmp.eq.s32.totalorder %s2443_s23, 0 }
  0xae   : > { %s1446_s0 = sshll.u32 %s375_s30, 3  ;;  %s384_s26 = sadd.s32 %s2435_s21, %s1447_s27 }
  0xaf   : > { %p65_p6 = por %p3182_p3, %p63_p9  ;;  %s1448_s7 = sshll.u32 %s384_s26, 7 }
  0xb0   : > { %s379_s8 = scalar_lea.vmem [#allocation4], %s1446_s0  ;;  %s3183_s29 = sld [smem:[#allocation34_spill]] }
  0xb1   : > { %s388_s4 = sshll.u32 %s379_s8, 4  ;;  %p3184_p10 = scmp.lt.s32.totalorder %s2443_s23, 4  ;;  %s2788_s4 = int_to_ptr.vmem [resolvable:$true] %s388_s4 }
  0xb2   : > { %s2217_s22 = scalar_lea.hbm %s2681_s12, 2048  ;;  %p3186_p12 = scmp.ne.s32.totalorder %s3181_s1, 0 }
  0xb3   : > { %p2792_p7 = pnand %p3184_p10, %p65_p6  ;;  %p2218_p9 = scmp.ne.s32.totalorder %s2681_s12, %s2217_s22 }
  0xb4   : > { %p3187_p4 = pneg %p3186_p12  ;;  %s2222_s26 = scalar_lea.hbm %s3102_s2, 4096 }
  0xb5   : > { %p2223_p11 = scmp.lt.u32.totalorder %s2681_s12, %s3102_s2  ;;  %p2224_p13 = scmp.lt.u32.totalorder %s2222_s26, %s2217_s22 }
  0xb6   : > { %s2786_s24 = scalar_lea.hbm %s3183_s29, %s1448_s7  ;;  %p2220_p0 = pnand %p2218_p9, %p3187_p4 }
  0xb7   : > { %p2225_p3 = por %p2224_p13, %p2223_p11  ;;  %p2226_p6 = scmp.lt.u32.totalorder %s2217_s22, %s2681_s12 }
  0xb8   : > { %p2221_p8 = pneg %p2220_p0 }
  0xb9   : > { %p2227_p10 = por %p2226_p6, %p2225_p3 }
  0xbb   : > { %p2228_p2 = pnand %p2227_p10, %p2221_p8 }
  0xbd   : > { %2231 = shalt.err (!%p2228_p2)
}
  0xbe   : > { %s2232_s7 = scalar_lea.vmem %s2729_s9, 2048  ;;  %s2451_s8 = smov [#allocation9]  }
  0xbf   : > { %p2233_p9 = scmp.ne.s32.totalorder %s2729_s9, %s2232_s7  ;;  %s2237_s27 = sshll.u32 %s2451_s8, 4  ;;  %s2238_s27 = int_to_ptr.vmem [resolvable:$false] %s2237_s27 }
  0xc0   : > { %s2239_s0 = scalar_lea.vmem %s2238_s27, 4096  ;;  %p2240_p1 = scmp.lt.s32.totalorder %s2729_s9, %s2238_s27 }
  0xc1   : > { %p2235_p0 = pnand %p2233_p9, %p3187_p4  ;;  %p2241_p11 = scmp.lt.s32.totalorder %s2239_s0, %s2232_s7 }
  0xc3   : > { %p2236_p5 = pneg %p2235_p0  ;;  %p2242_p13 = por %p2241_p11, %p2240_p1 }
  0xc5   : > { %p2243_p3 = pnand %p2242_p13, %p2236_p5 }
  0xc7   : > { %2246 = shalt.err (!%p2243_p3)
}
  0xc8   : > { %1987 = dma.hbm_to_vmem [thread:$0]  (!%p3186_p12), %s2681_s12, 2048, %s2729_s9, %s2645_s13, %s3169_s10, %s3169_s10, %s3168_s6  }
  0xc9   : > { %s376_s22 = scalar_lea.sflag [#allocation5], %s375_s30  ;;  %s2247_s26 = scalar_lea.hbm %s2786_s24, 128 }
  0xca   : > { %p2248_p1 = scmp.ne.s32.totalorder %s2786_s24, %s2247_s26  ;;  %p2249_p5 = pneg %p2792_p7 }
  0xcb   : > { %s2252_s3 = scalar_lea.hbm %s3183_s29, 512  ;;  %p2253_p6 = scmp.lt.u32.totalorder %s2786_s24, %s3183_s29 }
  0xcc   : > { %p2250_p2 = pnand %p2249_p5, %p2248_p1  ;;  %p2254_p10 = scmp.lt.u32.totalorder %s2252_s3, %s2247_s26 }
  0xcd   : > { %p2256_p9 = scmp.lt.u32.totalorder %s2247_s26, %s2786_s24 }
  0xce   : > { %p2251_p8 = pneg %p2250_p2  ;;  %p2255_p12 = por %p2254_p10, %p2253_p6 }
  0xd0   : > { %p2257_p4 = por %p2256_p9, %p2255_p12 }
  0xd2   : > { %p2258_p0 = pnand %p2257_p4, %p2251_p8 }
  0xd4   : > { %2261 = shalt.err (!%p2258_p0)
}
  0xd5   : > { %s2262_s13 = scalar_lea.vmem %s2788_s4, 128  ;;  %s2452_s6 = smov [#allocation4]  }
  0xd6   : > { %p2263_p11 = scmp.ne.s32.totalorder %s2788_s4, %s2262_s13  ;;  %s2267_s10 = sshll.u32 %s2452_s6, 4  ;;  %s2268_s10 = int_to_ptr.vmem [resolvable:$false] %s2267_s10 }
  0xd7   : > { %s2269_s12 = scalar_lea.vmem %s2268_s10, 256  ;;  %p2270_p1 = scmp.lt.s32.totalorder %s2788_s4, %s2268_s10 }
  0xd8   : > { %p2265_p13 = pnand %p2263_p11, %p2249_p5  ;;  %p2271_p2 = scmp.lt.s32.totalorder %s2269_s12, %s2262_s13 }
  0xda   : > { %p2266_p3 = pneg %p2265_p13  ;;  %p2272_p6 = por %p2271_p2, %p2270_p1 }
  0xdc   : > { %p2273_p10 = pnand %p2272_p6, %p2266_p3 }
  0xde   : > { %2276 = shalt.err (!%p2273_p10)
}
  0xdf   : > { %1981 = dma.hbm_to_vmem [thread:$0]  (!%p2792_p7), %s2786_s24, 128, %s2788_s4, %s376_s22  }
  0xe0   : > { %s3188_s9 = sld [smem:[#allocation30_spill]] }
  0xe6   : > { %p3189_p8 = scmp.ne.s32.totalorder %s3188_s9, 0 }
  0xe7   : > { %s2853_s30 = sand.u32 (!%p3189_p8), 1, %s2419_s17   ;;  %p3190_p5 = scmp.ne.s32.totalorder (!%p3189_p8), %s3178_s20, 0 }
  0xe8   : > { %439 = sbr.rel (%p3189_p8) target bundleno = 1545 (0x609), region = 56  ;;  %s2856_s27 = sshll.u32 (!%p3189_p8), %s2853_s30, 3 }
  0xe9   : > { %s442_s0 = scalar_lea.sflag (!%p3189_p8), [#allocation5], %s2853_s30  ;;  %s445_s26 = scalar_lea.vmem (!%p3189_p8), [#allocation4], %s2856_s27 }
  0xef   : > { %2378 = dma.done.wait (%p3190_p5), %s442_s0, 128  }
  0xf0   : > { %2380 = vsyncadd (%p3190_p5), %s442_s0, 4294967168  ;;  %s3191_s4 = sld [smem:[#allocation28_spill]]  ;;  %s3192_s24 = sld [smem:[#allocation24_spill]] }
  0xf1   : > { %s3193_s14 = sld [smem:[#allocation29_spill]] }
  0xf6   : > { %s450_s22 = sand.u32 1, %s3191_s4   ;;  %s452_s1 = sand.u32 1, %s3192_s24  }
  0xf7   : > { %s1457_s5 = sshll.u32 %s452_s1, 7  ;;  %s451_s3 = scalar_lea.sflag [#allocation8], %s450_s22 }
  0xf8   : > { %s2866_s7 = scalar_lea.vmem [#allocation7], %s1457_s5  ;;  %p3194_p7 = scmp.ne.s32.totalorder %s3193_s14, 0 }
  0xfa   : > { %2382 = dma.done.wait (%p3194_p7), %s451_s3, 4096  }
  0xfb   : > { %2384 = vsyncadd (%p3194_p7), %s451_s3, 4294963200  ;;  %s2872_s8 = scalar_lea.vmem [#allocation9], %s1457_s5  ;;  %p3195_p12 = scmp.eq.s32.totalorder %s3191_s4, 0 }
  0xfd   : > { %2386 = dma.done.wait (%p3195_p12), [#allocation11], 4096   ;;  %p3196_p9 = pmov %p3195_p12 }
  0xff   : > { %2388 = vsyncadd (%p3196_p9), [#allocation11], 4294963200  ;;  %p3197_p4 = pmov %p3196_p9 }
 0x101   : > { %2390 = dma.done.wait (%p3197_p4), [#allocation14], 2048   ;;  %p3198_p0 = pmov %p3197_p4 }
 0x102   : > { %s519_s20 = scalar_lea.vmem [#allocation15], %s2856_s27  ;;  %s526_s13 = scalar_lea.vmem [#allocation16], %s2856_s27 }
 0x103   : > { %2392 = vsyncadd (%p3198_p0), [#allocation14], 4294965248  ;;  %s3199_s6 = sld [smem:[#allocation25_spill]] }
 0x109   : > { %p1464_p11 = scmp.ne.s32.totalorder %s3199_s6, 0 }
 0x10a   : > { %v563_v0 = vld [vmem:[#allocation12] sm:$0xff] (!%p1464_p11)  ;;  %v564_v1 = vld [vmem:[#allocation12 + $0x8] sm:$0xff] (!%p1464_p11)  ;;  %v565_v5 = vld [vmem:[#allocation12 + $0x10] sm:$0xff] (!%p1464_p11)  ;;  %s3200_s9 = sld [smem:[#allocation40_spill]] (!%p1464_p11)  ;;  %s3201_s24 = sld [smem:[#allocation41_spill]] (!%p1464_p11) }
 0x10b   : > { %530 = sbr.rel (%p1464_p11) target bundleno = 546 (0x222), region = 84  ;;  %v731_v2 = vld [vmem:[#allocation13] sm:$0xff] (!%p1464_p11)  ;;  %v1810_v3 = vpack.c.bf16 (!%p1464_p11), %v564_v1, %v563_v0  ;;  %v732_v4 = vld [vmem:[#allocation13 + $0x8] sm:$0xff] (!%p1464_p11)  ;;  %v566_v6 = vld [vmem:[#allocation12 + $0x18] sm:$0xff] (!%p1464_p11) }
 0x10c   : > { %v1842_v7 = vpack.c.bf16 (!%p1464_p11), %v732_v4, %v731_v2  ;;  %v1814_v8 = vpack.c.bf16 (!%p1464_p11), %v566_v6, %v565_v5  ;;  %v733_v9 = vld [vmem:[#allocation13 + $0x10] sm:$0xff] (!%p1464_p11)  ;;  %v734_v10 = vld [vmem:[#allocation13 + $0x18] sm:$0xff] (!%p1464_p11)  ;;  %v567_v11 = vld [vmem:[#allocation12 + $0x20] sm:$0xff] (!%p1464_p11) }
 0x10d   : > { %1811 = vmatprep.subr.bf16.mxu0 (!%p1464_p11), %v1810_v3  ;;  %v1846_v12 = vpack.c.bf16 (!%p1464_p11), %v734_v10, %v733_v9  ;;  %v568_v13 = vld [vmem:[#allocation12 + $0x28] sm:$0xff] (!%p1464_p11)  ;;  %v735_v14 = vld [vmem:[#allocation13 + $0x20] sm:$0xff] (!%p1464_p11)  ;;  %v569_v18 = vld [vmem:[#allocation12 + $0x30] sm:$0xff] (!%p1464_p11) }
 0x10e   : > { %v736_v15 = vld [vmem:[#allocation13 + $0x28] sm:$0xff] (!%p1464_p11)  ;;  %1843 = vmatprep.subr.bf16.mxu1 (!%p1464_p11), %v1842_v7  ;;  %1813 = vmatpush3.bf16.msra.mxu0 (!%p1464_p11), %v1810_v3  ;;  %v1818_v16 = vpack.c.bf16 (!%p1464_p11), %v568_v13, %v567_v11  ;;  %v570_v19 = vld [vmem:[#allocation12 + $0x38] sm:$0xff] (!%p1464_p11)  ;;  %v737_v20 = vld [vmem:[#allocation13 + $0x30] sm:$0xff] (!%p1464_p11) }
 0x10f   : > { %1845 = vmatpush3.bf16.msra.mxu1 (!%p1464_p11), %v1842_v7  ;;  %1815 = vmatprep.subr.bf16.mxu0 (!%p1464_p11), %v1814_v8  ;;  %v1850_v17 = vpack.c.bf16 (!%p1464_p11), %v736_v15, %v735_v14  ;;  %v738_v21 = vld [vmem:[#allocation13 + $0x38] sm:$0xff] (!%p1464_p11)  ;;  %v1822_v22 = vpack.c.bf16 (!%p1464_p11), %v570_v19, %v569_v18  ;;  %v571_v24 = vld [vmem:[#allocation12 + $0x40] sm:$0xff] (!%p1464_p11)  ;;  %v572_v25 = vld [vmem:[#allocation12 + $0x48] sm:$0xff] (!%p1464_p11) }
 0x110   : > { %1847 = vmatprep.subr.bf16.mxu1 (!%p1464_p11), %v1846_v12  ;;  %v1854_v23 = vpack.c.bf16 (!%p1464_p11), %v738_v21, %v737_v20  ;;  %v531_v26 = vld [vmem:[%s2866_s7] sm:$0xff] (!%p1464_p11)  ;;  %v740_v28 = vld [vmem:[#allocation13 + $0x48] sm:$0xff] (!%p1464_p11)  ;;  %v1826_v30 = vpack.c.bf16 (!%p1464_p11), %v572_v25, %v571_v24  ;;  %v573_v32 = vld [vmem:[#allocation12 + $0x50] sm:$0xff] (!%p1464_p11) }
 0x111   : > { %v739_v27 = vld [vmem:[#allocation13 + $0x40] sm:$0xff] (!%p1464_p11)  ;;  %1625 = vmatprep.mubr.f32.mxu0 (!%p1464_p11), %v531_v26  ;;  %v574_v33 = vld [vmem:[#allocation12 + $0x58] sm:$0xff] (!%p1464_p11)  ;;  %v741_v34 = vld [vmem:[#allocation13 + $0x50] sm:$0xff] (!%p1464_p11) }
 0x112   : > { %1817 = vmatpush3.bf16.msra.mxu0 %v1814_v8  ;;  %v547_v29 = vld [vmem:[%s2872_s8] sm:$0xff]  ;;  %v1858_v31 = vpack.c.bf16 %v740_v28, %v739_v27  ;;  %v742_v35 = vld [vmem:[#allocation13 + $0x58] sm:$0xff]  ;;  %v1830_v36 = vpack.c.bf16 %v574_v33, %v573_v32  ;;  %v576_v39 = vld [vmem:[#allocation12 + $0x68] sm:$0xff] }
 0x113   : > { %1849 = vmatpush3.bf16.msra.mxu1 %v1846_v12  ;;  %1819 = vmatprep.subr.bf16.mxu0 %v1818_v16  ;;  %v1862_v37 = vpack.c.bf16 %v742_v35, %v741_v34  ;;  %v575_v38 = vld [vmem:[#allocation12 + $0x60] sm:$0xff]  ;;  %v744_v41 = vld [vmem:[#allocation13 + $0x68] sm:$0xff]  ;;  %v577_v44 = vld [vmem:[#allocation12 + $0x70] sm:$0xff] }
 0x114   : > { %1851 = vmatprep.subr.bf16.mxu1 %v1850_v17  ;;  %1681 = vmatprep.mubr.f32.mxu1 %v547_v29  ;;  %v743_v40 = vld [vmem:[#allocation13 + $0x60] sm:$0xff]  ;;  %v1834_v42 = vpack.c.bf16 %v576_v39, %v575_v38  ;;  %v578_v45 = vld [vmem:[#allocation12 + $0x78] sm:$0xff]  ;;  %v745_v46 = vld [vmem:[#allocation13 + $0x70] sm:$0xff] }
 0x115   : > { %v1866_v43 = vpack.c.bf16 %v744_v41, %v743_v40  ;;  %v746_v47 = vld [vmem:[#allocation13 + $0x78] sm:$0xff]  ;;  %v1838_v48 = vpack.c.bf16 %v578_v45, %v577_v44  ;;  %v532_v50 = vld [vmem:[%s2866_s7 + $0x8] sm:$0xff]  ;;  %v533_v52 = vld [vmem:[%s2866_s7 + $0x10] sm:$0xff] }
 0x116   : > { %1821 = vmatpush3.bf16.msra.mxu0 %v1818_v16  ;;  %v1870_v49 = vpack.c.bf16 %v746_v47, %v745_v46  ;;  %v548_v51 = vld [vmem:[%s2872_s8 + $0x8] sm:$0xff]  ;;  %v549_v53 = vld [vmem:[%s2872_s8 + $0x10] sm:$0xff]  ;;  %v534_v54 = vld [vmem:[%s2866_s7 + $0x18] sm:$0xff] }
 0x117   : > { %1853 = vmatpush3.bf16.msra.mxu1 %v1850_v17  ;;  %1823 = vmatprep.subr.bf16.mxu0 %v1822_v22  ;;  %v550_v55 = vld [vmem:[%s2872_s8 + $0x18] sm:$0xff]  ;;  %v535_v56 = vld [vmem:[%s2866_s7 + $0x20] sm:$0xff]  ;;  %v536_v58 = vld [vmem:[%s2866_s7 + $0x28] sm:$0xff] }
 0x118   : > { %1855 = vmatprep.subr.bf16.mxu1 %v1854_v23  ;;  %v551_v57 = vld [vmem:[%s2872_s8 + $0x20] sm:$0xff]  ;;  %v552_v59 = vld [vmem:[%s2872_s8 + $0x28] sm:$0xff]  ;;  %v537_v60 = vld [vmem:[%s2866_s7 + $0x30] sm:$0xff] }
 0x119   : > { %v553_v61 = vld [vmem:[%s2872_s8 + $0x30] sm:$0xff]  ;;  %v538_v62 = vld [vmem:[%s2866_s7 + $0x38] sm:$0xff]  ;;  %v539_v0 = vld [vmem:[%s2866_s7 + $0x40] sm:$0xff] }
 0x11a   : > { %1825 = vmatpush3.bf16.msra.mxu0 %v1822_v22  ;;  %v554_v63 = vld [vmem:[%s2872_s8 + $0x38] sm:$0xff]  ;;  %v555_v1 = vld [vmem:[%s2872_s8 + $0x40] sm:$0xff]  ;;  %v540_v2 = vld [vmem:[%s2866_s7 + $0x48] sm:$0xff] }
 0x11b   : > { %1857 = vmatpush3.bf16.msra.mxu1 %v1854_v23  ;;  %1827 = vmatprep.subr.bf16.mxu0 %v1826_v30  ;;  %v556_v3 = vld [vmem:[%s2872_s8 + $0x48] sm:$0xff]  ;;  %v541_v4 = vld [vmem:[%s2866_s7 + $0x50] sm:$0xff]  ;;  %v542_v6 = vld [vmem:[%s2866_s7 + $0x58] sm:$0xff] }
 0x11c   : > { %1859 = vmatprep.subr.bf16.mxu1 %v1858_v31  ;;  %v557_v5 = vld [vmem:[%s2872_s8 + $0x50] sm:$0xff]  ;;  %v558_v7 = vld [vmem:[%s2872_s8 + $0x58] sm:$0xff]  ;;  %v543_v8 = vld [vmem:[%s2866_s7 + $0x60] sm:$0xff] }
 0x11d   : > { %v559_v9 = vld [vmem:[%s2872_s8 + $0x60] sm:$0xff]  ;;  %v544_v10 = vld [vmem:[%s2866_s7 + $0x68] sm:$0xff]  ;;  %v545_v12 = vld [vmem:[%s2866_s7 + $0x70] sm:$0xff] }
 0x11e   : > { %1829 = vmatpush3.bf16.msra.mxu0 %v1826_v30  ;;  %v560_v11 = vld [vmem:[%s2872_s8 + $0x68] sm:$0xff]  ;;  %v561_v13 = vld [vmem:[%s2872_s8 + $0x70] sm:$0xff]  ;;  %v546_v14 = vld [vmem:[%s2866_s7 + $0x78] sm:$0xff] }
 0x11f   : > { %1861 = vmatpush3.bf16.msra.mxu1 %v1858_v31  ;;  %1831 = vmatprep.subr.bf16.mxu0 %v1830_v36  ;;  %v562_v15 = vld [vmem:[%s2872_s8 + $0x78] sm:$0xff]  ;;  %v2920_v16 = vld [vmem:[%s3200_s9] ss:$0 sm:$0xff] }
 0x120   : > { %1863 = vmatprep.subr.bf16.mxu1 %v1862_v37  ;;  %v2925_v17 = vld [vmem:[%s3201_s24] ss:$0 sm:$0xff] }
 0x122   : > { %1833 = vmatpush3.bf16.msra.mxu0 %v1830_v36 }
 0x123   : > { %1865 = vmatpush3.bf16.msra.mxu1 %v1862_v37  ;;  %1835 = vmatprep.subr.bf16.mxu0 %v1834_v42 }
 0x124   : > { %1867 = vmatprep.subr.bf16.mxu1 %v1866_v43 }
 0x126   : > { %1837 = vmatpush3.bf16.msra.mxu0 %v1834_v42 }
 0x127   : > { %1869 = vmatpush3.bf16.msra.mxu1 %v1866_v43  ;;  %1839 = vmatprep.subr.bf16.mxu0 %v1838_v48 }
 0x128   : > { %1871 = vmatprep.subr.bf16.mxu1 %v1870_v49 }
 0x12a   : > { %1841 = vmatpush3.bf16.msra.mxu0 %v1838_v48 }
 0x12b   : > { %1873 = vmatpush3.bf16.msra.mxu1 %v1870_v49 }
 0x12d   : > { %1626 = vmatmul.mubr.f32.vlgmr.msra.gmra.mrb[0].mxu0 %v532_v50 }
 0x12e   : > { %1682 = vmatmul.mubr.f32.vlgmr.msra.gmra.mrb[0].mxu1 %v548_v51  ;;  %1628 = vmatprep.mubr.f32.mxu0 %v533_v52 }
 0x12f   : > { %1684 = vmatprep.mubr.f32.mxu1 %v549_v53 }
 0x131   : > { %1629 = vmatmul.mubr.f32.gmra.mrb[2].mxu0 %v534_v54 }
 0x132   : > { %1685 = vmatmul.mubr.f32.gmra.mrb[2].mxu1 %v550_v55  ;;  %1631 = vmatprep.mubr.f32.mxu0 %v535_v56 }
 0x133   : > { %1687 = vmatprep.mubr.f32.mxu1 %v551_v57 }
 0x135   : > { %1632 = vmatmul.mubr.f32.gmra.mrb[4].mxu0 %v536_v58 }
 0x136   : > { %1688 = vmatmul.mubr.f32.gmra.mrb[4].mxu1 %v552_v59  ;;  %1634 = vmatprep.mubr.f32.mxu0 %v537_v60 }
 0x137   : > { %1690 = vmatprep.mubr.f32.mxu1 %v553_v61 }
 0x139   : > { %1635 = vmatmul.mubr.f32.gmra.mrb[6].mxu0 %v538_v62 }
 0x13a   : > { %1691 = vmatmul.mubr.f32.gmra.mrb[6].mxu1 %v554_v63  ;;  %1637 = vmatprep.mubr.f32.mxu0 %v539_v0 }
 0x13b   : > { %1693 = vmatprep.mubr.f32.mxu1 %v555_v1 }
 0x13d   : > { %1638 = vmatmul.mubr.f32.gmra.mrb[8].mxu0 %v540_v2 }
 0x13e   : > { %1694 = vmatmul.mubr.f32.gmra.mrb[8].mxu1 %v556_v3  ;;  %1640 = vmatprep.mubr.f32.mxu0 %v541_v4 }
 0x13f   : > { %1696 = vmatprep.mubr.f32.mxu1 %v557_v5 }
 0x141   : > { %1641 = vmatmul.mubr.f32.gmra.mrb[10].mxu0 %v542_v6 }
 0x142   : > { %1697 = vmatmul.mubr.f32.gmra.mrb[10].mxu1 %v558_v7  ;;  %1643 = vmatprep.mubr.f32.mxu0 %v543_v8 }
 0x143   : > { %1699 = vmatprep.mubr.f32.mxu1 %v559_v9 }
 0x145   : > { %1644 = vmatmul.mubr.f32.gmra.mrb[12].mxu0 %v544_v10 }
 0x146   : > { %1700 = vmatmul.mubr.f32.gmra.mrb[12].mxu1 %v560_v11  ;;  %1646 = vmatprep.mubr.f32.mxu0 %v545_v12 }
 0x147   : > { %1702 = vmatprep.mubr.f32.mxu1 %v561_v13 }
 0x149   : > { %1647 = vmatmul.mubr.f32.gmra.mrb[14].mxu0 %v546_v14 }
 0x14a   : > { %1703 = vmatmul.mubr.f32.gmra.mrb[14].mxu1 %v562_v15 }
 0x200   : > { %v1627_v18 = vpop.f32.mrb[0].mxu0 }
 0x201   : > { %v658_v19 = vadd.f32 %v1627_v18, %v2920_v16  ;;  %v1683_v20 = vpop.f32.mrb[0].mxu1  ;;  %v652_v21 = vpop.f32.mrb[1].mxu0 }
 0x202   : > { %v826_v22 = vadd.f32 %v1683_v20, %v2925_v17  ;;  %v653_v23 = vadd.f32 %v2920_v16, %v652_v21  ;;  %v820_v24 = vpop.f32.mrb[1].mxu1 }
 0x203   : > { %900 = vst [vmem:[#allocation2 + $0x8] sm:$0xff] %v658_v19  ;;  %v821_v25 = vadd.f32 %v2925_v17, %v820_v24 }
 0x204   : > { %916 = vst [vmem:[#allocation3 + $0x8] sm:$0xff] %v826_v22  ;;  %899 = vst [vmem:[#allocation2] sm:$0xff] %v653_v23  ;;  %v1630_v26 = vpop.f32.mrb[2].mxu0 }
 0x205   : > { %915 = vst [vmem:[#allocation3] sm:$0xff] %v821_v25  ;;  %v668_v27 = vadd.f32 %v1630_v26, %v2920_v16  ;;  %v1686_v28 = vpop.f32.mrb[2].mxu1  ;;  %v662_v29 = vpop.f32.mrb[3].mxu0 }
 0x206   : > { %v836_v30 = vadd.f32 %v1686_v28, %v2925_v17  ;;  %v663_v31 = vadd.f32 %v2920_v16, %v662_v29  ;;  %v830_v32 = vpop.f32.mrb[3].mxu1 }
 0x207   : > { %902 = vst [vmem:[#allocation2 + $0x18] sm:$0xff] %v668_v27  ;;  %v831_v33 = vadd.f32 %v2925_v17, %v830_v32 }
 0x208   : > { %918 = vst [vmem:[#allocation3 + $0x18] sm:$0xff] %v836_v30  ;;  %901 = vst [vmem:[#allocation2 + $0x10] sm:$0xff] %v663_v31  ;;  %v1633_v34 = vpop.f32.mrb[4].mxu0 }
 0x209   : > { %917 = vst [vmem:[#allocation3 + $0x10] sm:$0xff] %v831_v33  ;;  %v678_v35 = vadd.f32 %v1633_v34, %v2920_v16  ;;  %v1689_v36 = vpop.f32.mrb[4].mxu1  ;;  %v672_v37 = vpop.f32.mrb[5].mxu0 }
 0x20a   : > { %v846_v38 = vadd.f32 %v1689_v36, %v2925_v17  ;;  %v673_v39 = vadd.f32 %v2920_v16, %v672_v37  ;;  %v840_v40 = vpop.f32.mrb[5].mxu1 }
 0x20b   : > { %904 = vst [vmem:[#allocation2 + $0x28] sm:$0xff] %v678_v35  ;;  %v841_v41 = vadd.f32 %v2925_v17, %v840_v40 }
 0x20c   : > { %920 = vst [vmem:[#allocation3 + $0x28] sm:$0xff] %v846_v38  ;;  %903 = vst [vmem:[#allocation2 + $0x20] sm:$0xff] %v673_v39  ;;  %v1636_v42 = vpop.f32.mrb[6].mxu0 }
 0x20d   : > { %919 = vst [vmem:[#allocation3 + $0x20] sm:$0xff] %v841_v41  ;;  %v688_v43 = vadd.f32 %v1636_v42, %v2920_v16  ;;  %v1692_v44 = vpop.f32.mrb[6].mxu1  ;;  %v682_v45 = vpop.f32.mrb[7].mxu0 }
 0x20e   : > { %v856_v46 = vadd.f32 %v1692_v44, %v2925_v17  ;;  %v683_v47 = vadd.f32 %v2920_v16, %v682_v45  ;;  %v850_v48 = vpop.f32.mrb[7].mxu1 }
 0x20f   : > { %906 = vst [vmem:[#allocation2 + $0x38] sm:$0xff] %v688_v43  ;;  %v851_v49 = vadd.f32 %v2925_v17, %v850_v48 }
 0x210   : > { %922 = vst [vmem:[#allocation3 + $0x38] sm:$0xff] %v856_v46  ;;  %905 = vst [vmem:[#allocation2 + $0x30] sm:$0xff] %v683_v47  ;;  %v1639_v50 = vpop.f32.mrb[8].mxu0 }
 0x211   : > { %921 = vst [vmem:[#allocation3 + $0x30] sm:$0xff] %v851_v49  ;;  %v698_v51 = vadd.f32 %v1639_v50, %v2920_v16  ;;  %v1695_v52 = vpop.f32.mrb[8].mxu1  ;;  %v692_v53 = vpop.f32.mrb[9].mxu0 }
 0x212   : > { %v866_v54 = vadd.f32 %v1695_v52, %v2925_v17  ;;  %v693_v55 = vadd.f32 %v2920_v16, %v692_v53  ;;  %v860_v56 = vpop.f32.mrb[9].mxu1 }
 0x213   : > { %908 = vst [vmem:[#allocation2 + $0x48] sm:$0xff] %v698_v51  ;;  %v861_v57 = vadd.f32 %v2925_v17, %v860_v56 }
 0x214   : > { %924 = vst [vmem:[#allocation3 + $0x48] sm:$0xff] %v866_v54  ;;  %907 = vst [vmem:[#allocation2 + $0x40] sm:$0xff] %v693_v55  ;;  %v1642_v58 = vpop.f32.mrb[10].mxu0 }
 0x215   : > { %923 = vst [vmem:[#allocation3 + $0x40] sm:$0xff] %v861_v57  ;;  %v708_v59 = vadd.f32 %v1642_v58, %v2920_v16  ;;  %v1698_v60 = vpop.f32.mrb[10].mxu1  ;;  %v702_v61 = vpop.f32.mrb[11].mxu0 }
 0x216   : > { %v876_v62 = vadd.f32 %v1698_v60, %v2925_v17  ;;  %v703_v63 = vadd.f32 %v2920_v16, %v702_v61  ;;  %v870_v0 = vpop.f32.mrb[11].mxu1 }
 0x217   : > { %910 = vst [vmem:[#allocation2 + $0x58] sm:$0xff] %v708_v59  ;;  %v871_v1 = vadd.f32 %v2925_v17, %v870_v0 }
 0x218   : > { %926 = vst [vmem:[#allocation3 + $0x58] sm:$0xff] %v876_v62  ;;  %909 = vst [vmem:[#allocation2 + $0x50] sm:$0xff] %v703_v63  ;;  %v1645_v2 = vpop.f32.mrb[12].mxu0 }
 0x219   : > { %925 = vst [vmem:[#allocation3 + $0x50] sm:$0xff] %v871_v1  ;;  %v718_v3 = vadd.f32 %v1645_v2, %v2920_v16  ;;  %v1701_v4 = vpop.f32.mrb[12].mxu1  ;;  %v712_v5 = vpop.f32.mrb[13].mxu0 }
 0x21a   : > { %v886_v6 = vadd.f32 %v1701_v4, %v2925_v17  ;;  %v713_v7 = vadd.f32 %v2920_v16, %v712_v5  ;;  %v880_v8 = vpop.f32.mrb[13].mxu1 }
 0x21b   : > { %912 = vst [vmem:[#allocation2 + $0x68] sm:$0xff] %v718_v3  ;;  %v881_v9 = vadd.f32 %v2925_v17, %v880_v8 }
 0x21c   : > { %928 = vst [vmem:[#allocation3 + $0x68] sm:$0xff] %v886_v6  ;;  %911 = vst [vmem:[#allocation2 + $0x60] sm:$0xff] %v713_v7  ;;  %v1648_v10 = vpop.f32.mrb[14].mxu0 }
 0x21d   : > { %927 = vst [vmem:[#allocation3 + $0x60] sm:$0xff] %v881_v9  ;;  %v728_v11 = vadd.f32 %v1648_v10, %v2920_v16  ;;  %v1704_v12 = vpop.f32.mrb[14].mxu1  ;;  %v722_v13 = vpop.f32.mrb[15].mxu0 }
 0x21e   : > { %v896_v14 = vadd.f32 %v1704_v12, %v2925_v17  ;;  %v723_v15 = vadd.f32 %v2920_v16, %v722_v13  ;;  %v890_v18 = vpop.f32.mrb[15].mxu1 }
 0x21f   : > { %914 = vst [vmem:[#allocation2 + $0x78] sm:$0xff] %v728_v11  ;;  %v891_v19 = vadd.f32 %v2925_v17, %v890_v18 }
 0x220   : > { %930 = vst [vmem:[#allocation3 + $0x78] sm:$0xff] %v896_v14  ;;  %913 = vst [vmem:[#allocation2 + $0x70] sm:$0xff] %v723_v15 }
 0x221   : > { %929 = vst [vmem:[#allocation3 + $0x70] sm:$0xff] %v891_v19 }
 0x222 PF: > { %v932_v20 = vld [vmem:[#allocation10] sm:$0xff]  ;;  %v933_v21 = vld [vmem:[#allocation10 + $0x8] sm:$0xff]  ;;  %v934_v22 = vld [vmem:[#allocation10 + $0x10] sm:$0xff]  ;;  %v2453_v23 = vmov 0.0|0.0   ;;  %vm2454_vm0 = vmmov 0   ;;  %v2455_v26 = vmov 0.0   ;;  %v1111_v9 = vlaneseq }
 0x223   : > { %1874 = vmatprep.subr.bf16.mxu0 %v2453_v23  ;;  %v1875_v24 = vpack.c.bf16 %v933_v21, %v932_v20  ;;  %v935_v25 = vld [vmem:[#allocation10 + $0x18] sm:$0xff]  ;;  %1737 = vmatprep.mubr.msk.f32.mxu0 %vm2454_vm0, %v2455_v26  ;;  %v936_v17 = vld [vmem:[#allocation10 + $0x20] sm:$0xff]  ;;  %v937_v27 = vld [vmem:[#allocation10 + $0x28] sm:$0xff]  ;;  %s3202_s22 = sld [smem:[#allocation39_spill]]  ;;  %s3203_s1 = sld [smem:[#allocation26_spill]] }
 0x224   : > { %1898 = vmatprep.subr.bf16.mxu1 %v2453_v23  ;;  %1772 = vmatprep.mubr.msk.f32.mxu1 %vm2454_vm0, %v2455_v26  ;;  %v1878_v16 = vpack.c.bf16 %v935_v25, %v934_v22  ;;  %v1025_v28 = vld [vmem:[#allocation2] sm:$0xff]  ;;  %v1026_v29 = vld [vmem:[#allocation2 + $0x8] sm:$0xff]  ;;  %v1881_v30 = vpack.c.bf16 %v937_v27, %v936_v17  ;;  %v1027_v34 = vld [vmem:[#allocation2 + $0x10] sm:$0xff]  ;;  %v1112_v10 = vand.u32 127, %v1111_v9  ;;  %s3204_s5 = sld [smem:[#allocation25_spill]]  ;;  %s3205_s12 = sld [smem:[#allocation43_spill]] }
 0x225   : > { %1876 = vmatpush3.bf16.msra.mxu0 %v1875_v24  ;;  %v1899_v31 = vpack.c.bf16 %v1026_v29, %v1025_v28  ;;  %v938_v32 = vld [vmem:[#allocation10 + $0x30] sm:$0xff]  ;;  %v939_v33 = vld [vmem:[#allocation10 + $0x38] sm:$0xff]  ;;  %v1028_v35 = vld [vmem:[#allocation2 + $0x18] sm:$0xff]  ;;  %s1248_s0 = sshll.u32 %s526_s13, 4  ;;  %s1218_s4 = scalar_lea.sflag [#allocation17], %s2853_s30  ;;  %s1249_s0 = int_to_ptr.vmem [resolvable:$true] %s1248_s0 }
 0x226   : > { %1877 = vmatprep.subr.bf16.mxu0 %v2453_v23  ;;  %v1884_v36 = vpack.c.bf16 %v939_v33, %v938_v32  ;;  %v940_v37 = vld [vmem:[#allocation10 + $0x40] sm:$0xff]  ;;  %v941_v38 = vld [vmem:[#allocation10 + $0x48] sm:$0xff]  ;;  %v1902_v39 = vpack.c.bf16 %v1028_v35, %v1027_v34  ;;  %v942_v41 = vld [vmem:[#allocation10 + $0x50] sm:$0xff]  ;;  %vm1113_vm1 = vcmp.lt.s32.totalorder %v1112_v10, 8  ;;  %s2277_s24 = scalar_lea.vmem %s1249_s0, 128  ;;  %p3206_p3 = scmp.ne.s32.totalorder %s3179_s11, 0 }
 0x227   : > { %1900 = vmatpush3.bf16.xpose.msra.mxu1 %v1899_v31  ;;  %v1887_v40 = vpack.c.bf16 %v941_v38, %v940_v37  ;;  %v943_v42 = vld [vmem:[#allocation10 + $0x58] sm:$0xff]  ;;  %v1029_v43 = vld [vmem:[#allocation2 + $0x20] sm:$0xff]  ;;  %v944_v46 = vld [vmem:[#allocation10 + $0x60] sm:$0xff]  ;;  %p2278_p13 = scmp.ne.s32.totalorder %s1249_s0, %s2277_s24 }
 0x228   : > { %1901 = vmatprep.subr.bf16.mxu1 %v2453_v23  ;;  %v1030_v44 = vld [vmem:[#allocation2 + $0x28] sm:$0xff]  ;;  %v1890_v45 = vpack.c.bf16 %v943_v42, %v942_v41  ;;  %v945_v47 = vld [vmem:[#allocation10 + $0x68] sm:$0xff]  ;;  %v946_v50 = vld [vmem:[#allocation10 + $0x70] sm:$0xff] }
 0x229   : > { %1879 = vmatpush3.bf16.msra.mxu0 %v1878_v16  ;;  %v1905_v48 = vpack.c.bf16 %v1030_v44, %v1029_v43  ;;  %v1893_v49 = vpack.c.bf16 %v945_v47, %v944_v46  ;;  %v947_v51 = vld [vmem:[#allocation10 + $0x78] sm:$0xff]  ;;  %v1031_v52 = vld [vmem:[#allocation2 + $0x30] sm:$0xff]  ;;  %v1032_v53 = vld [vmem:[#allocation2 + $0x38] sm:$0xff]  ;;  %s1470_s3 = sshll.u32 %s3203_s1, 1  ;;  %p2279_p1 = pnand %p2278_p13, %p3206_p3 }
 0x22a   : > { %1880 = vmatprep.subr.bf16.mxu0 %v2453_v23  ;;  %v1896_v54 = vpack.c.bf16 %v947_v51, %v946_v50  ;;  %v1908_v55 = vpack.c.bf16 %v1032_v53, %v1031_v52  ;;  %v931_v56 = vld [vmem:[%s445_s26] sm:$0xff]  ;;  %v1035_v60 = vld [vmem:[#allocation2 + $0x50] sm:$0xff]  ;;  %v1036_v61 = vld [vmem:[#allocation2 + $0x58] sm:$0xff]  ;;  %s2998_s7 = sadd.s32 %s3204_s5, %s1470_s3  ;;  %s2456_s26 = smov [#allocation16]  }
 0x22b   : > { %v1033_v57 = vld [vmem:[#allocation2 + $0x40] sm:$0xff]  ;;  %v1034_v58 = vld [vmem:[#allocation2 + $0x48] sm:$0xff]  ;;  %v1914_v62 = vpack.c.bf16 %v1036_v61, %v1035_v60  ;;  %v1039_v2 = vld [vmem:[#allocation2 + $0x70] sm:$0xff]  ;;  %s1471_s8 = sshll.u32 %s2998_s7, 7  ;;  %p2280_p2 = pneg %p2279_p1 }
 0x22c   : > { %v1911_v59 = vpack.c.bf16 %v1034_v58, %v1033_v57  ;;  %v1037_v63 = vld [vmem:[#allocation2 + $0x60] sm:$0xff]  ;;  %v1038_v0 = vld [vmem:[#allocation2 + $0x68] sm:$0xff]  ;;  %v1040_v3 = vld [vmem:[#allocation2 + $0x78] sm:$0xff]  ;;  %s3006_s9 = scalar_lea.hbm %s3205_s12, %s1471_s8  ;;  %s2281_s14 = sshll.u32 %s2456_s26, 4  ;;  %s2282_s14 = int_to_ptr.vmem [resolvable:$false] %s2281_s14 }
 0x22d   : > { %1882 = vmatpush3.bf16.msra.mxu0 %v1881_v30  ;;  %v1917_v1 = vpack.c.bf16 %v1038_v0, %v1037_v63  ;;  %v1920_v4 = vpack.c.bf16 %v1040_v3, %v1039_v2  ;;  %v1467_v5 = vld [vmem:[%s3202_s22] ss:$0 sm:$0xff]  ;;  %v1125_v15 = vld [vmem:[#allocation3 + $0x8] sm:$0xff]  ;;  %v1126_v18 = vld [vmem:[#allocation3 + $0x10] sm:$0xff]  ;;  %s2283_s22 = scalar_lea.vmem %s2282_s14, 256  ;;  %p2284_p6 = scmp.lt.s32.totalorder %s1249_s0, %s2282_s14 }
 0x22e   : > { %1883 = vmatprep.subr.bf16.mxu0 %v2453_v23  ;;  %v1124_v14 = vld [vmem:[#allocation3] sm:$0xff]  ;;  %v1127_v20 = vld [vmem:[#allocation3 + $0x18] sm:$0xff]  ;;  %v1129_v24 = vld [vmem:[#allocation3 + $0x28] sm:$0xff]  ;;  %p2285_p10 = scmp.lt.s32.totalorder %s2283_s22, %s2277_s24 }
 0x22f   : > { %1903 = vmatpush3.bf16.xpose.msra.mxu1 %v1902_v39  ;;  %v1923_v19 = vpack.c.bf16 %v1125_v15, %v1124_v14  ;;  %v1926_v21 = vpack.c.bf16 %v1127_v20, %v1126_v18  ;;  %v1128_v22 = vld [vmem:[#allocation3 + $0x20] sm:$0xff]  ;;  %v1131_v16 = vld [vmem:[#allocation3 + $0x38] sm:$0xff]  ;;  %v1133_v28 = vld [vmem:[#allocation3 + $0x48] sm:$0xff] }
 0x230   : > { %1904 = vmatprep.subr.bf16.mxu1 %v2453_v23  ;;  %v1929_v25 = vpack.c.bf16 %v1129_v24, %v1128_v22  ;;  %v1132_v27 = vld [vmem:[#allocation3 + $0x40] sm:$0xff]  ;;  %v1134_v34 = vld [vmem:[#allocation3 + $0x50] sm:$0xff]  ;;  %v1135_v35 = vld [vmem:[#allocation3 + $0x58] sm:$0xff]  ;;  %p2286_p8 = por %p2285_p10, %p2284_p6 }
 0x231   : > { %1885 = vmatpush3.bf16.msra.mxu0 %v1884_v36  ;;  %v1935_v29 = vpack.c.bf16 %v1133_v28, %v1132_v27  ;;  %v1938_v36 = vpack.c.bf16 %v1135_v35, %v1134_v34  ;;  %v1136_v37 = vld [vmem:[#allocation3 + $0x60] sm:$0xff]  ;;  %v1137_v38 = vld [vmem:[#allocation3 + $0x68] sm:$0xff]  ;;  %v1139_v41 = vld [vmem:[#allocation3 + $0x78] sm:$0xff] }
 0x232   : > { %1886 = vmatprep.subr.bf16.mxu0 %v2453_v23  ;;  %v1941_v39 = vpack.c.bf16 %v1137_v38, %v1136_v37  ;;  %p2287_p5 = pnand %p2286_p8, %p2280_p2 }
 0x235   : > { %1888 = vmatpush3.bf16.msra.mxu0 %v1887_v40  ;;  %v1138_v40 = vld [vmem:[#allocation3 + $0x70] sm:$0xff] }
 0x236   : > { %1889 = vmatprep.subr.bf16.mxu0 %v2453_v23  ;;  %v1944_v42 = vpack.c.bf16 %v1139_v41, %v1138_v40 }
 0x237   : > { %1906 = vmatpush3.bf16.xpose.msra.mxu1 %v1905_v48 }
 0x238   : > { %1907 = vmatprep.subr.bf16.mxu1 %v2453_v23 }
 0x239   : > { %1891 = vmatpush3.bf16.msra.mxu0 %v1890_v45 }
 0x23a   : > { %1892 = vmatprep.subr.bf16.mxu0 %v2453_v23 }
 0x23d   : > { %1894 = vmatpush3.bf16.msra.mxu0 %v1893_v49 }
 0x23e   : > { %1895 = vmatprep.subr.bf16.mxu0 %v2453_v23 }
 0x23f   : > { %1909 = vmatpush3.bf16.xpose.msra.mxu1 %v1908_v55 }
 0x240   : > { %1910 = vmatprep.subr.bf16.mxu1 %v2453_v23 }
 0x241   : > { %1897 = vmatpush3.bf16.msra.mxu0 %v1896_v54 }
 0x242   : > { %1922 = vmatprep.subr.bf16.mxu0 %v2453_v23 }
 0x244   : > { %1738 = vmatmul.mubr.f32.vlgmr.msra.gmra.mrb[0].mxu0 %v931_v56 }
 0x245   : > { %1807 = vmatprep.mubr.msk.f32.mxu0 %vm2454_vm0, %v2455_v26  ;;  %1924 = vmatpush3.bf16.msra.mxu0 %v1923_v19  ;;  %v1130_v26 = vld [vmem:[#allocation3 + $0x30] sm:$0xff] }
 0x246   : > { %1925 = vmatprep.subr.bf16.mxu0 %v2453_v23  ;;  %v1932_v17 = vpack.c.bf16 %v1131_v16, %v1130_v26 }
 0x247   : > { %1912 = vmatpush3.bf16.xpose.msra.mxu1 %v1911_v59 }
 0x248   : > { %1913 = vmatprep.subr.bf16.mxu1 %v2453_v23 }
 0x249   : > { %1927 = vmatpush3.bf16.msra.mxu0 %v1926_v21 }
 0x24a   : > { %1928 = vmatprep.subr.bf16.mxu0 %v2453_v23 }
 0x24d   : > { %1930 = vmatpush3.bf16.msra.mxu0 %v1929_v25 }
 0x24e   : > { %1931 = vmatprep.subr.bf16.mxu0 %v2453_v23 }
 0x24f   : > { %1915 = vmatpush3.bf16.xpose.msra.mxu1 %v1914_v62 }
 0x250   : > { %1916 = vmatprep.subr.bf16.mxu1 %v2453_v23 }
 0x251   : > { %1933 = vmatpush3.bf16.msra.mxu0 %v1932_v17 }
 0x252   : > { %1934 = vmatprep.subr.bf16.mxu0 %v2453_v23 }
 0x255   : > { %1936 = vmatpush3.bf16.msra.mxu0 %v1935_v29 }
 0x256   : > { %1937 = vmatprep.subr.bf16.mxu0 %v2453_v23 }
 0x257   : > { %1918 = vmatpush3.bf16.xpose.msra.mxu1 %v1917_v1 }
 0x258   : > { %1919 = vmatprep.subr.bf16.mxu1 %v2453_v23 }
 0x259   : > { %1939 = vmatpush3.bf16.msra.mxu0 %v1938_v36 }
 0x25a   : > { %1940 = vmatprep.subr.bf16.mxu0 %v2453_v23 }
 0x25d   : > { %1942 = vmatpush3.bf16.msra.mxu0 %v1941_v39 }
 0x25e   : > { %1943 = vmatprep.subr.bf16.mxu0 %v2453_v23 }
 0x25f   : > { %1921 = vmatpush3.bf16.xpose.msra.mxu1 %v1920_v4 }
 0x261   : > { %1945 = vmatpush3.bf16.msra.mxu0 %v1944_v42 }
 0x317   : > { %v1021_v6 = vpop.f32.mrb[0].mxu0 }
 0x318   : > { %v1022_v7 = vadd.f32 %v1467_v5, %v1021_v6  ;;  %v1739_v8 = vpop.f32.mrb[1].mxu0 }
 0x31a   : > { %1773 = vmatmul.mubr.f32.vlgmr.msra.gmra.mrb[0].mxu1 %v1022_v7 }
 0x3ed   : > { %v1107_v11 = vpop.f32.mrb[0].mxu1 }
 0x3ee   : > { %v1774_v12 = vpop.f32.mrb[1].mxu1  ;;  %v1114_v13 = vsel %vm1113_vm1, %v1107_v11, -inf }
 0x3ef   : > { %1115 = vmax.xlane.f32.xlu0 %v1114_v13 }
 0x47c   : > { %v1116_v30 = vpop.xlane.xlu0 %1115 }
 0x47d   : > { %v1117_v31 = vsub.f32 %v1114_v13, %v1116_v30 }
 0x47f   : > { %v1118_v32 = vmul.f32 1.442695, %v1117_v31 }
 0x481   : > { %2099 = vpow2.f32 %v1118_v32 }
 0x48b   : > { %v2100_v33 = vpop.eup %2099 }
 0x48c   : > { %1120 = vadd.xlane.f32.xlu0 %v2100_v33 }
 0x519   : > { %v1121_v43 = vpop.xlane.xlu0 %1120 }
 0x51a   : > { %2101 = vrcp.f32 %v1121_v43 }
 0x524   : > { %v2102_v44 = vpop.eup %2101 }
 0x525   : > { %v1123_v45 = vmul.f32 %v2102_v44, %v2100_v33 }
 0x527   : > { %1808 = vmatmul.mubr.f32.vlgmr.msra.gmra.mrb[2].mxu0 %v1123_v45  ;;  %1211 = vst [vmem:[%s526_s13] sm:$0xff] %v1123_v45 }
 0x528   : > { %2290 = shalt.err (!%p2287_p5)
}
 0x529   : > { %s2291_s13 = scalar_lea.hbm %s3006_s9, 128  ;;  %s2295_s3 = scalar_lea.hbm %s3205_s12, 512 }
 0x52a   : > { %p2292_p7 = scmp.ne.s32.totalorder %s3006_s9, %s2291_s13  ;;  %p2296_p4 = scmp.lt.u32.totalorder %s3006_s9, %s3205_s12 }
 0x52b   : > { %p2297_p0 = scmp.lt.u32.totalorder %s2295_s3, %s2291_s13  ;;  %p2299_p13 = scmp.lt.u32.totalorder %s2291_s13, %s3006_s9 }
 0x52c   : > { %p2293_p12 = pnand %p2292_p7, %p3206_p3 }
 0x52d   : > { %p2298_p11 = por %p2297_p0, %p2296_p4 }
 0x52e   : > { %p2294_p9 = pneg %p2293_p12 }
 0x52f   : > { %p2300_p1 = por %p2299_p13, %p2298_p11 }
 0x531   : > { %p2301_p2 = pnand %p2300_p1, %p2294_p9 }
 0x533   : > { %2304 = shalt.err (!%p2301_p2)
}
 0x534   : > { %1965 = dma.vmem_to_hbm [thread:$0]  (%p3206_p3), %s1249_s0, 128, %s3006_s9, %s1218_s4  }
 0x535   : > { %s1233_s24 = sshll.u32 %s519_s20, 4  ;;  %s3207_s22 = sld [smem:[#allocation42_spill]]  ;;  %s3037_s24 = int_to_ptr.vmem [resolvable:$true] %s1233_s24 }
 0x536   : > { %s1213_s13 = scalar_lea.sflag [#allocation6], %s2853_s30  ;;  %s2305_s3 = scalar_lea.vmem %s3037_s24, 128 }
 0x537   : > { %p2306_p6 = scmp.ne.s32.totalorder %s3037_s24, %s2305_s3  ;;  %s2457_s7 = smov [#allocation15]  }
 0x538   : > { %s2309_s9 = sshll.u32 %s2457_s7, 4  ;;  %s2310_s9 = int_to_ptr.vmem [resolvable:$false] %s2309_s9 }
 0x539   : > { %p2307_p10 = pnand %p2306_p6, %p3206_p3  ;;  %p2312_p5 = scmp.lt.s32.totalorder %s3037_s24, %s2310_s9 }
 0x53b   : > { %s3208_s1 = smov %s3207_s22  ;;  %s3035_s5 = scalar_lea.hbm %s3207_s22, %s1471_s8 }
 0x53c   : > { %p2308_p8 = pneg %p2307_p10  ;;  %s2311_s8 = scalar_lea.vmem %s2310_s9, 256 }
 0x53d   : > { %p2313_p7 = scmp.lt.s32.totalorder %s2311_s8, %s2305_s3 }
 0x53f   : > { %p2314_p12 = por %p2313_p7, %p2312_p5 }
 0x541   : > { %p2315_p9 = pnand %p2314_p12, %p2308_p8 }
 0x5fa   : > { %v1206_v23 = vpop.f32.mrb[2].mxu0 }
 0x5fb   : > { %1210 = vst [vmem:[%s519_s20] sm:$0xff] %v1206_v23  ;;  %v1809_v46 = vpop.f32.mrb[3].mxu0 }
 0x5fc   : > { %2318 = shalt.err (!%p2315_p9)
}
 0x5fd   : > { %s2319_s30 = scalar_lea.hbm %s3035_s5, 128  ;;  %s2323_s0 = scalar_lea.hbm %s3208_s1, 512 }
 0x5fe   : > { %p2320_p4 = scmp.ne.s32.totalorder %s3035_s5, %s2319_s30  ;;  %p2324_p13 = scmp.lt.u32.totalorder %s3035_s5, %s3208_s1 }
 0x5ff   : > { %p2325_p1 = scmp.lt.u32.totalorder %s2323_s0, %s2319_s30  ;;  %p2327_p6 = scmp.lt.u32.totalorder %s2319_s30, %s3035_s5 }
 0x600   : > { %p2321_p0 = pnand %p2320_p4, %p3206_p3 }
 0x601   : > { %p2326_p2 = por %p2325_p1, %p2324_p13 }
 0x602   : > { %p2322_p11 = pneg %p2321_p0 }
 0x603   : > { %p2328_p10 = por %p2327_p6, %p2326_p2 }
 0x605   : > { %p2329_p8 = pnand %p2328_p10, %p2322_p11 }
 0x607   : > { %2332 = shalt.err (!%p2329_p8)
}
 0x608   : > { %1964 = dma.vmem_to_hbm [thread:$0]  (%p3206_p3), %s3037_s24, 128, %s3035_s5, %s1213_s13  }
 0x609 PF: > { %p2002_p5 = scmp.ge.s32.totalorder %s2443_s23, 2  ;;  %s1260_s10 = sand.u32 1, %s2415_s16  }
 0x60a   : > { %p3209_p7 = scmp.ne.s32.totalorder %s3180_s28, 0  ;;  %s1261_s26 = scalar_lea.sflag [#allocation6], %s1260_s10 }
 0x60c   : > { %p1989_p12 = pnand %p2002_p5, %p3209_p7 }
 0x60e   : > { %2394 = dma.done.wait (!%p1989_p12), %s1261_s26, 128  }
 0x60f   : > { %2396 = vsyncadd (!%p1989_p12), %s1261_s26, 4294967168  ;;  %s1270_s14 = scalar_lea.sflag [#allocation17], %s1260_s10 }
 0x610   : > { %2398 = dma.done.wait (!%p1989_p12), %s1270_s14, 128  }
 0x611   : > { %2400 = vsyncadd (!%p1989_p12), %s1270_s14, 4294967168  ;;  %s35_s23 = sadd.s32 1, %s2443_s23   ;;  %s3210_s13 = sld [smem:[#allocation24_spill]] }
 0x612   : > { %p32_p9 = scmp.ge.s32.totalorder %s35_s23, 6   ;;  %s3211_s20 = sld [smem:[#allocation27_spill]] }
 0x613   : > { %s3212_s11 = sld [smem:[#allocation32_spill]]  ;;  %s3213_s22 = sld [smem:[#allocation33_spill]] }
 0x614   : > { %s3214_s14 = smov %s2411_s15  ;;  %s3215_s15 = smov %s2768_s25 }
 0x615   : > { %s3216_s16 = smov %s2419_s17  ;;  %s3217_s17 = smov %s2423_s18 }
 0x616   : > { %s3218_s18 = smov %s2771_s19  ;;  %s3219_s19 = smov %s2435_s21 }
 0x617   :  { %34 = sbr.rel (!%p32_p9) target bundleno = 26 (0x1a), region = 158 }
 0x619   : > { %s3220_s21 = smov %s3212_s11 }
 0x61e   :  { %1275 = vsyncpa [#allocation5], 1 }
 0x61f   :  { %1277 = vsyncpa [#allocation5 + $0x1], 1 }
 0x620   :  { %1278 = vsyncpa [#allocation8], 1 }
 0x621   :  { %1280 = vsyncpa [#allocation8 + $0x1], 1 }
 0x622   :  { %1281 = vsyncpa [#allocation11], 1 }
 0x623   :  { %1282 = vsyncpa [#allocation14], 1 }
 0x624   :  { %1283 = vsyncpa [#allocation6], 1 }
 0x625   :  { %1285 = vsyncpa [#allocation6 + $0x1], 1 }
 0x626   :  { %1286 = vsyncpa [#allocation17], 1 }
 0x627   :  { %1288 = vsyncpa [#allocation17 + $0x1], 1 }

</bundles_post_ra>
